<compile_context>
chip_gen: v6e
topology: v6e:2x2x1
jax: 0.10.0
libtpu: 0.0.40
codegen_flags: <defaults>
</compile_context>

<pallas_src>
import functools

import jax
import jax.numpy as jnp
import numpy as np
from jax import lax
from jax.experimental import pallas as pl
from jax.experimental.pallas import tpu as pltpu

LANE = 128


def _round_up(x, m):
    return (x + m - 1) // m * m


def _pick_batch_tile(B, s_pad, l_pad, E, k_max, n_pad, n_out_pad, itemsize):
    """Batch-tile heuristic: HBM amortization, v7x-safe VMEM, megacore grid."""
    row_in = s_pad * E * itemsize                     # emb bytes per batch row
    # Amortize the ~0.35us fixed per-step pipeline cost: target >= ~2 MiB of
    # emb traffic per grid step (~2us of HBM time on v6e).
    tb_hbm = pl.cdiv(2 << 20, row_in)
    # v7x-safe VMEM budget (64 MiB physical; keep the batch tile well under it):
    # double-buffered emb tile + f32 im2col/conv intermediates + out tile.
    per_row_vmem = (2 * row_in
                    + l_pad * (k_max * E + n_pad) * 4
                    + 2 * n_out_pad * 4)
    tb_vmem = (36 << 20) // per_row_vmem
    # Megacore (v7x has 2 TensorCores): keep >= 2 grid steps when B allows it.
    tb_grid = pl.cdiv(B, 2)
    tb = max(8, min(tb_hbm, tb_vmem, tb_grid, B, 1024))
    return _round_up(tb, 8)


def _textcnn_kernel(k_max, l_pad, emb_ref, valid_ref, wc_ref, bc_ref,
                    wl_ref, bl_ref, out_ref):
    """One batch tile: im2col conv -> mask -> max-pool -> bias+ReLU -> linear.

    emb_ref  : [TB, S_pad, E]        compute dtype
    valid_ref: [1, N_pad]      int32 #valid window positions per conv channel
    wc_ref   : [k_max*E, N_pad]      packed conv weights (all kernel sizes)
    bc_ref   : [1, N_pad]      f32   packed conv biases
    wl_ref   : [N_pad, N_out_pad] f32 packed (pre-transposed) linear weight
    bl_ref   : [1, N_out_pad]  f32   padded linear bias
    out_ref  : [TB, N_out_pad] f32
    """
    tb = emb_ref.shape[0]
    e = emb_ref.shape[-1]

    # im2col via ref-level shifted reads: X[b, t, i*E + e] = emb[b, t + i, e].
    x = jnp.concatenate(
        [emb_ref[:, pl.ds(i, l_pad), :] for i in range(k_max)], axis=-1)
    x2 = x.reshape(tb * l_pad, k_max * e)             # [TB*L_pad, k_max*E]

    # All conv kernel sizes in a single MXU matmul (f32 accumulate).
    conv = jnp.dot(x2, wc_ref[...], preferred_element_type=jnp.float32)
    n_pad = conv.shape[-1]
    conv = conv.reshape(tb, l_pad, n_pad)             # [TB, L_pad, N_pad]

    # Additive -1e30 mask for window positions a given kernel size can't reach
    # (kept in f32; the -1e30 trick relies on f32-range accumulation).
    t_idx = lax.broadcasted_iota(jnp.int32, (l_pad, n_pad), 0)
    neg = jnp.where(t_idx < valid_ref[...], 0.0, -1e30)
    conv = conv + neg[None]

    # Global max-pool over time, then bias + ReLU (exact post-pool rewrite:
    # bias constant along the pooled axis, ReLU monotone).
    pooled = jnp.max(conv, axis=1)                    # [TB, N_pad]
    feat = jnp.maximum(pooled + bc_ref[...], 0.0)

    # TODO(synk): dropout omitted (eval-mode identity).
    # Final linear kept in f32 (negligible FLOPs; avoids a second rounding step).
    out = jnp.dot(feat, wl_ref[...], preferred_element_type=jnp.float32)
    out_ref[...] = (out + bl_ref[...]).astype(out_ref.dtype)


def pack_textcnn_params(params, kernel_sizes, out_channel, output_size, *,
                        compute_dtype=jnp.bfloat16):
    """One-time packing of all weights into lane-dense slabs (hoisted out of
    the per-call path)."""
    kernel_sizes = tuple(kernel_sizes)
    k_max = max(kernel_sizes)
    E = params["embedding"].shape[1]
    n_feat = len(kernel_sizes) * out_channel
    n_pad = _round_up(n_feat, LANE)
    n_out_pad = _round_up(output_size, LANE)

    wc = np.zeros((k_max * E, n_pad), np.float32)
    bc = np.zeros((1, n_pad), np.float32)
    for idx, k in enumerate(kernel_sizes):
        w = np.asarray(params[f"conv{k}_w"], np.float32)        # [k, E, C]
        c0 = idx * out_channel
        wc[: k * E, c0:c0 + out_channel] = w.reshape(k * E, out_channel)
        bc[0, c0:c0 + out_channel] = np.asarray(params[f"conv{k}_b"],
                                                np.float32)[0]

    wl = np.zeros((n_pad, n_out_pad), np.float32)
    wl[:n_feat, :output_size] = np.asarray(params["linear_w"], np.float32).T
    bl = np.zeros((1, n_out_pad), np.float32)
    bl[0, :output_size] = np.asarray(params["linear_b"], np.float32)[0]

    return {
        # Table cast hoisted here so the per-call gather emits compute dtype.
        "table": jnp.asarray(params["embedding"]).astype(compute_dtype),
        "wc": jnp.asarray(wc).astype(compute_dtype),
        "bc": jnp.asarray(bc),
        "wl": jnp.asarray(wl),          # stays f32 (final matmul stays f32)
        "bl": jnp.asarray(bl),
        "kernel_sizes": kernel_sizes,
        "out_channel": out_channel,
        "output_size": output_size,
        "embedding_size": E,
        "n_feat": n_feat,
        "n_pad": n_pad,
        "n_out_pad": n_out_pad,
        "compute_dtype": jnp.dtype(compute_dtype),
    }


def textcnn_forward(tokens, packed, *, batch_tile=None):
    kernel_sizes = packed["kernel_sizes"]
    out_channel = packed["out_channel"]
    output_size = packed["output_size"]
    E = packed["embedding_size"]
    n_pad = packed["n_pad"]
    n_out_pad = packed["n_out_pad"]
    compute_dtype = packed["compute_dtype"]
    itemsize = jnp.dtype(compute_dtype).itemsize

    k_max = max(kernel_sizes)
    k_min = min(kernel_sizes)

    B, S = tokens.shape
    assert S >= k_max, "sequence length must be >= the largest conv kernel size"

    # Pooled-position rounding: 16 for packed bf16 sublanes, 8 for f32.
    sub = 16 if itemsize == 2 else 8
    l_pad = _round_up(S - k_min + 1, sub)
    s_pad = l_pad + k_max - 1

    if batch_tile is None:
        tb = _pick_batch_tile(B, s_pad, l_pad, E, k_max, n_pad, n_out_pad,
                              itemsize)
    else:
        tb = _round_up(min(batch_tile, max(B, 8)), 8)
    b_pad = _round_up(B, tb)
    grid = b_pad // tb

    # Single gather in compute dtype on padded token ids -> the [B,S,E] stream
    # is written to HBM exactly once.  Pad-id-0 rows only feed masked window
    # positions or padded batch rows (sliced off below), so they are harmless.
    tok = jnp.pad(tokens, ((0, b_pad - B), (0, s_pad - S)))
    emb = packed["table"][tok]                        # [b_pad, s_pad, E]

    # Tiny per-channel valid-window lengths (depends on S -> built per call).
    valid_np = np.zeros((1, n_pad), np.int32)
    for idx, k in enumerate(kernel_sizes):
        valid_np[0, idx * out_channel:(idx + 1) * out_channel] = S - k + 1
    valid = jnp.asarray(valid_np)

    # Explicit scoped-VMEM limit from the tile footprint (+40% headroom),
    # clamped to stay v7x-safe (64 MiB physical VMEM per TensorCore).
    tile_bytes = tb * (2 * s_pad * E * itemsize
                       + l_pad * (k_max * E + n_pad) * 4
                       + 2 * n_out_pad * 4)
    const_bytes = 2 * (k_max * E * n_pad * itemsize
                       + n_pad * n_out_pad * 4
                       + 3 * (n_pad + n_out_pad) * 4)
    vmem_limit = int(1.4 * (tile_bytes + const_bytes)) + (2 << 20)
    vmem_limit = min(max(vmem_limit, 32 << 20), 64 << 20)

    flops = (2 * b_pad * l_pad * (k_max * E) * n_pad
             + 2 * b_pad * n_pad * n_out_pad)
    bytes_accessed = (b_pad * s_pad * E * itemsize
                      + k_max * E * n_pad * itemsize
                      + (n_pad * n_out_pad + 3 * n_pad + 2 * n_out_pad) * 4
                      + b_pad * n_out_pad * 4)

    kernel = functools.partial(_textcnn_kernel, k_max, l_pad)

    def run(const_mode):
        def cspec(shape):
            idx_map = lambda b: (0,) * len(shape)
            if const_mode is None:
                return pl.BlockSpec(shape, idx_map)
            return pl.BlockSpec(shape, idx_map, pipeline_mode=const_mode)

        return pl.pallas_call(
            kernel,
            out_shape=jax.ShapeDtypeStruct((b_pad, n_out_pad), jnp.float32),
            grid_spec=pltpu.PrefetchScalarGridSpec(
                num_scalar_prefetch=0,
                grid=(grid,),
                in_specs=[
                    pl.BlockSpec((tb, s_pad, E), lambda b: (b, 0, 0)),
                    cspec((1, n_pad)),                # per-channel valid lengths
                    cspec((k_max * E, n_pad)),        # packed conv weights
                    cspec((1, n_pad)),                # packed conv biases
                    cspec((n_pad, n_out_pad)),        # packed linear weight
                    cspec((1, n_out_pad)),            # linear bias
                ],
                out_specs=pl.BlockSpec((tb, n_out_pad), lambda b: (b, 0)),
            ),
            compiler_params=pltpu.CompilerParams(
                dimension_semantics=("parallel",),
                vmem_limit_bytes=vmem_limit),
            cost_estimate=pl.CostEstimate(
                flops=flops, transcendentals=0, bytes_accessed=bytes_accessed),
        )(emb, valid, packed["wc"], packed["bc"], packed["wl"], packed["bl"])

    try:
        # Constant operands single-buffered (their block index never changes);
        # reclaims VMEM that lets the batch tile grow for large E/out_channel.
        out = run(pl.Buffered(1))
    except Exception:  # pragma: no cover - jax without BlockSpec.pipeline_mode
        out = run(None)

    return out[:B, :output_size]


def textcnn_reference(tokens, params, kernel_sizes):
    """Pure-JAX reference mirroring the PyTorch forward (eval mode)."""
    emb = params["embedding"][tokens].astype(jnp.float32)        # [B, S, E]
    B, S, E = emb.shape
    feats = []
    for k in kernel_sizes:
        w = params[f"conv{k}_w"]          # [k, E, C]
        b = params[f"conv{k}_b"]          # [1, C]
        L = S - k + 1
        acc = jnp.zeros((B, L, w.shape[-1]), jnp.float32)
        for i in range(k):
            acc = acc + jnp.einsum("ble,ec->blc", emb[:, i:i + L, :], w[i])
        acc = jnp.maximum(acc + b[None], 0.0)
        feats.append(jnp.max(acc, axis=1))                       # [B, C]
    feat = jnp.concatenate(feats, axis=1)
    return feat @ params["linear_w"].T + params["linear_b"]


def init_params(key, vocab_size, embedding_size, kernel_sizes, out_channel,
                output_size):
    keys = jax.random.split(key, 3 + 2 * len(kernel_sizes))
    params = {}
    params["embedding"] = 0.1 * jax.random.normal(
        keys[0], (vocab_size, embedding_size), jnp.float32)
    for i, k in enumerate(kernel_sizes):
        # PyTorch Conv2d weight [C_out, 1, k, E]; stored here as [k, E, C_out].
        params[f"conv{k}_w"] = 0.1 * jax.random.normal(
            keys[1 + 2 * i], (k, embedding_size, out_channel), jnp.float32)
        params[f"conv{k}_b"] = 0.1 * jax.random.normal(
            keys[2 + 2 * i], (1, out_channel), jnp.float32)
    n_feat = len(kernel_sizes) * out_channel
    params["linear_w"] = 0.1 * jax.random.normal(
        keys[-2], (output_size, n_feat), jnp.float32)            # PyTorch [out, in]
    params["linear_b"] = 0.1 * jax.random.normal(
        keys[-1], (1, output_size), jnp.float32)
    return params


if __name__ == "__main__":
    jax.config.update("jax_default_matmul_precision", "highest")

    # Small, module-consistent config.
    batch, seq_len = 2, 16
    vocab_size, embedding_size = 50, 32
    input_channel, output_channel = 1, 8
    kernel_sizes = (2, 3, 4)
    output_size = 4

    key = jax.random.PRNGKey(0)
    pkey, tkey = jax.random.split(key)
    params = init_params(pkey, vocab_size, embedding_size, kernel_sizes,
                         output_channel, output_size)
    tokens = jax.random.randint(tkey, (batch, seq_len), 0, vocab_size,
                                dtype=jnp.int32)

    ref = textcnn_reference(tokens, params, kernel_sizes)

    # f32 operand path (tight check).
    packed_f32 = pack_textcnn_params(params, kernel_sizes, output_channel,
                                     output_size, compute_dtype=jnp.float32)
    out_f32 = jax.block_until_ready(textcnn_forward(tokens, packed_f32))
    assert out_f32.shape == (batch, output_size)
    assert jnp.allclose(out_f32, ref, atol=1e-4, rtol=1e-4)

    # bf16 operand path (the default; f32 accumulation, looser check).
    packed_bf16 = pack_textcnn_params(params, kernel_sizes, output_channel,
                                      output_size)
    out_bf16 = jax.block_until_ready(textcnn_forward(tokens, packed_bf16))
    assert out_bf16.shape == (batch, output_size)
    assert jnp.allclose(out_bf16, ref, atol=1e-2, rtol=1e-2)

    print("KERNEL_OK")
</pallas_src>

<mosaic_0001>
module attributes {stable_mosaic.version = 11 : i64} {
  func.func @_textcnn_kernel(%arg0: i32, %arg1: memref<8x19x32xf32, #tpu.memory_space<vmem>>, %arg2: memref<1x128xi32, #tpu.memory_space<vmem>>, %arg3: memref<128x128xf32, #tpu.memory_space<vmem>>, %arg4: memref<1x128xf32, #tpu.memory_space<vmem>>, %arg5: memref<128x128xf32, #tpu.memory_space<vmem>>, %arg6: memref<1x128xf32, #tpu.memory_space<vmem>>, %arg7: memref<8x128xf32, #tpu.memory_space<vmem>>) attributes {dimension_semantics = [#tpu.dimension_semantics<parallel>], iteration_bounds = array<i64: 1>, scalar_prefetch = 0 : i64, scratch_operands = 0 : i64, tpu.core_type = #tpu.core_type<tc>, window_params = [{transform_indices = @transform_0, window_bounds = array<i64: 8, 19, 32>}, {pipeline_mode = #tpu.pipeline_mode<synchronous>, transform_indices = @transform_1, window_bounds = array<i64: 1, 128>}, {pipeline_mode = #tpu.pipeline_mode<synchronous>, transform_indices = @transform_2, window_bounds = array<i64: 128, 128>}, {pipeline_mode = #tpu.pipeline_mode<synchronous>, transform_indices = @transform_3, window_bounds = array<i64: 1, 128>}, {pipeline_mode = #tpu.pipeline_mode<synchronous>, transform_indices = @transform_4, window_bounds = array<i64: 128, 128>}, {pipeline_mode = #tpu.pipeline_mode<synchronous>, transform_indices = @transform_5, window_bounds = array<i64: 1, 128>}, {transform_indices = @transform_6, window_bounds = array<i64: 8, 128>}]} {
    %c0 = arith.constant 0 : index
    %c0_0 = arith.constant 0 : index
    %c0_1 = arith.constant 0 : index
    %0 = vector.load %arg1[%c0, %c0_0, %c0_1] : memref<8x19x32xf32, #tpu.memory_space<vmem>>, vector<8x16x32xf32>
    %c0_2 = arith.constant 0 : index
    %c1 = arith.constant 1 : index
    %c0_3 = arith.constant 0 : index
    %1 = vector.load %arg1[%c0_2, %c1, %c0_3] : memref<8x19x32xf32, #tpu.memory_space<vmem>>, vector<8x16x32xf32>
    %c0_4 = arith.constant 0 : index
    %c2 = arith.constant 2 : index
    %c0_5 = arith.constant 0 : index
    %2 = vector.load %arg1[%c0_4, %c2, %c0_5] : memref<8x19x32xf32, #tpu.memory_space<vmem>>, vector<8x16x32xf32>
    %c0_6 = arith.constant 0 : index
    %c3 = arith.constant 3 : index
    %c0_7 = arith.constant 0 : index
    %3 = vector.load %arg1[%c0_6, %c3, %c0_7] : memref<8x19x32xf32, #tpu.memory_space<vmem>>, vector<8x16x32xf32>
    %4 = tpu.concatenate %0, %1, %2, %3 in 2 : vector<8x16x32xf32>, vector<8x16x32xf32>, vector<8x16x32xf32>, vector<8x16x32xf32> -> vector<8x16x128xf32>
    %5 = vector.shape_cast %4 : vector<8x16x128xf32> to vector<128x128xf32>
    %c0_8 = arith.constant 0 : index
    %c0_9 = arith.constant 0 : index
    %6 = vector.load %arg3[%c0_8, %c0_9] : memref<128x128xf32, #tpu.memory_space<vmem>>, vector<128x128xf32>
    %cst = arith.constant dense<0.000000e+00> : vector<128x128xf32>
    %7 = tpu.matmul %5, %6, %cst {dimension_numbers = #tpu.dot_dimension_numbers<[1], [0], [0], [1], [0, 0, 1, 1], [], []>, precision = #tpu.contract_precision<fp32>} : vector<128x128xf32>, vector<128x128xf32>, vector<128x128xf32> -> vector<128x128xf32>
    %8 = vector.shape_cast %7 : vector<128x128xf32> to vector<8x16x128xf32>
    %9 = tpu.iota {dimensions = array<i32: 0>} : vector<16x128xi32>
    %c0_10 = arith.constant 0 : index
    %c0_11 = arith.constant 0 : index
    %10 = vector.load %arg2[%c0_10, %c0_11] : memref<1x128xi32, #tpu.memory_space<vmem>>, vector<1x128xi32>
    %11 = vector.broadcast %10 : vector<1x128xi32> to vector<16x128xi32>
    %12 = arith.cmpi slt, %9, %11 : vector<16x128xi32>
    %cst_12 = arith.constant 0.000000e+00 : f32
    %cst_13 = arith.constant -1.000000e+30 : f32
    %13 = vector.broadcast %cst_12 : f32 to vector<16x128xf32>
    %14 = vector.broadcast %cst_13 : f32 to vector<16x128xf32>
    %15 = arith.select %12, %13, %14 : vector<16x128xi1>, vector<16x128xf32>
    %16 = vector.shape_cast %15 : vector<16x128xf32> to vector<1x16x128xf32>
    %17 = vector.broadcast %16 : vector<1x16x128xf32> to vector<8x16x128xf32>
    %18 = arith.addf %8, %17 : vector<8x16x128xf32>
    %cst_14 = arith.constant dense<0xFF800000> : vector<8x128xf32>
    %19 = vector.multi_reduction <maximumf>, %18, %cst_14 [1] : vector<8x16x128xf32> to vector<8x128xf32>
    %c0_15 = arith.constant 0 : index
    %c0_16 = arith.constant 0 : index
    %20 = vector.load %arg4[%c0_15, %c0_16] : memref<1x128xf32, #tpu.memory_space<vmem>>, vector<1x128xf32>
    %21 = vector.broadcast %20 : vector<1x128xf32> to vector<8x128xf32>
    %22 = arith.addf %19, %21 : vector<8x128xf32>
    %cst_17 = arith.constant 0.000000e+00 : f32
    %23 = vector.broadcast %cst_17 : f32 to vector<8x128xf32>
    %24 = arith.maximumf %22, %23 : vector<8x128xf32>
    %c0_18 = arith.constant 0 : index
    %c0_19 = arith.constant 0 : index
    %25 = vector.load %arg5[%c0_18, %c0_19] : memref<128x128xf32, #tpu.memory_space<vmem>>, vector<128x128xf32>
    %cst_20 = arith.constant dense<0.000000e+00> : vector<8x128xf32>
    %26 = tpu.matmul %24, %25, %cst_20 {dimension_numbers = #tpu.dot_dimension_numbers<[1], [0], [0], [1], [0, 0, 1, 1], [], []>, precision = #tpu.contract_precision<fp32>} : vector<8x128xf32>, vector<128x128xf32>, vector<8x128xf32> -> vector<8x128xf32>
    %c0_21 = arith.constant 0 : index
    %c0_22 = arith.constant 0 : index
    %27 = vector.load %arg6[%c0_21, %c0_22] : memref<1x128xf32, #tpu.memory_space<vmem>>, vector<1x128xf32>
    %28 = vector.broadcast %27 : vector<1x128xf32> to vector<8x128xf32>
    %29 = arith.addf %26, %28 : vector<8x128xf32>
    %c0_23 = arith.constant 0 : index
    %c0_24 = arith.constant 0 : index
    %30 = vector.load %arg7[%c0_23, %c0_24] : memref<8x128xf32, #tpu.memory_space<vmem>>, vector<8x128xf32>
    tpu.vector_store %arg7[%c0_23, %c0_24], %29 {strides = array<i32>} : memref<8x128xf32, #tpu.memory_space<vmem>>, vector<8x128xf32>,
    return
  }
  func.func @transform_0(%arg0: i32) -> (i32, i32, i32) {
    %c0_i32 = arith.constant 0 : i32
    %c0_i32_0 = arith.constant 0 : i32
    %c0_i32_1 = arith.constant 0 : i32
    return %arg0, %c0_i32, %c0_i32_0 : i32, i32, i32
  }
  func.func @transform_1(%arg0: i32) -> (i32, i32) {
    %c0_i32 = arith.constant 0 : i32
    %c0_i32_0 = arith.constant 0 : i32
    %c0_i32_1 = arith.constant 0 : i32
    return %c0_i32, %c0_i32_0 : i32, i32
  }
  func.func @transform_2(%arg0: i32) -> (i32, i32) {
    %c0_i32 = arith.constant 0 : i32
    %c0_i32_0 = arith.constant 0 : i32
    %c0_i32_1 = arith.constant 0 : i32
    return %c0_i32, %c0_i32_0 : i32, i32
  }
  func.func @transform_3(%arg0: i32) -> (i32, i32) {
    %c0_i32 = arith.constant 0 : i32
    %c0_i32_0 = arith.constant 0 : i32
    %c0_i32_1 = arith.constant 0 : i32
    return %c0_i32, %c0_i32_0 : i32, i32
  }
  func.func @transform_4(%arg0: i32) -> (i32, i32) {
    %c0_i32 = arith.constant 0 : i32
    %c0_i32_0 = arith.constant 0 : i32
    %c0_i32_1 = arith.constant 0 : i32
    return %c0_i32, %c0_i32_0 : i32, i32
  }
  func.func @transform_5(%arg0: i32) -> (i32, i32) {
    %c0_i32 = arith.constant 0 : i32
    %c0_i32_0 = arith.constant 0 : i32
    %c0_i32_1 = arith.constant 0 : i32
    return %c0_i32, %c0_i32_0 : i32, i32
  }
  func.func @transform_6(%arg0: i32) -> (i32, i32) {
    %c0_i32 = arith.constant 0 : i32
    %c0_i32_0 = arith.constant 0 : i32
    return %arg0, %c0_i32 : i32, i32
  }
}

module attributes {stable_mosaic.version = 11 : i64} {
  func.func @_textcnn_kernel(%arg0: i32, %arg1: memref<8x19x32xf32, #tpu.memory_space<vmem>>, %arg2: memref<1x128xi32, #tpu.memory_space<vmem>>, %arg3: memref<128x128xf32, #tpu.memory_space<vmem>>, %arg4: memref<1x128xf32, #tpu.memory_space<vmem>>, %arg5: memref<128x128xf32, #tpu.memory_space<vmem>>, %arg6: memref<1x128xf32, #tpu.memory_space<vmem>>, %arg7: memref<8x128xf32, #tpu.memory_space<vmem>>) attributes {dimension_semantics = [#tpu.dimension_semantics<parallel>], iteration_bounds = array<i64: 1>, scalar_prefetch = 0 : i64, scratch_operands = 0 : i64, tpu.core_type = #tpu.core_type<tc>, window_params = [{transform_indices = @transform_0, window_bounds = array<i64: 8, 19, 32>}, {pipeline_mode = #tpu.pipeline_mode<synchronous>, transform_indices = @transform_1, window_bounds = array<i64: 1, 128>}, {pipeline_mode = #tpu.pipeline_mode<synchronous>, transform_indices = @transform_2, window_bounds = array<i64: 128, 128>}, {pipeline_mode = #tpu.pipeline_mode<synchronous>, transform_indices = @transform_3, window_bounds = array<i64: 1, 128>}, {pipeline_mode = #tpu.pipeline_mode<synchronous>, transform_indices = @transform_4, window_bounds = array<i64: 128, 128>}, {pipeline_mode = #tpu.pipeline_mode<synchronous>, transform_indices = @transform_5, window_bounds = array<i64: 1, 128>}, {transform_indices = @transform_6, window_bounds = array<i64: 8, 128>}]} {
    %c0 = arith.constant 0 : index
    %c0_0 = arith.constant 0 : index
    %c0_1 = arith.constant 0 : index
    %0 = vector.load %arg1[%c0, %c0_0, %c0_1] : memref<8x19x32xf32, #tpu.memory_space<vmem>>, vector<8x16x32xf32>
    %c0_2 = arith.constant 0 : index
    %c1 = arith.constant 1 : index
    %c0_3 = arith.constant 0 : index
    %1 = vector.load %arg1[%c0_2, %c1, %c0_3] : memref<8x19x32xf32, #tpu.memory_space<vmem>>, vector<8x16x32xf32>
    %c0_4 = arith.constant 0 : index
    %c2 = arith.constant 2 : index
    %c0_5 = arith.constant 0 : index
    %2 = vector.load %arg1[%c0_4, %c2, %c0_5] : memref<8x19x32xf32, #tpu.memory_space<vmem>>, vector<8x16x32xf32>
    %c0_6 = arith.constant 0 : index
    %c3 = arith.constant 3 : index
    %c0_7 = arith.constant 0 : index
    %3 = vector.load %arg1[%c0_6, %c3, %c0_7] : memref<8x19x32xf32, #tpu.memory_space<vmem>>, vector<8x16x32xf32>
    %4 = tpu.concatenate %0, %1, %2, %3 in 2 : vector<8x16x32xf32>, vector<8x16x32xf32>, vector<8x16x32xf32>, vector<8x16x32xf32> -> vector<8x16x128xf32>
    %5 = vector.shape_cast %4 : vector<8x16x128xf32> to vector<128x128xf32>
    %c0_8 = arith.constant 0 : index
    %c0_9 = arith.constant 0 : index
    %6 = vector.load %arg3[%c0_8, %c0_9] : memref<128x128xf32, #tpu.memory_space<vmem>>, vector<128x128xf32>
    %cst = arith.constant dense<0.000000e+00> : vector<128x128xf32>
    %7 = tpu.matmul %5, %6, %cst {dimension_numbers = #tpu.dot_dimension_numbers<[1], [0], [0], [1], [0, 0, 1, 1], [], []>, precision = #tpu.contract_precision<fp32>} : vector<128x128xf32>, vector<128x128xf32>, vector<128x128xf32> -> vector<128x128xf32>
    %8 = vector.shape_cast %7 : vector<128x128xf32> to vector<8x16x128xf32>
    %9 = tpu.iota {dimensions = array<i32: 0>} : vector<16x128xi32>
    %c0_10 = arith.constant 0 : index
    %c0_11 = arith.constant 0 : index
    %10 = vector.load %arg2[%c0_10, %c0_11] : memref<1x128xi32, #tpu.memory_space<vmem>>, vector<1x128xi32>
    %11 = vector.broadcast %10 : vector<1x128xi32> to vector<16x128xi32>
    %12 = arith.cmpi slt, %9, %11 : vector<16x128xi32>
    %cst_12 = arith.constant 0.000000e+00 : f32
    %cst_13 = arith.constant -1.000000e+30 : f32
    %13 = vector.broadcast %cst_12 : f32 to vector<16x128xf32>
    %14 = vector.broadcast %cst_13 : f32 to vector<16x128xf32>
    %15 = arith.select %12, %13, %14 : vector<16x128xi1>, vector<16x128xf32>
    %16 = vector.shape_cast %15 : vector<16x128xf32> to vector<1x16x128xf32>
    %17 = vector.broadcast %16 : vector<1x16x128xf32> to vector<8x16x128xf32>
    %18 = arith.addf %8, %17 : vector<8x16x128xf32>
    %cst_14 = arith.constant dense<0xFF800000> : vector<8x128xf32>
    %19 = vector.multi_reduction <maximumf>, %18, %cst_14 [1] : vector<8x16x128xf32> to vector<8x128xf32>
    %c0_15 = arith.constant 0 : index
    %c0_16 = arith.constant 0 : index
    %20 = vector.load %arg4[%c0_15, %c0_16] : memref<1x128xf32, #tpu.memory_space<vmem>>, vector<1x128xf32>
    %21 = vector.broadcast %20 : vector<1x128xf32> to vector<8x128xf32>
    %22 = arith.addf %19, %21 : vector<8x128xf32>
    %cst_17 = arith.constant 0.000000e+00 : f32
    %23 = vector.broadcast %cst_17 : f32 to vector<8x128xf32>
    %24 = arith.maximumf %22, %23 : vector<8x128xf32>
    %c0_18 = arith.constant 0 : index
    %c0_19 = arith.constant 0 : index
    %25 = vector.load %arg5[%c0_18, %c0_19] : memref<128x128xf32, #tpu.memory_space<vmem>>, vector<128x128xf32>
    %cst_20 = arith.constant dense<0.000000e+00> : vector<8x128xf32>
    %26 = tpu.matmul %24, %25, %cst_20 {dimension_numbers = #tpu.dot_dimension_numbers<[1], [0], [0], [1], [0, 0, 1, 1], [], []>, precision = #tpu.contract_precision<fp32>} : vector<8x128xf32>, vector<128x128xf32>, vector<8x128xf32> -> vector<8x128xf32>
    %c0_21 = arith.constant 0 : index
    %c0_22 = arith.constant 0 : index
    %27 = vector.load %arg6[%c0_21, %c0_22] : memref<1x128xf32, #tpu.memory_space<vmem>>, vector<1x128xf32>
    %28 = vector.broadcast %27 : vector<1x128xf32> to vector<8x128xf32>
    %29 = arith.addf %26, %28 : vector<8x128xf32>
    %c0_23 = arith.constant 0 : index
    %c0_24 = arith.constant 0 : index
    %30 = vector.load %arg7[%c0_23, %c0_24] : memref<8x128xf32, #tpu.memory_space<vmem>>, vector<8x128xf32>
    tpu.vector_store %arg7[%c0_23, %c0_24], %29 {strides = array<i32>} : memref<8x128xf32, #tpu.memory_space<vmem>>, vector<8x128xf32>,
    return
  }
  func.func @transform_0(%arg0: i32) -> (i32, i32, i32) {
    %c0_i32 = arith.constant 0 : i32
    %c0_i32_0 = arith.constant 0 : i32
    %c0_i32_1 = arith.constant 0 : i32
    return %arg0, %c0_i32, %c0_i32_0 : i32, i32, i32
  }
  func.func @transform_1(%arg0: i32) -> (i32, i32) {
    %c0_i32 = arith.constant 0 : i32
    %c0_i32_0 = arith.constant 0 : i32
    %c0_i32_1 = arith.constant 0 : i32
    return %c0_i32, %c0_i32_0 : i32, i32
  }
  func.func @transform_2(%arg0: i32) -> (i32, i32) {
    %c0_i32 = arith.constant 0 : i32
    %c0_i32_0 = arith.constant 0 : i32
    %c0_i32_1 = arith.constant 0 : i32
    return %c0_i32, %c0_i32_0 : i32, i32
  }
  func.func @transform_3(%arg0: i32) -> (i32, i32) {
    %c0_i32 = arith.constant 0 : i32
    %c0_i32_0 = arith.constant 0 : i32
    %c0_i32_1 = arith.constant 0 : i32
    return %c0_i32, %c0_i32_0 : i32, i32
  }
  func.func @transform_4(%arg0: i32) -> (i32, i32) {
    %c0_i32 = arith.constant 0 : i32
    %c0_i32_0 = arith.constant 0 : i32
    %c0_i32_1 = arith.constant 0 : i32
    return %c0_i32, %c0_i32_0 : i32, i32
  }
  func.func @transform_5(%arg0: i32) -> (i32, i32) {
    %c0_i32 = arith.constant 0 : i32
    %c0_i32_0 = arith.constant 0 : i32
    %c0_i32_1 = arith.constant 0 : i32
    return %c0_i32, %c0_i32_0 : i32, i32
  }
  func.func @transform_6(%arg0: i32) -> (i32, i32) {
    %c0_i32 = arith.constant 0 : i32
    %c0_i32_0 = arith.constant 0 : i32
    return %arg0, %c0_i32 : i32, i32
  }
}

</mosaic_0001>

<bundles_post_ra>
// kernel: tpu_custom_call.1
= control target key start
LH: loop header
LB: loop body
LE: loop exit
PB: predicated region body
PF: predicated region fallthrough
CT: control target
= control target key end

     0   :  { %s3321_s25 = smov 64   ;;  %s3322_s26 = smov 32   ;;  %s4832_s0 = inlined_call_operand.vmem [shape: f32[8,19,32], index: 0, kind: input, shape index: {}]   ;;  %s4833_s1 = inlined_call_operand.vmem [shape: s32[1,128], index: 1, kind: input, shape index: {}]   ;;  %s4834_s2 = inlined_call_operand.vmem [shape: f32[128,128], index: 2, kind: input, shape index: {}]   ;;  %s4835_s3 = inlined_call_operand.vmem [shape: f32[1,128], index: 3, kind: input, shape index: {}]   ;;  %s4836_s4 = inlined_call_operand.vmem [shape: f32[128,128], index: 4, kind: input, shape index: {}]   ;;  %s4837_s5 = inlined_call_operand.vmem [shape: f32[1,128], index: 5, kind: input, shape index: {}]   ;;  %s4838_s6 = inlined_call_operand.hbm [shape: f32[8,128], index: 6, kind: output, shape index: {}]  }
   0x1   :  { %v56_v0 = vld [vmem:[%s4832_s0 + $0x2] sm:$0xff]  ;;  %v57_v2 = vld [vmem:[%s4832_s0 + $0xa] sm:$0xff]  ;;  %s3323_s11 = smov 96   ;;  %v42_v7 = vld [vmem:[%s4832_s0 + $0x19] sm:$0xff] }
   0x2   :  { %v40_v1 = vld [vmem:[%s4832_s0 + $0x1] sm:$0xff]  ;;  %168 = vrot.lane.b32.xlu1 %v56_v0, %s3321_s25  ;;  %v41_v3 = vld [vmem:[%s4832_s0 + $0x9] sm:$0xff]  ;;  %v346_v12 = vld [vmem:[%s4834_s2 + $0x78] sm:$0xff] }
   0x3   :  { %104 = vrot.lane.b32.xlu0 %v40_v1, %s3322_s26  ;;  %v73_v4 = vld [vmem:[%s4832_s0 + $0xb] sm:$0xff]  ;;  %v72_v5 = vld [vmem:[%s4832_s0 + $0x3] sm:$0xff]  ;;  %v58_v9 = vld [vmem:[%s4832_s0 + $0x1a] sm:$0xff]  ;;  %v3412_v13 = vand.u32 4294901760, %v346_v12 }
   0x4   :  { %v43_v6 = vld [vmem:[%s4832_s0 + $0x21] sm:$0xff]  ;;  %v345_v14 = vld [vmem:[%s4834_s2 + $0x70] sm:$0xff]  ;;  %v342_v20 = vld [vmem:[%s4834_s2 + $0x58] sm:$0xff] }
   0x5   :  { %v59_v8 = vld [vmem:[%s4832_s0 + $0x22] sm:$0xff]  ;;  %v3423_v17 = vand.u32 4294901760, %v345_v14  ;;  %v341_v21 = vld [vmem:[%s4834_s2 + $0x50] sm:$0xff]  ;;  %v3436_v22 = vsub.f32 %v346_v12, %v3412_v13  ;;  %2746 = vmatprep.subr.mxu0 %v3412_v13  ;;  %v3439_v23 = vand.u32 4294901760, %v342_v20  ;;  %v45_v28 = vld [vmem:[%s4832_s0 + $0x39] sm:$0xff] }
   0x6   :  { %170 = vrot.lane.b32.xlu1 %v57_v2, %s3321_s25  ;;  %v75_v10 = vld [vmem:[%s4832_s0 + $0x23] sm:$0xff]  ;;  %v74_v11 = vld [vmem:[%s4832_s0 + $0x1b] sm:$0xff]  ;;  %v44_v29 = vld [vmem:[%s4832_s0 + $0x31] sm:$0xff]  ;;  %2747 = vmatpush3.msra.mxu0 %v3412_v13  ;;  %v3465_v31 = vand.u32 4294901760, %v341_v21 }
   0x7   :  { %106 = vrot.lane.b32.xlu0 %v41_v3, %s3322_s26  ;;  %v344_v15 = vld [vmem:[%s4834_s2 + $0x68] sm:$0xff]  ;;  %v343_v16 = vld [vmem:[%s4834_s2 + $0x60] sm:$0xff]  ;;  %v3444_v24 = vsub.f32 %v345_v14, %v3423_v17  ;;  %v3462_v30 = vand.u32 4294901760, %v3436_v22  ;;  %v3474_v34 = vsub.f32 %v342_v20, %v3439_v23  ;;  %2748 = vmatprep.subr.mxu0 %v3423_v17  ;;  %v60_v41 = vld [vmem:[%s4832_s0 + $0x32] sm:$0xff] }
   0x8   :  { %v3425_v18 = vand.u32 4294901760, %v344_v15  ;;  %v3427_v19 = vand.u32 4294901760, %v343_v16  ;;  %v340_v27 = vld [vmem:[%s4834_s2 + $0x48] sm:$0xff]  ;;  %2749 = vmatpush3.msra.mxu0 %v3423_v17  ;;  %v339_v38 = vld [vmem:[%s4834_s2 + $0x40] sm:$0xff]  ;;  %v3501_v44 = vsub.f32 %v341_v21, %v3465_v31 }
   0x9   :  { %v3468_v32 = vand.u32 4294901760, %v3444_v24  ;;  %v592_v35 = vsub.f32 %v3436_v22, %v3462_v30  ;;  %v3483_v37 = vand.u32 4294901760, %v340_v27  ;;  %v61_v40 = vld [vmem:[%s4832_s0 + $0x3a] sm:$0xff] }
   0xa   :  { %234 = vrot.lane.b32.xlu1 %v73_v4, %s3323_s11  ;;  %v3447_v25 = vsub.f32 %v344_v15, %v3425_v18  ;;  %v3450_v26 = vsub.f32 %v343_v16, %v3427_v19  ;;  %2750 = vmatprep.subr.mxu0 %v3425_v18 }
   0xb   :  { %232 = vrot.lane.b32.xlu0 %v72_v5, %s3323_s11  ;;  %v599_v39 = vsub.f32 %v3444_v24, %v3468_v32  ;;  %v593_v42 = vand.u32 4294901760, %v592_v35 }
   0xc   :  { %v3471_v33 = vand.u32 4294901760, %v3447_v25  ;;  %v3480_v36 = vand.u32 4294901760, %v3450_v26 }
   0xe   :  { %110 = vrot.lane.b32.xlu1 %v43_v6, %s3322_s26  ;;  %v606_v43 = vsub.f32 %v3447_v25, %v3471_v33 }
   0xf   :  { %108 = vrot.lane.b32.xlu0 %v42_v7, %s3322_s26 }
  0x12   :  { %174 = vrot.lane.b32.xlu1 %v59_v8, %s3321_s25 }
  0x13   :  { %172 = vrot.lane.b32.xlu0 %v58_v9, %s3321_s25 }
  0x16   :  { %238 = vrot.lane.b32.xlu1 %v75_v10, %s3323_s11 }
  0x17   :  { %236 = vrot.lane.b32.xlu0 %v74_v11, %s3323_s11 }
  0x1a   :  { %114 = vrot.lane.b32.xlu1 %v45_v28, %s3322_s26 }
  0x1b   :  { %112 = vrot.lane.b32.xlu0 %v44_v29, %s3322_s26 }
  0x1c   :  { %11 = vsyncpa [#allocation3], 0  ;;  %v600_v45 = vand.u32 4294901760, %v599_v39  ;;  %v3505_v46 = vand.u32 4294901760, %v3474_v34  ;;  %2751 = vmatpush3.msra.mxu0 %v3425_v18  ;;  %v3508_v47 = vand.u32 4294901760, %v339_v38  ;;  %v338_v48 = vld [vmem:[%s4834_s2 + $0x38] sm:$0xff]  ;;  %2802 = vmatprep.subr.mxu1 %v593_v42  ;;  %v613_v49 = vsub.f32 %v3450_v26, %v3480_v36 }
  0x1d   :  { %v3516_v50 = vsub.f32 %v340_v27, %v3483_v37  ;;  %2752 = vmatprep.subr.mxu0 %v3427_v19  ;;  %v337_v51 = vld [vmem:[%s4834_s2 + $0x30] sm:$0xff]  ;;  %v77_v52 = vld [vmem:[%s4832_s0 + $0x3b] sm:$0xff]  ;;  %2803 = vmatpush3.msra.mxu1 %v593_v42  ;;  %v607_v54 = vand.u32 4294901760, %v606_v43  ;;  %v3531_v55 = vand.u32 4294901760, %v3501_v44  ;;  %v3534_v56 = vand.u32 4294901760, %v338_v48  ;;  %v336_v62 = vld [vmem:[%s4834_s2 + $0x28] sm:$0xff] }
  0x1e   :  { %178 = vrot.lane.b32.xlu1 %v61_v40, %s3321_s25  ;;  %v76_v53 = vld [vmem:[%s4832_s0 + $0x33] sm:$0xff]  ;;  %2753 = vmatpush3.msra.mxu0 %v3427_v19  ;;  %v620_v57 = vsub.f32 %v3474_v34, %v3505_v46  ;;  %v3539_v58 = vsub.f32 %v339_v38, %v3508_v47  ;;  %v614_v59 = vand.u32 4294901760, %v613_v49  ;;  %v3546_v61 = vand.u32 4294901760, %v337_v51  ;;  %v46_v0 = vld [vmem:[%s4832_s0 + $0x49] sm:$0xff]  ;;  %v335_v6 = vld [vmem:[%s4834_s2 + $0x20] sm:$0xff]  ;;  %s3327_s10 = smov [#allocation2]  }
  0x1f   :  { %176 = vrot.lane.b32.xlu0 %v60_v41, %s3321_s25  ;;  %2804 = vmatprep.subr.mxu1 %v600_v45  ;;  %v3543_v60 = vand.u32 4294901760, %v3516_v50  ;;  %v47_v63 = vld [vmem:[%s4832_s0 + $0x51] sm:$0xff]  ;;  %v627_v1 = vsub.f32 %v3501_v44, %v3531_v55  ;;  %v3562_v2 = vsub.f32 %v338_v48, %v3534_v56  ;;  %v3569_v5 = vand.u32 4294901760, %v336_v62  ;;  %s2441_s12 = sshll.u32 %s3327_s10, 4  ;;  %s2442_s12 = int_to_ptr.vmem [resolvable:$true] %s2441_s12 }
  0x20   :  { %2754 = vmatprep.subr.mxu0 %v3439_v23  ;;  %2805 = vmatpush3.msra.mxu1 %v600_v45  ;;  %v621_v3 = vand.u32 4294901760, %v620_v57  ;;  %v3566_v4 = vand.u32 4294901760, %v3539_v58  ;;  %v3577_v8 = vsub.f32 %v337_v51, %v3546_v61  ;;  %v334_v9 = vld [vmem:[%s4834_s2 + $0x18] sm:$0xff]  ;;  %v62_v11 = vld [vmem:[%s4832_s0 + $0x4a] sm:$0xff]  ;;  %v3595_v15 = vand.u32 4294901760, %v335_v6  ;;  %v331_v51 = vld [vmem:[%s4834_s2] sm:$0xff]  ;;  %p3304_p1 = scmp.lt.s32.totalorder %s2442_s12, %s2442_s12 }
  0x21   :  { %2755 = vmatpush3.msra.mxu0 %v3439_v23  ;;  %2806 = vmatprep.subr.mxu1 %v607_v54  ;;  %v634_v7 = vsub.f32 %v3516_v50, %v3543_v60  ;;  %v63_v10 = vld [vmem:[%s4832_s0 + $0x52] sm:$0xff]  ;;  %v628_v12 = vand.u32 4294901760, %v627_v1  ;;  %v3592_v14 = vand.u32 4294901760, %v3562_v2  ;;  %v3600_v20 = vsub.f32 %v336_v62, %v3569_v5  ;;  %v332_v45 = vld [vmem:[%s4834_s2 + $0x8] sm:$0xff]  ;;  %s3299_s13 = scalar_lea.vmem %s2442_s12, 128 }
  0x22   :  { %242 = vrot.lane.b32.xlu1 %v77_v52, %s3323_s11  ;;  %2756 = vmatprep.subr.mxu0 %v3465_v31  ;;  %v641_v16 = vsub.f32 %v3539_v58, %v3566_v4  ;;  %v3604_v27 = vand.u32 4294901760, %v3577_v8  ;;  %v3607_v28 = vand.u32 4294901760, %v334_v9  ;;  %v333_v29 = vld [vmem:[%s4834_s2 + $0x10] sm:$0xff]  ;;  %v3623_v40 = vsub.f32 %v335_v6, %v3595_v15  ;;  %p3300_p0 = scmp.ne.s32.totalorder %s2442_s12, %s3299_s13  ;;  %p3305_p2 = scmp.lt.s32.totalorder %s3299_s13, %s3299_s13 }
  0x23   :  { %240 = vrot.lane.b32.xlu0 %v76_v53, %s3323_s11  ;;  %2807 = vmatpush3.msra.mxu1 %v607_v54  ;;  %v635_v21 = vand.u32 4294901760, %v634_v7  ;;  %v79_v35 = vld [vmem:[%s4832_s0 + $0x53] sm:$0xff]  ;;  %v78_v38 = vld [vmem:[%s4832_s0 + $0x4b] sm:$0xff]  ;;  %v648_v39 = vsub.f32 %v3562_v2, %v3592_v14  ;;  %v3627_v42 = vand.u32 4294901760, %v3600_v20  ;;  %v3630_v43 = vand.u32 4294901760, %v333_v29  ;;  %v48_v53 = vld [vmem:[%s4832_s0 + $0x61] sm:$0xff] }
  0x24   :  { %2757 = vmatpush3.msra.mxu0 %v3465_v31  ;;  %2808 = vmatprep.subr.mxu1 %v614_v59  ;;  %v642_v41 = vand.u32 4294901760, %v641_v16  ;;  %v655_v48 = vsub.f32 %v3577_v8, %v3604_v27  ;;  %v3638_v49 = vsub.f32 %v334_v9, %v3607_v28  ;;  %v49_v52 = vld [vmem:[%s4832_s0 + $0x69] sm:$0xff]  ;;  %v3653_v57 = vand.u32 4294901760, %v3623_v40  ;;  %p3306_p3 = por %p3305_p2, %p3304_p1 }
  0x25   :  { %2758 = vmatprep.subr.mxu0 %v3483_v37  ;;  %2809 = vmatpush3.msra.mxu1 %v614_v59  ;;  %v649_v54 = vand.u32 4294901760, %v648_v39  ;;  %v3656_v59 = vand.u32 4294901760, %v332_v45  ;;  %v662_v62 = vsub.f32 %v3600_v20, %v3627_v42  ;;  %v65_v6 = vld [vmem:[%s4832_s0 + $0x6a] sm:$0xff]  ;;  %v64_v7 = vld [vmem:[%s4832_s0 + $0x62] sm:$0xff]  ;;  %vm280_vm0 = vcmask 261120  }
  0x26   :  { %118 = vrot.lane.b32.xlu1 %v47_v63, %s3322_s26  ;;  %2759 = vmatpush3.msra.mxu0 %v3483_v37  ;;  %v3661_v63 = vsub.f32 %v333_v29, %v3630_v43  ;;  %v3665_v1 = vand.u32 4294901760, %v3638_v49  ;;  %v669_v9 = vsub.f32 %v3623_v40, %v3653_v57  ;;  %v81_v29 = vld [vmem:[%s4832_s0 + $0x6b] sm:$0xff]  ;;  %vm297_vm1 = vcmask 523264   ;;  %p3307_p4 = pnand %p3306_p3, %p3300_p0 }
  0x27   :  { %116 = vrot.lane.b32.xlu0 %v46_v0, %s3322_s26  ;;  %2810 = vmatprep.subr.mxu1 %v621_v3  ;;  %v656_v0 = vand.u32 4294901760, %v655_v48  ;;  %vm314_vm2 = vcmask 785408   ;;  %vm3325_vm3 = vmmov 0   ;;  %vm1772_vm6 = vcmask 1041409  }
  0x28   :  { %2760 = vmatprep.subr.mxu0 %v3508_v47  ;;  %2811 = vmatpush3.msra.mxu1 %v621_v3  ;;  %v3668_v3 = vand.u32 4294901760, %v331_v51  ;;  %v676_v16 = vsub.f32 %v3638_v49, %v3665_v1  ;;  %vm1775_vm7 = vcmask 1042434   ;;  %vm1778_vm8 = vcmask 1043459  }
  0x29   :  { %2761 = vmatpush3.msra.mxu0 %v3508_v47  ;;  %2812 = vmatprep.subr.mxu1 %v628_v12  ;;  %vm1781_vm9 = vcmask 1044484   ;;  %vm1784_vm10 = vcmask 1045509   ;;  %vm1787_vm11 = vcmask 1046534   ;;  %vm1790_vm12 = vcmask 1047559  }
  0x2a   :  { %182 = vrot.lane.b32.xlu1 %v63_v10, %s3321_s25  ;;  %2762 = vmatprep.subr.mxu0 %v3534_v56  ;;  %v3681_v10 = vsub.f32 %v332_v45, %v3656_v59  ;;  %v677_v45 = vand.u32 4294901760, %v676_v16  ;;  %v82_v16 = vld [vmem:[%s4832_s0 + $0x7b] sm:$0xff] }
  0x2b   :  { %180 = vrot.lane.b32.xlu0 %v62_v11, %s3321_s25  ;;  %2813 = vmatpush3.msra.mxu1 %v628_v12  ;;  %v663_v11 = vand.u32 4294901760, %v662_v62  ;;  %v3685_v12 = vand.u32 4294901760, %v3661_v63 }
  0x2c   :  { %2763 = vmatpush3.msra.mxu0 %v3534_v56  ;;  %2814 = vmatprep.subr.mxu1 %v635_v21  ;;  %v3703_v39 = vand.u32 4294901760, %v3681_v10 }
  0x2d   :  { %2764 = vmatprep.subr.mxu0 %v3546_v61  ;;  %2815 = vmatpush3.msra.mxu1 %v635_v21  ;;  %4966 = vst [vmem:[#allocation5_spill] sm:$0xff] %v3685_v12  ;;  %v3691_v21 = vsub.f32 %v331_v51, %v3668_v3  ;;  %v51_v51 = vld [vmem:[%s4832_s0 + $0x81] sm:$0xff] }
  0x2e   :  { %246 = vrot.lane.b32.xlu1 %v79_v35, %s3323_s11  ;;  %2765 = vmatpush3.msra.mxu0 %v3546_v61  ;;  %v80_v35 = vld [vmem:[%s4832_s0 + $0x63] sm:$0xff]  ;;  %4967 = vst [vmem:[#allocation6_spill] sm:$0xff] %v3703_v39 }
  0x2f   :  { %244 = vrot.lane.b32.xlu0 %v78_v38, %s3323_s11  ;;  %2816 = vmatprep.subr.mxu1 %v642_v41  ;;  %v670_v38 = vand.u32 4294901760, %v669_v9  ;;  %v3710_v48 = vand.u32 4294901760, %v3691_v21 }
  0x30   :  { %2766 = vmatprep.subr.mxu0 %v3569_v5  ;;  %2817 = vmatpush3.msra.mxu1 %v642_v41  ;;  %v683_v41 = vsub.f32 %v3661_v63, %v3685_v12 }
  0x31   :  { %2767 = vmatpush3.msra.mxu0 %v3569_v5  ;;  %2818 = vmatprep.subr.mxu1 %v649_v54  ;;  %4968 = vst [vmem:[#allocation7_spill] sm:$0xff] %v3710_v48  ;;  %v697_v62 = vsub.f32 %v3691_v21, %v3710_v48 }
  0x32   :  { %122 = vrot.lane.b32.xlu1 %v49_v52, %s3322_s26  ;;  %2768 = vmatprep.subr.mxu0 %v3595_v15  ;;  %v50_v52 = vld [vmem:[%s4832_s0 + $0x79] sm:$0xff] }
  0x33   :  { %120 = vrot.lane.b32.xlu0 %v48_v53, %s3322_s26  ;;  %2819 = vmatpush3.msra.mxu1 %v649_v54  ;;  %v690_v53 = vsub.f32 %v3681_v10, %v3703_v39  ;;  %v684_v54 = vand.u32 4294901760, %v683_v41  ;;  %v698_v9 = vand.u32 4294901760, %v697_v62  ;;  %v68_v41 = vld [vmem:[%s4832_s0 + $0x92] sm:$0xff]  ;;  %v70_v62 = vld [vmem:[%s4832_s0 + $0xaa] sm:$0xff] }
  0x34   :  { %2769 = vmatpush3.msra.mxu0 %v3595_v15  ;;  %2820 = vmatprep.subr.mxu1 %v656_v0 }
  0x35   :  { %2770 = vmatprep.subr.mxu0 %v3607_v28  ;;  %2821 = vmatpush3.msra.mxu1 %v656_v0  ;;  %v67_v0 = vld [vmem:[%s4832_s0 + $0x82] sm:$0xff] }
  0x36   :  { %186 = vrot.lane.b32.xlu1 %v65_v6, %s3321_s25  ;;  %2771 = vmatpush3.msra.mxu0 %v3607_v28  ;;  %v66_v6 = vld [vmem:[%s4832_s0 + $0x7a] sm:$0xff] }
  0x37   :  { %184 = vrot.lane.b32.xlu0 %v64_v7, %s3321_s25  ;;  %2822 = vmatprep.subr.mxu1 %v663_v11  ;;  %v691_v7 = vand.u32 4294901760, %v690_v53  ;;  %v54_v53 = vld [vmem:[%s4832_s0 + $0xa9] sm:$0xff] }
  0x38   :  { %2772 = vmatprep.subr.mxu0 %v3630_v43  ;;  %2823 = vmatpush3.msra.mxu1 %v663_v11  ;;  %v83_v11 = vld [vmem:[%s4832_s0 + $0x83] sm:$0xff] }
  0x39   :  { %2773 = vmatpush3.msra.mxu0 %v3630_v43  ;;  %2824 = vmatprep.subr.mxu1 %v670_v38 }
  0x3a   :  { %250 = vrot.lane.b32.xlu1 %v81_v29, %s3323_s11  ;;  %2774 = vmatprep.subr.mxu0 %v3656_v59  ;;  %v53_v29 = vld [vmem:[%s4832_s0 + $0x99] sm:$0xff] }
  0x3b   :  { %248 = vrot.lane.b32.xlu0 %v80_v35, %s3323_s11  ;;  %2825 = vmatpush3.msra.mxu1 %v670_v38  ;;  %v52_v35 = vld [vmem:[%s4832_s0 + $0x91] sm:$0xff]  ;;  %v69_v38 = vld [vmem:[%s4832_s0 + $0x9a] sm:$0xff] }
  0x3c   :  { %2775 = vmatpush3.msra.mxu0 %v3656_v59  ;;  %2826 = vmatprep.subr.mxu1 %v677_v45 }
  0x3d   :  { %2776 = vmatprep.subr.mxu0 %v3668_v3  ;;  %2827 = vmatpush3.msra.mxu1 %v677_v45  ;;  %v85_v45 = vld [vmem:[%s4832_s0 + $0x9b] sm:$0xff] }
  0x3e   :  { %126 = vrot.lane.b32.xlu1 %v51_v51, %s3322_s26  ;;  %2777 = vmatpush3.msra.mxu0 %v3668_v3  ;;  %v84_v51 = vld [vmem:[%s4832_s0 + $0x93] sm:$0xff] }
  0x3f   :  { %124 = vrot.lane.b32.xlu0 %v50_v52, %s3322_s26  ;;  %2828 = vmatprep.subr.mxu1 %v684_v54  ;;  %v55_v52 = vld [vmem:[%s4832_s0 + $0xb1] sm:$0xff] }
  0x40   :  { %2858 = vmatprep.subr.mxu0 %v3436_v22  ;;  %2829 = vmatpush3.msra.mxu1 %v684_v54  ;;  %v71_v54 = vld [vmem:[%s4832_s0 + $0xb2] sm:$0xff] }
  0x41   :  { %2830 = vmatprep.subr.mxu1 %v691_v7 }
  0x42   :  { %190 = vrot.lane.b32.xlu1 %v67_v0, %s3321_s25  ;;  %2831 = vmatpush3.msra.mxu1 %v691_v7  ;;  %v87_v0 = vld [vmem:[%s4832_s0 + $0xb3] sm:$0xff] }
  0x43   :  { %188 = vrot.lane.b32.xlu0 %v66_v6, %s3321_s25  ;;  %2832 = vmatprep.subr.mxu1 %v698_v9  ;;  %v86_v6 = vld [vmem:[%s4832_s0 + $0xab] sm:$0xff] }
  0x44   :  { %2833 = vmatpush3.msra.mxu1 %v698_v9 }
  0x45   :  { %2914 = vmatprep.subr.mxu1 %v3412_v13 }
  0x46   :  { %254 = vrot.lane.b32.xlu1 %v83_v11, %s3323_s11  ;;  %v24_v11 = vld [vmem:[%s4832_s0] sm:$0xff] }
  0x47   :  { %252 = vrot.lane.b32.xlu0 %v82_v16, %s3323_s11  ;;  %v25_v16 = vld [vmem:[%s4832_s0 + $0x8] sm:$0xff] }
  0x4a   :  { %130 = vrot.lane.b32.xlu1 %v53_v29, %s3322_s26 }
  0x4b   :  { %128 = vrot.lane.b32.xlu0 %v52_v35, %s3322_s26 }
  0x4e   :  { %194 = vrot.lane.b32.xlu1 %v69_v38, %s3321_s25 }
  0x4f   :  { %192 = vrot.lane.b32.xlu0 %v68_v41, %s3321_s25 }
  0x52   :  { %258 = vrot.lane.b32.xlu1 %v85_v45, %s3323_s11 }
  0x53   :  { %256 = vrot.lane.b32.xlu0 %v84_v51, %s3323_s11 }
  0x56   :  { %134 = vrot.lane.b32.xlu1 %v55_v52, %s3322_s26 }
  0x57   :  { %132 = vrot.lane.b32.xlu0 %v54_v53, %s3322_s26 }
  0x5a   :  { %198 = vrot.lane.b32.xlu1 %v71_v54, %s3321_s25 }
  0x5b   :  { %196 = vrot.lane.b32.xlu0 %v70_v62, %s3321_s25 }
  0x5e   :  { %262 = vrot.lane.b32.xlu1 %v87_v0, %s3323_s11 }
  0x5f   :  { %260 = vrot.lane.b32.xlu0 %v86_v6, %s3323_s11 }
  0x74   :  { %v169_v7 = vpop.permute.xlu1 %168 }
  0x75   :  { %v105_v9 = vpop.permute.xlu0 %104 }
  0x76   :  { %v281_v38 = vsel %vm280_vm0, %v24_v11, %v105_v9 }
  0x77   :  { %v298_v53 = vsel %vm297_vm1, %v281_v38, %v169_v7  ;;  %v27_v38 = vld [vmem:[%s4832_s0 + $0x20] sm:$0xff] }
  0x78   :  { %v171_v29 = vpop.permute.xlu1 %170 }
  0x79   :  { %v107_v35 = vpop.permute.xlu0 %106 }
  0x7a   :  { %v282_v41 = vsel %vm280_vm0, %v25_v16, %v107_v35 }
  0x7b   :  { %v299_v51 = vsel %vm297_vm1, %v282_v41, %v171_v29  ;;  %v26_v41 = vld [vmem:[%s4832_s0 + $0x18] sm:$0xff] }
  0x7c   :  { %v235_v45 = vpop.permute.xlu1 %234 }
  0x7d   :  { %v233_v52 = vpop.permute.xlu0 %232  ;;  %v316_v54 = vsel %vm314_vm2, %v299_v51, %v235_v45 }
  0x7e   :  { %v315_v62 = vsel %vm314_vm2, %v298_v53, %v233_v52  ;;  %v3809_v0 = vand.u32 4294901760, %v316_v54 }
  0x7f   :  { %v3811_v6 = vand.u32 4294901760, %v315_v62 }
  0x80   :  { %4969 = vst [vmem:[#allocation8_spill] sm:$0xff] %v3809_v0  ;;  %v3814_v9 = vsub.f32 %v316_v54, %v3809_v0  ;;  %v111_v16 = vpop.permute.xlu1 %110 }
  0x81   :  { %v3817_v11 = vsub.f32 %v315_v62, %v3811_v6  ;;  %v109_v35 = vpop.permute.xlu0 %108  ;;  %2834 = vmatprep.mubr.f32.mxu1 %v3811_v6  ;;  %v284_v48 = vsel %vm280_vm0, %v27_v38, %v111_v16 }
  0x82   :  { %2835 = vmatmul.mubr.f32.vlgmr.msra.gmra.mxu1 %v3809_v0  ;;  %v4848_v29 = vand.u32 4294901760, %v3814_v9  ;;  %v283_v39 = vsel %vm280_vm0, %v26_v41, %v109_v35 }
  0x83   :  { %v4843_v7 = vand.u32 4294901760, %v3817_v11  ;;  %2915 = vmatpush3.msra.mxu1 %v3412_v13 }
  0x84   :  { %2916 = vmatprep.subr.mxu1 %v3423_v17  ;;  %v175_v45 = vpop.permute.xlu1 %174  ;;  %v441_v53 = vsub.f32 %v3814_v9, %v4848_v29 }
  0x85   :  { %v173_v51 = vpop.permute.xlu0 %172  ;;  %v431_v52 = vsub.f32 %v3817_v11, %v4843_v7  ;;  %2917 = vmatpush3.msra.mxu1 %v3423_v17  ;;  %v301_v7 = vsel %vm297_vm1, %v284_v48, %v175_v45 }
  0x86   :  { %2918 = vmatprep.subr.mxu1 %v3425_v18  ;;  %v442_v62 = vand.u32 4294901760, %v441_v53  ;;  %v300_v12 = vsel %vm297_vm1, %v283_v39, %v173_v51 }
  0x87   :  { %v432_v54 = vand.u32 4294901760, %v431_v52  ;;  %2919 = vmatpush3.msra.mxu1 %v3425_v18 }
  0x88   :  { %2920 = vmatprep.subr.mxu1 %v3427_v19  ;;  %v239_v0 = vpop.permute.xlu1 %238 }
  0x89   :  { %v237_v29 = vpop.permute.xlu0 %236  ;;  %2778 = vmatprep.mubr.f32.mxu0 %v432_v54  ;;  %2921 = vmatpush3.msra.mxu1 %v3427_v19  ;;  %v318_v52 = vsel %vm314_vm2, %v301_v7, %v239_v0 }
  0x8a   :  { %v317_v53 = vsel %vm314_vm2, %v300_v12, %v237_v29  ;;  %2779 = vmatmul.mubr.f32.vlgmr.msra.gmra.mxu0 %v442_v62  ;;  %2922 = vmatprep.subr.mxu1 %v3439_v23  ;;  %v3849_v16 = vand.u32 4294901760, %v318_v52  ;;  %v28_v29 = vld [vmem:[%s4832_s0 + $0x30] sm:$0xff] }
  0x8b   :  { %v3851_v35 = vand.u32 4294901760, %v317_v53  ;;  %2859 = vmatpush3.msra.mxu0 %v3436_v22  ;;  %2923 = vmatpush3.msra.mxu1 %v3439_v23 }
  0x8c   :  { %4970 = vst [vmem:[#allocation9_spill] sm:$0xff] %v3849_v16  ;;  %2860 = vmatprep.subr.mxu0 %v3444_v24  ;;  %2924 = vmatprep.subr.mxu1 %v3465_v31  ;;  %v3858_v39 = vsub.f32 %v318_v52, %v3849_v16  ;;  %v115_v48 = vpop.permute.xlu1 %114 }
  0x8d   :  { %4971 = vst [vmem:[#allocation10_spill] sm:$0xff] %v3851_v35  ;;  %v3861_v12 = vsub.f32 %v317_v53, %v3851_v35  ;;  %v113_v0 = vpop.permute.xlu0 %112  ;;  %2837 = vmatprep.mubr.f32.mxu1 %v3851_v35  ;;  %2861 = vmatpush3.msra.mxu0 %v3444_v24  ;;  %v29_v24 = vld [vmem:[%s4832_s0 + $0x38] sm:$0xff] }
  0x8e   :  { %2838 = vmatmul.mubr.f32.gmra.mxu1 %v3849_v16  ;;  %2862 = vmatprep.subr.mxu0 %v3447_v25  ;;  %v4849_v7 = vand.u32 4294901760, %v3858_v39  ;;  %v286_v62 = vsel %vm280_vm0, %v29_v24, %v115_v48  ;;  %v285_v52 = vsel %vm280_vm0, %v28_v29, %v113_v0 }
  0x8f   :  { %v4850_v22 = vand.u32 4294901760, %v3861_v12  ;;  %2925 = vmatpush3.msra.mxu1 %v3465_v31  ;;  %2863 = vmatpush3.msra.mxu0 %v3447_v25 }
  0x90   :  { %2926 = vmatprep.subr.mxu1 %v3483_v37  ;;  %2864 = vmatprep.subr.mxu0 %v3450_v26  ;;  %v179_v38 = vpop.permute.xlu1 %178  ;;  %v461_v25 = vsub.f32 %v3858_v39, %v4849_v7 }
  0x91   :  { %v177_v41 = vpop.permute.xlu0 %176  ;;  %v451_v45 = vsub.f32 %v3861_v12, %v4850_v22  ;;  %2927 = vmatpush3.msra.mxu1 %v3483_v37  ;;  %2865 = vmatpush3.msra.mxu0 %v3450_v26  ;;  %v303_v26 = vsel %vm297_vm1, %v286_v62, %v179_v38 }
  0x92   :  { %2928 = vmatprep.subr.mxu1 %v3508_v47  ;;  %2866 = vmatprep.subr.mxu0 %v3474_v34  ;;  %v462_v54 = vand.u32 4294901760, %v461_v25  ;;  %v302_v53 = vsel %vm297_vm1, %v285_v52, %v177_v41  ;;  %v30_v41 = vld [vmem:[%s4832_s0 + $0x48] sm:$0xff] }
  0x93   :  { %v452_v51 = vand.u32 4294901760, %v451_v45  ;;  %2929 = vmatpush3.msra.mxu1 %v3508_v47  ;;  %2867 = vmatpush3.msra.mxu0 %v3474_v34 }
  0x94   :  { %2930 = vmatprep.subr.mxu1 %v3534_v56  ;;  %2868 = vmatprep.subr.mxu0 %v3501_v44  ;;  %v243_v7 = vpop.permute.xlu1 %242 }
  0x95   :  { %v241_v22 = vpop.permute.xlu0 %240  ;;  %2781 = vmatprep.mubr.f32.mxu0 %v452_v51  ;;  %2931 = vmatpush3.msra.mxu1 %v3534_v56  ;;  %v320_v45 = vsel %vm314_vm2, %v303_v26, %v243_v7 }
  0x96   :  { %v319_v34 = vsel %vm314_vm2, %v302_v53, %v241_v22  ;;  %2782 = vmatmul.mubr.f32.gmra.mxu0 %v462_v54  ;;  %2932 = vmatprep.subr.mxu1 %v3546_v61  ;;  %v3901_v48 = vand.u32 4294901760, %v320_v45 }
  0x97   :  { %v3903_v0 = vand.u32 4294901760, %v319_v34  ;;  %2869 = vmatpush3.msra.mxu0 %v3501_v44  ;;  %2933 = vmatpush3.msra.mxu1 %v3546_v61 }
  0x98   :  { %4972 = vst [vmem:[#allocation11_spill] sm:$0xff] %v3901_v48  ;;  %2870 = vmatprep.subr.mxu0 %v3516_v50  ;;  %2934 = vmatprep.subr.mxu1 %v3569_v5  ;;  %v3910_v24 = vsub.f32 %v320_v45, %v3901_v48  ;;  %v119_v7 = vpop.permute.xlu1 %118 }
  0x99   :  { %4973 = vst [vmem:[#allocation12_spill] sm:$0xff] %v3903_v0  ;;  %v3913_v22 = vsub.f32 %v319_v34, %v3903_v0  ;;  %v117_v29 = vpop.permute.xlu0 %116  ;;  %2840 = vmatprep.mubr.f32.mxu1 %v3903_v0  ;;  %2871 = vmatpush3.msra.mxu0 %v3516_v50  ;;  %v31_v50 = vld [vmem:[%s4832_s0 + $0x50] sm:$0xff] }
  0x9a   :  { %2841 = vmatmul.mubr.f32.gmra.mxu1 %v3901_v48  ;;  %2872 = vmatprep.subr.mxu0 %v3539_v58  ;;  %v4851_v38 = vand.u32 4294901760, %v3910_v24  ;;  %v288_v26 = vsel %vm280_vm0, %v31_v50, %v119_v7  ;;  %v287_v53 = vsel %vm280_vm0, %v30_v41, %v117_v29 }
  0x9b   :  { %v4854_v44 = vand.u32 4294901760, %v3913_v22  ;;  %2935 = vmatpush3.msra.mxu1 %v3569_v5  ;;  %2873 = vmatpush3.msra.mxu0 %v3539_v58 }
  0x9c   :  { %2936 = vmatprep.subr.mxu1 %v3595_v15  ;;  %2874 = vmatprep.subr.mxu0 %v3562_v2  ;;  %v183_v25 = vpop.permute.xlu1 %182  ;;  %v481_v58 = vsub.f32 %v3910_v24, %v4851_v38 }
  0x9d   :  { %v181_v51 = vpop.permute.xlu0 %180  ;;  %v471_v54 = vsub.f32 %v3913_v22, %v4854_v44  ;;  %2937 = vmatpush3.msra.mxu1 %v3595_v15  ;;  %2875 = vmatpush3.msra.mxu0 %v3562_v2  ;;  %v305_v2 = vsel %vm297_vm1, %v288_v26, %v183_v25 }
  0x9e   :  { %2938 = vmatprep.subr.mxu1 %v3607_v28  ;;  %2876 = vmatprep.subr.mxu0 %v3577_v8  ;;  %v482_v52 = vand.u32 4294901760, %v481_v58  ;;  %v304_v45 = vsel %vm297_vm1, %v287_v53, %v181_v51  ;;  %v32_v58 = vld [vmem:[%s4832_s0 + $0x60] sm:$0xff] }
  0x9f   :  { %v472_v62 = vand.u32 4294901760, %v471_v54  ;;  %2939 = vmatpush3.msra.mxu1 %v3607_v28  ;;  %2877 = vmatpush3.msra.mxu0 %v3577_v8 }
  0xa0   :  { %2940 = vmatprep.subr.mxu1 %v3630_v43  ;;  %2878 = vmatprep.subr.mxu0 %v3600_v20  ;;  %v247_v34 = vpop.permute.xlu1 %246 }
  0xa1   :  { %v245_v38 = vpop.permute.xlu0 %244  ;;  %2784 = vmatprep.mubr.f32.mxu0 %v472_v62  ;;  %2941 = vmatpush3.msra.mxu1 %v3630_v43  ;;  %v322_v54 = vsel %vm314_vm2, %v305_v2, %v247_v34 }
  0xa2   :  { %v321_v8 = vsel %vm314_vm2, %v304_v45, %v245_v38  ;;  %2785 = vmatmul.mubr.f32.gmra.mxu0 %v482_v52  ;;  %2942 = vmatprep.subr.mxu1 %v3656_v59  ;;  %v3953_v7 = vand.u32 4294901760, %v322_v54 }
  0xa3   :  { %v3955_v29 = vand.u32 4294901760, %v321_v8  ;;  %2879 = vmatpush3.msra.mxu0 %v3600_v20  ;;  %2943 = vmatpush3.msra.mxu1 %v3656_v59 }
  0xa4   :  { %4974 = vst [vmem:[#allocation13_spill] sm:$0xff] %v3953_v7  ;;  %2880 = vmatprep.subr.mxu0 %v3623_v40  ;;  %2944 = vmatprep.subr.mxu1 %v3668_v3  ;;  %v3962_v50 = vsub.f32 %v322_v54, %v3953_v7  ;;  %v123_v41 = vpop.permute.xlu1 %122 }
  0xa5   :  { %4975 = vst [vmem:[#allocation14_spill] sm:$0xff] %v3955_v29  ;;  %v3965_v38 = vsub.f32 %v321_v8, %v3955_v29  ;;  %v121_v25 = vpop.permute.xlu0 %120  ;;  %2843 = vmatprep.mubr.f32.mxu1 %v3955_v29  ;;  %2881 = vmatpush3.msra.mxu0 %v3623_v40  ;;  %v33_v40 = vld [vmem:[%s4832_s0 + $0x68] sm:$0xff] }
  0xa6   :  { %2844 = vmatmul.mubr.f32.gmra.mxu1 %v3953_v7  ;;  %2882 = vmatprep.subr.mxu0 %v3638_v49  ;;  %v4853_v51 = vand.u32 4294901760, %v3962_v50  ;;  %v290_v45 = vsel %vm280_vm0, %v33_v40, %v123_v41  ;;  %v289_v34 = vsel %vm280_vm0, %v32_v58, %v121_v25 }
  0xa7   :  { %v4852_v20 = vand.u32 4294901760, %v3965_v38  ;;  %2945 = vmatpush3.msra.mxu1 %v3668_v3  ;;  %2883 = vmatpush3.msra.mxu0 %v3638_v49 }
  0xa8   :  { %3026 = vmatprep.subr.mxu1 %v3412_v13  ;;  %2884 = vmatprep.subr.mxu0 %v3661_v63  ;;  %v187_v62 = vpop.permute.xlu1 %186  ;;  %v501_v49 = vsub.f32 %v3962_v50, %v4853_v51 }
  0xa9   :  { %v185_v52 = vpop.permute.xlu0 %184  ;;  %v491_v26 = vsub.f32 %v3965_v38, %v4852_v20  ;;  %2885 = vmatpush3.msra.mxu0 %v3661_v63  ;;  %v307_v54 = vsel %vm297_vm1, %v290_v45, %v187_v62 }
  0xaa   :  { %2886 = vmatprep.subr.mxu0 %v3681_v10  ;;  %v502_v2 = vand.u32 4294901760, %v501_v49  ;;  %v306_v8 = vsel %vm297_vm1, %v289_v34, %v185_v52  ;;  %v34_v52 = vld [vmem:[%s4832_s0 + $0x78] sm:$0xff] }
  0xab   :  { %v492_v53 = vand.u32 4294901760, %v491_v26  ;;  %2887 = vmatpush3.msra.mxu0 %v3681_v10 }
  0xac   :  { %2888 = vmatprep.subr.mxu0 %v3691_v21  ;;  %v251_v20 = vpop.permute.xlu1 %250 }
  0xad   :  { %v249_v51 = vpop.permute.xlu0 %248  ;;  %2787 = vmatprep.mubr.f32.mxu0 %v492_v53  ;;  %2889 = vmatpush3.msra.mxu0 %v3691_v21  ;;  %v324_v63 = vsel %vm314_vm2, %v307_v54, %v251_v20 }
  0xae   :  { %v323_v26 = vsel %vm314_vm2, %v306_v8, %v249_v51  ;;  %2788 = vmatmul.mubr.f32.gmra.mxu0 %v502_v2  ;;  %2970 = vmatprep.subr.mxu0 %v3462_v30  ;;  %v4001_v10 = vand.u32 4294901760, %v324_v63  ;;  %v35_v51 = vld [vmem:[%s4832_s0 + $0x80] sm:$0xff] }
  0xaf   :  { %v4003_v41 = vand.u32 4294901760, %v323_v26 }
  0xb0   :  { %4976 = vst [vmem:[#allocation15_spill] sm:$0xff] %v4001_v10  ;;  %v4006_v25 = vsub.f32 %v324_v63, %v4001_v10  ;;  %v127_v58 = vpop.permute.xlu1 %126 }
  0xb1   :  { %4977 = vst [vmem:[#allocation16_spill] sm:$0xff] %v4003_v41  ;;  %v4009_v40 = vsub.f32 %v323_v26, %v4003_v41  ;;  %v125_v62 = vpop.permute.xlu0 %124  ;;  %2846 = vmatprep.mubr.f32.mxu1 %v4003_v41  ;;  %v292_v8 = vsel %vm280_vm0, %v35_v51, %v127_v58 }
  0xb2   :  { %2847 = vmatmul.mubr.f32.gmra.mxu1 %v4001_v10  ;;  %v4864_v20 = vand.u32 4294901760, %v4006_v25  ;;  %v291_v63 = vsel %vm280_vm0, %v34_v52, %v125_v62 }
  0xb3   :  { %v4861_v21 = vand.u32 4294901760, %v4009_v40 }
  0xb4   :  { %v191_v49 = vpop.permute.xlu1 %190  ;;  %v521_v45 = vsub.f32 %v4006_v25, %v4864_v20 }
  0xb5   :  { %v189_v53 = vpop.permute.xlu0 %188  ;;  %v511_v2 = vsub.f32 %v4009_v40, %v4861_v21  ;;  %v309_v26 = vsel %vm297_vm1, %v292_v8, %v191_v49 }
  0xb6   :  { %v522_v54 = vand.u32 4294901760, %v521_v45  ;;  %v308_v44 = vsel %vm297_vm1, %v291_v63, %v189_v53 }
  0xb7   :  { %v512_v34 = vand.u32 4294901760, %v511_v2 }
  0xb8   :  { %v255_v10 = vpop.permute.xlu1 %254 }
  0xb9   :  { %v253_v41 = vpop.permute.xlu0 %252  ;;  %2790 = vmatprep.mubr.f32.mxu0 %v512_v34  ;;  %v326_v7 = vsel %vm314_vm2, %v309_v26, %v255_v10 }
  0xba   :  { %v325_v21 = vsel %vm314_vm2, %v308_v44, %v253_v41  ;;  %2791 = vmatmul.mubr.f32.gmra.mxu0 %v522_v54  ;;  %v4033_v29 = vand.u32 4294901760, %v326_v7  ;;  %v37_v41 = vld [vmem:[%s4832_s0 + $0x98] sm:$0xff] }
  0xbb   :  { %v4035_v2 = vand.u32 4294901760, %v325_v21 }
  0xbc   :  { %4978 = vst [vmem:[#allocation17_spill] sm:$0xff] %v4033_v29  ;;  %v4038_v58 = vsub.f32 %v326_v7, %v4033_v29  ;;  %v131_v51 = vpop.permute.xlu1 %130  ;;  %v36_v7 = vld [vmem:[%s4832_s0 + $0x90] sm:$0xff] }
  0xbd   :  { %4979 = vst [vmem:[#allocation18_spill] sm:$0xff] %v4035_v2  ;;  %v4041_v62 = vsub.f32 %v325_v21, %v4035_v2  ;;  %v129_v52 = vpop.permute.xlu0 %128  ;;  %2849 = vmatprep.mubr.f32.mxu1 %v4035_v2  ;;  %v294_v8 = vsel %vm280_vm0, %v37_v41, %v131_v51 }
  0xbe   :  { %2850 = vmatmul.mubr.f32.gmra.mxu1 %v4033_v29  ;;  %v4874_v44 = vand.u32 4294901760, %v4038_v58  ;;  %v293_v63 = vsel %vm280_vm0, %v36_v7, %v129_v52 }
  0xbf   :  { %v4871_v10 = vand.u32 4294901760, %v4041_v62 }
  0xc0   :  { %v195_v21 = vpop.permute.xlu1 %194  ;;  %v541_v45 = vsub.f32 %v4038_v58, %v4874_v44 }
  0xc1   :  { %v193_v49 = vpop.permute.xlu0 %192  ;;  %v531_v53 = vsub.f32 %v4041_v62, %v4871_v10  ;;  %v311_v26 = vsel %vm297_vm1, %v294_v8, %v195_v21 }
  0xc2   :  { %v542_v54 = vand.u32 4294901760, %v541_v45  ;;  %v310_v20 = vsel %vm297_vm1, %v293_v63, %v193_v49 }
  0xc3   :  { %v532_v34 = vand.u32 4294901760, %v531_v53 }
  0xc4   :  { %v259_v29 = vpop.permute.xlu1 %258 }
  0xc5   :  { %v257_v2 = vpop.permute.xlu0 %256  ;;  %2793 = vmatprep.mubr.f32.mxu0 %v532_v34  ;;  %v328_v48 = vsel %vm314_vm2, %v311_v26, %v259_v29 }
  0xc6   :  { %v327_v10 = vsel %vm314_vm2, %v310_v20, %v257_v2  ;;  %2794 = vmatmul.mubr.f32.gmra.mxu0 %v542_v54  ;;  %v4065_v0 = vand.u32 4294901760, %v328_v48  ;;  %v39_v2 = vld [vmem:[%s4832_s0 + $0xb0] sm:$0xff] }
  0xc7   :  { %v4067_v53 = vand.u32 4294901760, %v327_v10 }
  0xc8   :  { %4980 = vst [vmem:[#allocation19_spill] sm:$0xff] %v4065_v0  ;;  %v4070_v51 = vsub.f32 %v328_v48, %v4065_v0  ;;  %v135_v41 = vpop.permute.xlu1 %134  ;;  %v38_v48 = vld [vmem:[%s4832_s0 + $0xa8] sm:$0xff] }
  0xc9   :  { %4981 = vst [vmem:[#allocation20_spill] sm:$0xff] %v4067_v53  ;;  %v4073_v52 = vsub.f32 %v327_v10, %v4067_v53  ;;  %v133_v7 = vpop.permute.xlu0 %132  ;;  %2852 = vmatprep.mubr.f32.mxu1 %v4067_v53  ;;  %v296_v8 = vsel %vm280_vm0, %v39_v2, %v135_v41  ;;  %v4982_v2 = vand.u32 4294901760, %v3817_v11 }
  0xca   :  { %2853 = vmatmul.mubr.f32.gmra.mxu1 %v4065_v0  ;;  %v560_v20 = vand.u32 4294901760, %v4070_v51  ;;  %v295_v63 = vsel %vm280_vm0, %v38_v48, %v133_v7  ;;  %v4984_v48 = vand.u32 4294901760, %v3861_v12 }
  0xcb   :  { %v4881_v29 = vand.u32 4294901760, %v4073_v52 }
  0xcc   :  { %v199_v10 = vpop.permute.xlu1 %198  ;;  %v561_v45 = vsub.f32 %v4070_v51, %v560_v20 }
  0xcd   :  { %v197_v21 = vpop.permute.xlu0 %196  ;;  %v551_v49 = vsub.f32 %v4073_v52, %v4881_v29  ;;  %v313_v26 = vsel %vm297_vm1, %v296_v8, %v199_v10  ;;  %v1753_v8 = vld [vmem:[%s4836_s4 + $0x68] sm:$0xff] }
  0xce   :  { %v562_v54 = vand.u32 4294901760, %v561_v45  ;;  %v312_v44 = vsel %vm297_vm1, %v295_v63, %v197_v21  ;;  %v4985_v45 = vand.u32 4294901760, %v3858_v39 }
  0xcf   :  { %v552_v34 = vand.u32 4294901760, %v551_v49 }
  0xd0   :  { %v263_v0 = vpop.permute.xlu1 %262 }
  0xd1   :  { %v261_v53 = vpop.permute.xlu0 %260  ;;  %2796 = vmatprep.mubr.f32.mxu0 %v552_v34  ;;  %v330_v16 = vsel %vm314_vm2, %v313_v26, %v263_v0  ;;  %v4986_v34 = vand.u32 4294901760, %v3913_v22 }
  0xd2   :  { %v329_v29 = vsel %vm314_vm2, %v312_v44, %v261_v53  ;;  %2797 = vmatmul.mubr.f32.gmra.mxu0 %v562_v54  ;;  %v4097_v35 = vand.u32 4294901760, %v330_v16 }
  0xd3   :  { %v4099_v49 = vand.u32 4294901760, %v329_v29 }
  0xd4   :  { %v4102_v41 = vsub.f32 %v330_v16, %v4097_v35 }
  0xd5   :  { %v4105_v7 = vsub.f32 %v329_v29, %v4099_v49  ;;  %2855 = vmatprep.mubr.f32.mxu1 %v4099_v49  ;;  %v4983_v29 = vand.u32 4294901760, %v3814_v9 }
  0xd6   :  { %2856 = vmatmul.mubr.f32.gmra.mxu1 %v4097_v35  ;;  %v580_v44 = vand.u32 4294901760, %v4102_v41 }
  0xd7   :  { %2946 = vmatprep.mubr.f32.mxu1 %v4982_v2  ;;  %v570_v0 = vand.u32 4294901760, %v4105_v7 }
  0xd8   :  { %v581_v16 = vsub.f32 %v4102_v41, %v580_v44 }
  0xd9   :  { %v571_v53 = vsub.f32 %v4105_v7, %v570_v0 }
  0xda   :  { %2947 = vmatmul.mubr.f32.vlgmr.msra.gmra.mxu1 %v4983_v29  ;;  %v582_v21 = vand.u32 4294901760, %v581_v16 }
  0xdb   :  { %2949 = vmatprep.mubr.f32.mxu1 %v4984_v48  ;;  %3027 = vmatpush3.msra.mxu1 %v3412_v13  ;;  %v572_v10 = vand.u32 4294901760, %v571_v53  ;;  %v4987_v13 = vand.u32 4294901760, %v3910_v24  ;;  %v1751_v53 = vld [vmem:[%s4836_s4 + $0x58] sm:$0xff] }
  0xdc   :  { %3028 = vmatprep.subr.mxu1 %v3423_v17 }
  0xdd   :  { %2799 = vmatprep.mubr.f32.mxu0 %v572_v10  ;;  %3029 = vmatpush3.msra.mxu1 %v3423_v17  ;;  %v4988_v17 = vand.u32 4294901760, %v3965_v38  ;;  %v4900_v10 = vmov 0.0  }
  0xde   :  { %2800 = vmatmul.mubr.f32.gmra.mxu0 %v582_v21  ;;  %2950 = vmatmul.mubr.f32.gmra.mxu1 %v4985_v45  ;;  %v4317_v45 = vand.u32 4294901760, %v1751_v53 }
  0xdf   :  { %3030 = vmatprep.subr.mxu1 %v3425_v18  ;;  %2890 = vmatprep.mubr.f32.mxu0 %v3817_v11 }
  0xe0   :  { %2952 = vmatprep.mubr.f32.mxu1 %v4986_v34  ;;  %3031 = vmatpush3.msra.mxu1 %v3425_v18  ;;  %v4989_v18 = vand.u32 4294901760, %v3962_v50  ;;  %v1750_v34 = vld [vmem:[%s4836_s4 + $0x50] sm:$0xff] }
  0xe1   :  { %3032 = vmatprep.subr.mxu1 %v3427_v19 }
  0xe2   :  { %3033 = vmatpush3.msra.mxu1 %v3427_v19  ;;  %2891 = vmatmul.mubr.f32.vlgmr.msra.gmra.mxu0 %v3814_v9  ;;  %v4990_v19 = vand.u32 4294901760, %v4009_v40 }
  0xe3   :  { %2953 = vmatmul.mubr.f32.gmra.mxu1 %v4987_v13  ;;  %2971 = vmatpush3.msra.mxu0 %v3462_v30  ;;  %v4992_v30 = vand.u32 4294901760, %v4041_v62 }
  0xe4   :  { %3034 = vmatprep.subr.mxu1 %v3439_v23  ;;  %2893 = vmatprep.mubr.f32.mxu0 %v3861_v12 }
  0xe5   :  { %2955 = vmatprep.mubr.f32.mxu1 %v4988_v17  ;;  %2972 = vmatprep.subr.mxu0 %v3468_v32 }
  0xe6   :  { %3035 = vmatpush3.msra.mxu1 %v3439_v23  ;;  %2973 = vmatpush3.msra.mxu0 %v3468_v32  ;;  %v4991_v23 = vand.u32 4294901760, %v4006_v25  ;;  %v4994_v32 = vand.u32 4294901760, %v4073_v52 }
  0xe7   :  { %3036 = vmatprep.subr.mxu1 %v3465_v31  ;;  %2974 = vmatprep.subr.mxu0 %v3471_v33 }
  0xe8   :  { %3037 = vmatpush3.msra.mxu1 %v3465_v31  ;;  %2894 = vmatmul.mubr.f32.gmra.mxu0 %v3858_v39  ;;  %v4993_v31 = vand.u32 4294901760, %v4038_v58 }
  0xe9   :  { %2956 = vmatmul.mubr.f32.gmra.mxu1 %v4989_v18  ;;  %2975 = vmatpush3.msra.mxu0 %v3471_v33  ;;  %v4995_v33 = vld [vmem:[#allocation8_spill] sm:$0xff] }
  0xea   :  { %3038 = vmatprep.subr.mxu1 %v3483_v37  ;;  %2896 = vmatprep.mubr.f32.mxu0 %v3913_v22 }
  0xeb   :  { %2958 = vmatprep.mubr.f32.mxu1 %v4990_v19  ;;  %2976 = vmatprep.subr.mxu0 %v3480_v36  ;;  %v4326_v19 = vand.u32 4294901760, %v1750_v34 }
  0xec   :  { %3039 = vmatpush3.msra.mxu1 %v3483_v37  ;;  %2977 = vmatpush3.msra.mxu0 %v3480_v36  ;;  %v4996_v36 = vld [vmem:[#allocation5_spill] sm:$0xff]  ;;  %v4997_v37 = vld [vmem:[#allocation10_spill] sm:$0xff] }
  0xed   :  { %3040 = vmatprep.subr.mxu1 %v3508_v47  ;;  %2978 = vmatprep.subr.mxu0 %v3505_v46 }
  0xee   :  { %3041 = vmatpush3.msra.mxu1 %v3508_v47  ;;  %2897 = vmatmul.mubr.f32.gmra.mxu0 %v3910_v24  ;;  %v4999_v47 = vld [vmem:[#allocation9_spill] sm:$0xff] }
  0xef   :  { %2959 = vmatmul.mubr.f32.gmra.mxu1 %v4991_v23  ;;  %2979 = vmatpush3.msra.mxu0 %v3505_v46  ;;  %v4998_v46 = vld [vmem:[#allocation6_spill] sm:$0xff] }
  0xf0   :  { %3042 = vmatprep.subr.mxu1 %v3534_v56  ;;  %2899 = vmatprep.mubr.f32.mxu0 %v3965_v38 }
  0xf1   :  { %2961 = vmatprep.mubr.f32.mxu1 %v4992_v30  ;;  %2980 = vmatprep.subr.mxu0 %v3531_v55  ;;  %v4331_v30 = vsub.f32 %v1751_v53, %v4317_v45  ;;  %v1744_v53 = vld [vmem:[%s4836_s4 + $0x20] sm:$0xff] }
  0xf2   :  { %3043 = vmatpush3.msra.mxu1 %v3534_v56  ;;  %2981 = vmatpush3.msra.mxu0 %v3531_v55  ;;  %v5000_v55 = vld [vmem:[#allocation7_spill] sm:$0xff]  ;;  %v5001_v56 = vld [vmem:[#allocation12_spill] sm:$0xff] }
  0xf3   :  { %3044 = vmatprep.subr.mxu1 %v3546_v61  ;;  %2982 = vmatprep.subr.mxu0 %v3543_v60 }
  0xf4   :  { %3045 = vmatpush3.msra.mxu1 %v3546_v61  ;;  %2900 = vmatmul.mubr.f32.gmra.mxu0 %v3962_v50  ;;  %v5003_v61 = vld [vmem:[#allocation14_spill] sm:$0xff] }
  0xf5   :  { %2962 = vmatmul.mubr.f32.gmra.mxu1 %v4993_v31  ;;  %2983 = vmatpush3.msra.mxu0 %v3543_v60  ;;  %v5002_v60 = vld [vmem:[#allocation11_spill] sm:$0xff]  ;;  %5019 = vst [vmem:[#allocation14_spill] sm:$0xff] %v4317_v45  ;;  %v1749_v31 = vld [vmem:[%s4836_s4 + $0x48] sm:$0xff] }
  0xf6   :  { %3046 = vmatprep.subr.mxu1 %v3569_v5  ;;  %2902 = vmatprep.mubr.f32.mxu0 %v4009_v40 }
  0xf7   :  { %2964 = vmatprep.mubr.f32.mxu1 %v4994_v32  ;;  %2984 = vmatprep.subr.mxu0 %v3566_v4 }
  0xf8   :  { %3047 = vmatpush3.msra.mxu1 %v3569_v5  ;;  %2985 = vmatpush3.msra.mxu0 %v3566_v4  ;;  %v5004_v4 = vld [vmem:[#allocation13_spill] sm:$0xff]  ;;  %v5005_v5 = vld [vmem:[#allocation16_spill] sm:$0xff] }
  0xf9   :  { %3048 = vmatprep.subr.mxu1 %v3595_v15  ;;  %2986 = vmatprep.subr.mxu0 %v3592_v14  ;;  %5020 = vst [vmem:[#allocation13_spill] sm:$0xff] %v4326_v19  ;;  %5021 = vst [vmem:[#allocation16_spill] sm:$0xff] %v4331_v30 }
  0xfa   :  { %3049 = vmatpush3.msra.mxu1 %v3595_v15  ;;  %2903 = vmatmul.mubr.f32.gmra.mxu0 %v4006_v25  ;;  %v5007_v15 = vld [vmem:[#allocation18_spill] sm:$0xff] }
  0xfb   :  { %2965 = vmatmul.mubr.f32.gmra.mxu1 %v560_v20  ;;  %2987 = vmatpush3.msra.mxu0 %v3592_v14  ;;  %v5006_v14 = vld [vmem:[#allocation15_spill] sm:$0xff] }
  0xfc   :  { %3050 = vmatprep.subr.mxu1 %v3607_v28  ;;  %2905 = vmatprep.mubr.f32.mxu0 %v4041_v62 }
  0xfd   :  { %2967 = vmatprep.mubr.f32.mxu1 %v570_v0  ;;  %2988 = vmatprep.subr.mxu0 %v3604_v27 }
  0xfe   :  { %3051 = vmatpush3.msra.mxu1 %v3607_v28  ;;  %2989 = vmatpush3.msra.mxu0 %v3604_v27  ;;  %v5008_v27 = vld [vmem:[#allocation17_spill] sm:$0xff]  ;;  %v5009_v28 = vld [vmem:[#allocation20_spill] sm:$0xff] }
  0xff   :  { %3052 = vmatprep.subr.mxu1 %v3630_v43  ;;  %2990 = vmatprep.subr.mxu0 %v3627_v42 }
 0x100   :  { %3053 = vmatpush3.msra.mxu1 %v3630_v43  ;;  %2906 = vmatmul.mubr.f32.gmra.mxu0 %v4038_v58  ;;  %v1754_v58 = vld [vmem:[%s4836_s4 + $0x70] sm:$0xff] }
 0x101   :  { %2968 = vmatmul.mubr.f32.gmra.mxu1 %v580_v44  ;;  %2991 = vmatpush3.msra.mxu0 %v3627_v42  ;;  %v5010_v42 = vld [vmem:[#allocation19_spill] sm:$0xff]  ;;  %v4280_v20 = vand.u32 4294901760, %v1754_v58 }
 0x102   :  { %3054 = vmatprep.subr.mxu1 %v3656_v59  ;;  %2908 = vmatprep.mubr.f32.mxu0 %v4073_v52 }
 0x103   :  { %2992 = vmatprep.subr.mxu0 %v3653_v57  ;;  %3055 = vmatpush3.msra.mxu1 %v3656_v59  ;;  %5013 = vst [vmem:[#allocation10_spill] sm:$0xff] %v4280_v20  ;;  %v4289_v26 = vsub.f32 %v1754_v58, %v4280_v20  ;;  %v1745_v58 = vld [vmem:[%s4836_s4 + $0x28] sm:$0xff] }
 0x104   :  { %3058 = vmatprep.mubr.f32.mxu1 %v3811_v6  ;;  %2993 = vmatpush3.msra.mxu0 %v3653_v57 }
 0x105   :  { %3056 = vmatprep.subr.mxu1 %v3668_v3  ;;  %2994 = vmatprep.subr.mxu0 %v3665_v1  ;;  %5014 = vst [vmem:[#allocation6_spill] sm:$0xff] %v4289_v26  ;;  %v4898_v2 = vand.u32 4294901760, %v4289_v26 }
 0x106   :  { %3057 = vmatpush3.msra.mxu1 %v3668_v3  ;;  %2909 = vmatmul.mubr.f32.gmra.mxu0 %v4070_v51 }
 0x107   :  { %2995 = vmatpush3.msra.mxu0 %v3665_v1  ;;  %3059 = vmatmul.mubr.f32.vlgmr.msra.gmra.mxu1 %v4995_v33  ;;  %v1895_v29 = vsub.f32 %v4289_v26, %v4898_v2 }
 0x108   :  { %2911 = vmatprep.mubr.f32.mxu0 %v4105_v7  ;;  %2996 = vmatprep.subr.mxu0 %v4996_v36 }
 0x109   :  { %3061 = vmatprep.mubr.f32.mxu1 %v4997_v37  ;;  %2997 = vmatpush3.msra.mxu0 %v4996_v36  ;;  %v1896_v17 = vand.u32 4294901760, %v1895_v29  ;;  %v4339_v36 = vsub.f32 %v1750_v34, %v4326_v19 }
 0x10a   :  { %2998 = vmatprep.subr.mxu0 %v4998_v46  ;;  %2912 = vmatmul.mubr.f32.gmra.mxu0 %v4102_v41  ;;  %v1752_v41 = vld [vmem:[%s4836_s4 + $0x60] sm:$0xff] }
 0x10b   :  { %2999 = vmatpush3.msra.mxu0 %v4998_v46  ;;  %3062 = vmatmul.mubr.f32.gmra.mxu1 %v4999_v47  ;;  %v4303_v44 = vand.u32 4294901760, %v1752_v41  ;;  %5022 = vst [vmem:[#allocation15_spill] sm:$0xff] %v4339_v36 }
 0x10c   :  { %3000 = vmatprep.subr.mxu0 %v5000_v55  ;;  %3002 = vmatprep.mubr.f32.mxu0 %v3811_v6 }
 0x10d   :  { %3064 = vmatprep.mubr.f32.mxu1 %v5001_v56  ;;  %3001 = vmatpush3.msra.mxu0 %v5000_v55  ;;  %5017 = vst [vmem:[#allocation12_spill] sm:$0xff] %v4303_v44  ;;  %v4314_v21 = vsub.f32 %v1752_v41, %v4303_v44  ;;  %v4895_v55 = vand.u32 4294901760, %v4331_v30  ;;  %v4406_v41 = vand.u32 4294901760, %v1745_v58 }
 0x10e   :  { %3003 = vmatmul.mubr.f32.vlgmr.msra.gmra.mxu0 %v4995_v33  ;;  %3117 = vmatprep.subr.mxu1 %v4900_v10 }
 0x10f   :  { %3065 = vmatmul.mubr.f32.gmra.mxu1 %v5002_v60  ;;  %3005 = vmatprep.mubr.f32.mxu0 %v4997_v37  ;;  %5018 = vst [vmem:[#allocation11_spill] sm:$0xff] %v4314_v21  ;;  %v4896_v23 = vand.u32 4294901760, %v4314_v21  ;;  %v4341_v37 = vand.u32 4294901760, %v1749_v31  ;;  %5030 = vst [vmem:[#allocation24_spill] sm:$0xff] %v4406_v41 }
 0x110   :  { %3067 = vmatprep.mubr.f32.mxu1 %v5003_v61  ;;  %3082 = vmatprep.subr.mxu0 %v4900_v10 }
 0x111   :  { %5023 = vst [vmem:[#allocation18_spill] sm:$0xff] %v4341_v37 }
 0x112   :  { %3006 = vmatmul.mubr.f32.gmra.mxu0 %v4999_v47  ;;  %v1909_v47 = vsub.f32 %v4314_v21, %v4896_v23 }
 0x113   :  { %3068 = vmatmul.mubr.f32.gmra.mxu1 %v5004_v4  ;;  %3008 = vmatprep.mubr.f32.mxu0 %v5001_v56  ;;  %v1748_v56 = vld [vmem:[%s4836_s4 + $0x40] sm:$0xff] }
 0x114   :  { %3070 = vmatprep.mubr.f32.mxu1 %v5005_v5 }
 0x116   :  { %3009 = vmatmul.mubr.f32.gmra.mxu0 %v5002_v60 }
 0x117   :  { %3071 = vmatmul.mubr.f32.gmra.mxu1 %v5006_v14  ;;  %3011 = vmatprep.mubr.f32.mxu0 %v5003_v61 }
 0x118   :  { %3073 = vmatprep.mubr.f32.mxu1 %v5007_v15 }
 0x11a   :  { %3012 = vmatmul.mubr.f32.gmra.mxu0 %v5004_v4  ;;  %v4894_v4 = vand.u32 4294901760, %v4339_v36 }
 0x11b   :  { %3074 = vmatmul.mubr.f32.gmra.mxu1 %v5008_v27  ;;  %3014 = vmatprep.mubr.f32.mxu0 %v5005_v5  ;;  %v4357_v5 = vsub.f32 %v1749_v31, %v4341_v37  ;;  %v1743_v31 = vld [vmem:[%s4836_s4 + $0x18] sm:$0xff] }
 0x11c   :  { %3076 = vmatprep.mubr.f32.mxu1 %v5009_v28 }
 0x11d   :  { %5024 = vst [vmem:[#allocation17_spill] sm:$0xff] %v4357_v5 }
 0x11e   :  { %3015 = vmatmul.mubr.f32.gmra.mxu0 %v5006_v14  ;;  %v4359_v14 = vand.u32 4294901760, %v1748_v56 }
 0x11f   :  { %3077 = vmatmul.mubr.f32.gmra.mxu1 %v5010_v42  ;;  %3017 = vmatprep.mubr.f32.mxu0 %v5007_v15 }
 0x120   :  { %3079 = vmatprep.mubr.f32.mxu1 %v4099_v49  ;;  %5025 = vst [vmem:[#allocation20_spill] sm:$0xff] %v4359_v14 }
 0x122   :  { %3018 = vmatmul.mubr.f32.gmra.mxu0 %v5008_v27  ;;  %v1910_v27 = vand.u32 4294901760, %v1909_v47 }
 0x123   :  { %3080 = vmatmul.mubr.f32.gmra.mxu1 %v4097_v35  ;;  %3020 = vmatprep.mubr.f32.mxu0 %v5009_v28  ;;  %v1916_v28 = vsub.f32 %v4331_v30, %v4895_v55 }
 0x124   :  { %3149 = vmatprep.mubr.msk.f32.mxu1 %vm3325_vm3, %v4900_v10 }
 0x126   :  { %3021 = vmatmul.mubr.f32.gmra.mxu0 %v5010_v42  ;;  %v1747_v42 = vld [vmem:[%s4836_s4 + $0x38] sm:$0xff] }
 0x127   :  { %3023 = vmatprep.mubr.f32.mxu0 %v4099_v49  ;;  %v4291_v49 = vand.u32 4294901760, %v1753_v8 }
 0x129   :  { %5015 = vst [vmem:[#allocation9_spill] sm:$0xff] %v4291_v49  ;;  %v4301_v0 = vsub.f32 %v1753_v8, %v4291_v49 }
 0x12a   :  { %3024 = vmatmul.mubr.f32.gmra.mxu0 %v4097_v35  ;;  %v1755_v35 = vld [vmem:[%s4836_s4 + $0x78] sm:$0xff] }
 0x12b   :  { %v4270_v25 = vand.u32 4294901760, %v1755_v35  ;;  %5016 = vst [vmem:[#allocation7_spill] sm:$0xff] %v4301_v0  ;;  %v4897_v48 = vand.u32 4294901760, %v4301_v0  ;;  %3114 = vmatprep.mubr.msk.f32.mxu0 %vm3325_vm3, %v4900_v10 }
 0x12d   :  { %5011 = vst [vmem:[#allocation8_spill] sm:$0xff] %v4270_v25  ;;  %v4278_v52 = vsub.f32 %v1755_v35, %v4270_v25  ;;  %v1902_v18 = vsub.f32 %v4301_v0, %v4897_v48  ;;  %3083 = vmatpush3.msra.mxu0 %v4270_v25 }
 0x12e   :  { %3084 = vmatprep.subr.mxu0 %v4900_v10 }
 0x12f   :  { %5012 = vst [vmem:[#allocation5_spill] sm:$0xff] %v4278_v52  ;;  %v4899_v63 = vand.u32 4294901760, %v4278_v52  ;;  %v1903_v33 = vand.u32 4294901760, %v1902_v18  ;;  %3085 = vmatpush3.msra.mxu0 %v4280_v20 }
 0x130   :  { %3086 = vmatprep.subr.mxu0 %v4900_v10 }
 0x131   :  { %v1888_v7 = vsub.f32 %v4278_v52, %v4899_v63  ;;  %3087 = vmatpush3.msra.mxu0 %v4291_v49 }
 0x132   :  { %3088 = vmatprep.subr.mxu0 %v4900_v10 }
 0x133   :  { %v1889_v16 = vand.u32 4294901760, %v1888_v7  ;;  %3089 = vmatpush3.msra.mxu0 %v4303_v44  ;;  %v2449_v44 = vld [vmem:[%s4833_s1] ss:$0 sm:$0xff] }
 0x134   :  { %3090 = vmatprep.subr.mxu0 %v4900_v10 }
 0x135   :  { %3118 = vmatpush3.msra.mxu1 %v1889_v16  ;;  %3091 = vmatpush3.msra.mxu0 %v4317_v45 }
 0x136   :  { %3119 = vmatprep.subr.mxu1 %v4900_v10  ;;  %3092 = vmatprep.subr.mxu0 %v4900_v10 }
 0x137   :  { %3120 = vmatpush3.msra.mxu1 %v1896_v17  ;;  %3093 = vmatpush3.msra.mxu0 %v4326_v19  ;;  %v4423_v17 = vand.u32 4294901760, %v1744_v53 }
 0x138   :  { %3121 = vmatprep.subr.mxu1 %v4900_v10  ;;  %3094 = vmatprep.subr.mxu0 %v4900_v10 }
 0x139   :  { %3122 = vmatpush3.msra.mxu1 %v1903_v33  ;;  %3095 = vmatpush3.msra.mxu0 %v4341_v37  ;;  %5033 = vst [vmem:[#allocation27_spill] sm:$0xff] %v4423_v17 }
 0x13a   :  { %3123 = vmatprep.subr.mxu1 %v4900_v10  ;;  %3096 = vmatprep.subr.mxu0 %v4900_v10 }
 0x13b   :  { %3124 = vmatpush3.msra.mxu1 %v1910_v27  ;;  %3097 = vmatpush3.msra.mxu0 %v4359_v14 }
 0x13c   :  { %3125 = vmatprep.subr.mxu1 %v4900_v10  ;;  %3098 = vmatprep.subr.mxu0 %v4900_v10 }
 0x142   :  { %v2836_v43 = vpop.f32.mrf.mxu1 }
 0x144   :  { %v735_v1 = vpop.f32.mrf.mxu1 }
 0x14a   :  { %v2780_v57 = vpop.f32.mrf.mxu0 }
 0x14b   :  { %v4259_v59 = vadd.f32 %v2836_v43, %v2780_v57  ;;  %v1923_v43 = vsub.f32 %v4339_v36, %v4894_v4  ;;  %v4893_v57 = vand.u32 4294901760, %v4357_v5 }
 0x14c   :  { %v434_v3 = vpop.f32.mrf.mxu0 }
 0x14d   :  { %v4261_v6 = vadd.f32 %v735_v1, %v434_v3  ;;  %v4377_v1 = vsub.f32 %v1748_v56, %v4359_v14  ;;  %v4379_v3 = vand.u32 4294901760, %v1747_v42  ;;  %v4434_v56 = vsub.f32 %v1744_v53, %v4423_v17 }
 0x14e   :  { %v2839_v9 = vpop.f32.mrf.mxu1 }
 0x14f   :  { %5026 = vst [vmem:[#allocation19_spill] sm:$0xff] %v4377_v1  ;;  %5027 = vst [vmem:[#allocation21_spill] sm:$0xff] %v4379_v3  ;;  %v4392_v35 = vsub.f32 %v1747_v42, %v4379_v3  ;;  %3099 = vmatpush3.msra.mxu0 %v4379_v3 }
 0x150   :  { %v747_v12 = vpop.f32.mrf.mxu1  ;;  %5034 = vst [vmem:[#allocation28_spill] sm:$0xff] %v4434_v56  ;;  %3100 = vmatprep.subr.mxu0 %v4900_v10 }
 0x151   :  { %5028 = vst [vmem:[#allocation22_spill] sm:$0xff] %v4392_v35  ;;  %v4891_v8 = vand.u32 4294901760, %v4392_v35 }
 0x153   :  { %v1944_v34 = vsub.f32 %v4392_v35, %v4891_v8 }
 0x155   :  { %v1945_v33 = vand.u32 4294901760, %v1944_v34 }
 0x156   :  { %v2783_v11 = vpop.f32.mrf.mxu0 }
 0x157   :  { %v4263_v39 = vadd.f32 %v2839_v9, %v2783_v11  ;;  %v1917_v9 = vand.u32 4294901760, %v1916_v28  ;;  %v1746_v11 = vld [vmem:[%s4836_s4 + $0x30] sm:$0xff] }
 0x158   :  { %v454_v24 = vpop.f32.mrf.mxu0  ;;  %v1742_v28 = vld [vmem:[%s4836_s4 + $0x10] sm:$0xff] }
 0x159   :  { %v4265_v22 = vadd.f32 %v747_v12, %v454_v24  ;;  %v1924_v12 = vand.u32 4294901760, %v1923_v43  ;;  %v1930_v24 = vsub.f32 %v4357_v5, %v4893_v57  ;;  %3126 = vmatpush3.msra.mxu1 %v1917_v9 }
 0x15a   :  { %v2842_v50 = vpop.f32.mrf.mxu1  ;;  %3127 = vmatprep.subr.mxu1 %v4900_v10 }
 0x15b   :  { %3128 = vmatpush3.msra.mxu1 %v1924_v12 }
 0x15c   :  { %v759_v62 = vpop.f32.mrf.mxu1  ;;  %3129 = vmatprep.subr.mxu1 %v4900_v10 }
 0x162   :  { %v2786_v38 = vpop.f32.mrf.mxu0 }
 0x163   :  { %v4272_v40 = vadd.f32 %v2842_v50, %v2786_v38  ;;  %v4892_v50 = vand.u32 4294901760, %v4377_v1  ;;  %v4395_v38 = vand.u32 4294901760, %v1746_v11 }
 0x164   :  { %v474_v51 = vpop.f32.mrf.mxu0 }
 0x165   :  { %v4282_v54 = vadd.f32 %v759_v62, %v474_v51  ;;  %5029 = vst [vmem:[#allocation23_spill] sm:$0xff] %v4395_v38  ;;  %v1931_v62 = vand.u32 4294901760, %v1930_v24  ;;  %v1937_v51 = vsub.f32 %v4377_v1, %v4892_v50  ;;  %v4409_v7 = vsub.f32 %v1746_v11, %v4395_v38  ;;  %3101 = vmatpush3.msra.mxu0 %v4395_v38 }
 0x166   :  { %v2845_v13 = vpop.f32.mrf.mxu1  ;;  %v4888_v11 = vand.u32 4294901760, %v4434_v56  ;;  %v4456_v24 = vand.u32 4294901760, %v1742_v28  ;;  %3102 = vmatprep.subr.mxu0 %v4900_v10  ;;  %v1633_v38 = vlaneseq }
 0x167   :  { %5031 = vst [vmem:[#allocation25_spill] sm:$0xff] %v4409_v7  ;;  %v1938_v29 = vand.u32 4294901760, %v1937_v51  ;;  %3130 = vmatpush3.msra.mxu1 %v1931_v62  ;;  %v4890_v18 = vand.u32 4294901760, %v4409_v7  ;;  %v1741_v51 = vld [vmem:[%s4836_s4 + $0x8] sm:$0xff]  ;;  %3103 = vmatpush3.msra.mxu0 %v4406_v41 }
 0x168   :  { %v771_v60 = vpop.f32.mrf.mxu1  ;;  %3131 = vmatprep.subr.mxu1 %v4900_v10  ;;  %5037 = vst [vmem:[#allocation31_spill] sm:$0xff] %v4456_v24  ;;  %v4471_v34 = vsub.f32 %v1742_v28, %v4456_v24  ;;  %3104 = vmatprep.subr.mxu0 %v4900_v10  ;;  %v1634_v30 = vshrl.u32 %v1633_v38, 7 }
 0x169   :  { %3132 = vmatpush3.msra.mxu1 %v1938_v29  ;;  %v1951_v27 = vsub.f32 %v4409_v7, %v4890_v18  ;;  %3105 = vmatpush3.msra.mxu0 %v4423_v17 }
 0x16a   :  { %3133 = vmatprep.subr.mxu1 %v4900_v10  ;;  %5038 = vst [vmem:[#allocation32_spill] sm:$0xff] %v4471_v34  ;;  %3106 = vmatprep.subr.mxu0 %v4900_v10  ;;  %v1635_v26 = vadd.s32 8, %v1634_v30  ;;  %vm1641_vm5 = vcmp.lt.s32.totalorder %v1634_v30, %v2449_v44 }
 0x16b   :  { %3134 = vmatpush3.msra.mxu1 %v1945_v33  ;;  %v1952_v62 = vand.u32 4294901760, %v1951_v27 }
 0x16c   :  { %3135 = vmatprep.subr.mxu1 %v4900_v10  ;;  %vm1642_vm4 = vcmp.lt.s32.totalorder %v1635_v26, %v2449_v44 }
 0x16d   :  { %3136 = vmatpush3.msra.mxu1 %v1952_v62 }
 0x16e   :  { %v2789_v32 = vpop.f32.mrf.mxu0  ;;  %3137 = vmatprep.subr.mxu1 %v4900_v10 }
 0x16f   :  { %v4343_v46 = vadd.f32 %v2845_v13, %v2789_v32  ;;  %v4421_v13 = vsub.f32 %v1745_v58, %v4406_v41 }
 0x170   :  { %v494_v61 = vpop.f32.mrf.mxu0 }
 0x171   :  { %v4361_v15 = vadd.f32 %v771_v60, %v494_v61  ;;  %5032 = vst [vmem:[#allocation26_spill] sm:$0xff] %v4421_v13  ;;  %v4889_v47 = vand.u32 4294901760, %v4421_v13  ;;  %v4436_v60 = vand.u32 4294901760, %v1743_v31 }
 0x172   :  { %v2848_v16 = vpop.f32.mrf.mxu1 }
 0x173   :  { %5035 = vst [vmem:[#allocation29_spill] sm:$0xff] %v4436_v60  ;;  %v1958_v9 = vsub.f32 %v4421_v13, %v4889_v47  ;;  %v4454_v12 = vsub.f32 %v1743_v31, %v4436_v60  ;;  %v4474_v31 = vand.u32 4294901760, %v1741_v51  ;;  %3107 = vmatpush3.msra.mxu0 %v4436_v60 }
 0x174   :  { %v783_v42 = vpop.f32.mrf.mxu1  ;;  %3108 = vmatprep.subr.mxu0 %v4900_v10 }
 0x175   :  { %5036 = vst [vmem:[#allocation30_spill] sm:$0xff] %v4454_v12  ;;  %v1959_v53 = vand.u32 4294901760, %v1958_v9  ;;  %v4884_v29 = vand.u32 4294901760, %v4454_v12  ;;  %5039 = vst [vmem:[#allocation33_spill] sm:$0xff] %v4474_v31  ;;  %3109 = vmatpush3.msra.mxu0 %v4456_v24 }
 0x176   :  { %3110 = vmatprep.subr.mxu0 %v4900_v10 }
 0x177   :  { %v1972_v27 = vsub.f32 %v4454_v12, %v4884_v29  ;;  %3138 = vmatpush3.msra.mxu1 %v1959_v53  ;;  %3111 = vmatpush3.msra.mxu0 %v4474_v31 }
 0x178   :  { %3139 = vmatprep.subr.mxu1 %v4900_v10  ;;  %3112 = vmatprep.subr.mxu0 %v4900_v10 }
 0x179   :  { %v1973_v9 = vand.u32 4294901760, %v1972_v27 }
 0x17a   :  { %v2792_v32 = vpop.f32.mrf.mxu0 }
 0x17b   :  { %v4438_v61 = vadd.f32 %v2848_v16, %v2792_v32  ;;  %v1965_v16 = vsub.f32 %v4434_v56, %v4888_v11  ;;  %v1740_v32 = vld [vmem:[%s4836_s4] sm:$0xff] }
 0x17c   :  { %v514_v43 = vpop.f32.mrf.mxu0  ;;  %v4485_v28 = vand.u32 4294901760, %v1740_v32 }
 0x17d   :  { %v4458_v58 = vadd.f32 %v783_v42, %v514_v43  ;;  %v1966_v33 = vand.u32 4294901760, %v1965_v16  ;;  %v4885_v42 = vand.u32 4294901760, %v4471_v34  ;;  %v4488_v43 = vsub.f32 %v1741_v51, %v4474_v31 }
 0x17e   :  { %5040 = vst [vmem:[#allocation34_spill] sm:$0xff] %v4485_v28  ;;  %v4497_v16 = vsub.f32 %v1740_v32, %v4485_v28  ;;  %v2851_v32 = vpop.f32.mrf.mxu1  ;;  %3113 = vmatpush3.msra.mxu0 %v4485_v28 }
 0x17f   :  { %5041 = vst [vmem:[#allocation35_spill] sm:$0xff] %v4488_v43  ;;  %v1979_v62 = vsub.f32 %v4471_v34, %v4885_v42  ;;  %3140 = vmatpush3.msra.mxu1 %v1966_v33  ;;  %v4886_v53 = vand.u32 4294901760, %v4488_v43  ;;  %3152 = vmatprep.subr.mxu0 %v4900_v10 }
 0x180   :  { %5042 = vst [vmem:[#allocation36_spill] sm:$0xff] %v4497_v16  ;;  %3141 = vmatprep.subr.mxu1 %v4900_v10  ;;  %v4887_v29 = vand.u32 4294901760, %v4497_v16 }
 0x181   :  { %v1980_v51 = vand.u32 4294901760, %v1979_v62  ;;  %3142 = vmatpush3.msra.mxu1 %v1973_v9  ;;  %v1986_v27 = vsub.f32 %v4488_v43, %v4886_v53 }
 0x182   :  { %3143 = vmatprep.subr.mxu1 %v4900_v10  ;;  %v1993_v42 = vsub.f32 %v4497_v16, %v4887_v29 }
 0x183   :  { %3144 = vmatpush3.msra.mxu1 %v1980_v51  ;;  %v1987_v9 = vand.u32 4294901760, %v1986_v27 }
 0x184   :  { %3145 = vmatprep.subr.mxu1 %v4900_v10  ;;  %v1994_v53 = vand.u32 4294901760, %v1993_v42  ;;  %v4527_v42 = vpop.f32.mrf.mxu1 }
 0x185   :  { %3146 = vmatpush3.msra.mxu1 %v1987_v9 }
 0x186   :  { %v2795_v33 = vpop.f32.mrf.mxu0  ;;  %3147 = vmatprep.subr.mxu1 %v4900_v10 }
 0x187   :  { %v4513_v62 = vadd.f32 %v2851_v32, %v2795_v33  ;;  %3148 = vmatpush3.msra.mxu1 %v1994_v53 }
 0x188   :  { %3187 = vmatprep.subr.mxu1 %v4900_v10  ;;  %v4533_v32 = vpop.f32.mrf.mxu0 }
 0x18a   :  { %v4529_v51 = vpop.f32.mrf.mxu1 }
 0x18c   :  { %v4531_v27 = vpop.f32.mrf.mxu1 }
 0x192   :  { %v4537_v53 = vpop.f32.mrf.mxu0 }
 0x194   :  { %v4541_v11 = vpop.f32.mrf.mxu0 }
 0x196   :  { %v4535_v33 = vpop.f32.mrf.mxu1 }
 0x198   :  { %v4539_v9 = vpop.f32.mrf.mxu1 }
 0x19a   :  { %v2948_v29 = vpop.f32.mrf.mxu1 }
 0x19c   :  { %v1123_v47 = vpop.f32.mrf.mxu1 }
 0x19e   :  { %v4543_v18 = vpop.f32.mrf.mxu0  ;;  %v2951_v8 = vpop.f32.mrf.mxu1 }
 0x1a0   :  { %v4545_v50 = vpop.f32.mrf.mxu0  ;;  %v1139_v57 = vpop.f32.mrf.mxu1 }
 0x1a2   :  { %v2892_v4 = vpop.f32.mrf.mxu0 }
 0x1a3   :  { %v4547_v55 = vpop.f32.mrf.mxu1  ;;  %v937_v37 = vadd.f32 %v2892_v4, %v4259_v59 }
 0x1a4   :  { %v929_v23 = vpop.f32.mrf.mxu0 }
 0x1a5   :  { %v4549_v48 = vpop.f32.mrf.mxu1  ;;  %v930_v45 = vadd.f32 %v929_v23, %v4261_v6  ;;  %v1132_v25 = vadd.f32 %v2948_v29, %v937_v37 }
 0x1a8   :  { %v2895_v2 = vpop.f32.mrf.mxu0 }
 0x1a9   :  { %v4551_v63 = vpop.f32.mrf.mxu1  ;;  %v951_v38 = vadd.f32 %v2895_v2, %v4263_v39  ;;  %v3326_v39 = vmov -1e+30  }
 0x1aa   :  { %v943_v10 = vpop.f32.mrf.mxu0  ;;  %v4596_v2 = vsel %vm1642_vm4, 0.0, %v3326_v39  ;;  %v4598_v37 = vsel %vm1641_vm5, 0.0, %v3326_v39 }
 0x1ab   :  { %v4553_v16 = vpop.f32.mrf.mxu1  ;;  %v944_v59 = vadd.f32 %v943_v10, %v4265_v22 }
 0x1ae   :  { %v2898_v43 = vpop.f32.mrf.mxu0 }
 0x1af   :  { %v4555_v34 = vpop.f32.mrf.mxu1  ;;  %v965_v6 = vadd.f32 %v2898_v43, %v4272_v40  ;;  %v796_v40 = vadd.f32 %v4527_v42, %v4533_v32 }
 0x1b0   :  { %v957_v12 = vpop.f32.mrf.mxu0 }
 0x1b1   :  { %v4557_v28 = vpop.f32.mrf.mxu1  ;;  %v1164_v30 = vadd.f32 %v4547_v55, %v965_v6 }
 0x1b4   :  { %v2901_v56 = vpop.f32.mrf.mxu0 }
 0x1b5   :  { %v4559_v31 = vpop.f32.mrf.mxu1 }
 0x1b6   :  { %v971_v13 = vpop.f32.mrf.mxu0 }
 0x1b7   :  { %v4561_v24 = vpop.f32.mrf.mxu1  ;;  %v972_v55 = vadd.f32 %v971_v13, %v4361_v15  ;;  %v820_v13 = vadd.f32 %v4539_v9, %v4545_v50 }
 0x1b8   :  { %5043 = vst [vmem:[#allocation37_spill] sm:$0xff] %v4561_v24  ;;  %v1148_v24 = vadd.f32 %v2951_v8, %v951_v38 }
 0x1ba   :  { %v4563_v7 = vpop.f32.mrf.mxu0 }
 0x1bb   :  { %v4565_v60 = vpop.f32.mrf.mxu1  ;;  %v993_v42 = vadd.f32 %v4563_v7, %v4438_v61 }
 0x1bc   :  { %5044 = vst [vmem:[#allocation38_spill] sm:$0xff] %v4565_v60  ;;  %v4567_v35 = vpop.f32.mrf.mxu0 }
 0x1bd   :  { %v4569_v17 = vpop.f32.mrf.mxu1  ;;  %v1196_v50 = vadd.f32 %v4555_v34, %v993_v42 }
 0x1be   :  { %5045 = vst [vmem:[#allocation39_spill] sm:$0xff] %v4569_v17  ;;  %v1124_v17 = vadd.f32 %v1123_v47, %v930_v45  ;;  %v1140_v45 = vadd.f32 %v1139_v57, %v944_v59  ;;  %v814_v47 = vadd.f32 %v4529_v51, %v4537_v53  ;;  %v1172_v53 = vadd.f32 %v4553_v16, %v972_v55 }
 0x1bf   :  { %v5051_v16 = vld [vmem:[#allocation37_spill] sm:$0xff] }
 0x1c0   :  { %v4571_v1 = vpop.f32.mrf.mxu0 }
 0x1c1   :  { %v4573_v41 = vpop.f32.mrf.mxu1 }
 0x1c2   :  { %5046 = vst [vmem:[#allocation40_spill] sm:$0xff] %v4573_v41  ;;  %v4575_v5 = vpop.f32.mrf.mxu0 }
 0x1c3   :  { %v4577_v36 = vpop.f32.mrf.mxu1  ;;  %v1000_v7 = vadd.f32 %v4575_v5, %v796_v40  ;;  %v5055_v55 = vld [vmem:[#allocation38_spill] sm:$0xff] }
 0x1c4   :  { %5047 = vst [vmem:[#allocation41_spill] sm:$0xff] %v4577_v36 }
 0x1c5   :  { %v1204_v39 = vadd.f32 %v5051_v16, %v1000_v7 }
 0x1c6   :  { %v4579_v3 = vpop.f32.mrf.mxu0 }
 0x1c7   :  { %v3060_v14 = vpop.f32.mrf.mxu1 }
 0x1c8   :  { %v4581_v21 = vpop.f32.mrf.mxu0 }
 0x1c9   :  { %5048 = vst [vmem:[#allocation42_spill] sm:$0xff] %v4581_v21  ;;  %v1539_v0 = vpop.f32.mrf.mxu1 }
 0x1ca   :  { %v4584_v19 = vpop.f32.mrf.mxu0 }
 0x1cb   :  { %5049 = vst [vmem:[#allocation43_spill] sm:$0xff] %v4584_v19  ;;  %v3063_v52 = vpop.f32.mrf.mxu1 }
 0x1cc   :  { %v4590_v49 = vpop.f32.mrf.mxu0 }
 0x1cd   :  { %5050 = vst [vmem:[#allocation44_spill] sm:$0xff] %v4590_v49  ;;  %v1551_v20 = vpop.f32.mrf.mxu1  ;;  %v958_v49 = vadd.f32 %v957_v12, %v4282_v54 }
 0x1ce   :  { %v3004_v36 = vpop.f32.mrf.mxu0 }
 0x1cf   :  { %v1369_v4 = vadd.f32 %v3004_v36, %v1132_v25  ;;  %v3066_v41 = vpop.f32.mrf.mxu1  ;;  %v1156_v12 = vadd.f32 %v4549_v48, %v958_v49 }
 0x1d0   :  { %v1362_v23 = vpop.f32.mrf.mxu0  ;;  %v5052_v40 = vld [vmem:[#allocation42_spill] sm:$0xff] }
 0x1d1   :  { %v1546_v60 = vadd.f32 %v3060_v14, %v1369_v4  ;;  %v1363_v19 = vadd.f32 %v1362_v23, %v1124_v17  ;;  %v1563_v21 = vpop.f32.mrf.mxu1  ;;  %v1021_v4 = vadd.f32 %v4579_v3, %v814_v47 }
 0x1d2   :  { %v3007_v26 = vpop.f32.mrf.mxu0 }
 0x1d3   :  { %v1540_v22 = vadd.f32 %v1539_v0, %v1363_v19  ;;  %v1381_v25 = vadd.f32 %v3007_v26, %v1148_v24  ;;  %v3069_v10 = vpop.f32.mrf.mxu1  ;;  %v1646_v36 = vadd.f32 %v4596_v2, %v1546_v60  ;;  %v808_v0 = vadd.f32 %v4531_v27, %v4541_v11 }
 0x1d4   :  { %v1374_v44 = vpop.f32.mrf.mxu0  ;;  %v979_v19 = vadd.f32 %v2901_v56, %v4343_v46  ;;  %v986_v11 = vadd.f32 %v4567_v35, %v4458_v58  ;;  %v5054_v47 = vld [vmem:[#allocation44_spill] sm:$0xff] }
 0x1d5   :  { %v1645_v54 = vadd.f32 %v4598_v37, %v1540_v22  ;;  %v1558_v14 = vadd.f32 %v3063_v52, %v1381_v25  ;;  %v1375_v8 = vadd.f32 %v1374_v44, %v1140_v45  ;;  %v1575_v17 = vpop.f32.mrf.mxu1  ;;  %v826_v52 = vadd.f32 %v4535_v33, %v4543_v18  ;;  %v5053_v44 = vld [vmem:[#allocation43_spill] sm:$0xff] }
 0x1d6   :  { %v3010_v57 = vpop.f32.mrf.mxu0  ;;  %v1007_v18 = vadd.f32 %v4571_v1, %v4513_v62  ;;  %v1180_v61 = vadd.f32 %v4551_v63, %v979_v19  ;;  %v1188_v9 = vadd.f32 %v4557_v28, %v986_v11  ;;  %v1014_v28 = vadd.f32 %v5052_v40, %v808_v0 }
 0x1d7   :  { %v1661_v24 = vmax.f32 %v1645_v54, %v1646_v36  ;;  %v1552_v60 = vadd.f32 %v1551_v20, %v1375_v8  ;;  %v1393_v29 = vadd.f32 %v3010_v57, %v1164_v30  ;;  %v3072_v43 = vpop.f32.mrf.mxu1  ;;  %v1648_v46 = vadd.f32 %v4596_v2, %v1558_v14 }
 0x1d8   :  { %v1386_v56 = vpop.f32.mrf.mxu0  ;;  %v1212_v23 = vadd.f32 %v4559_v31, %v1007_v18  ;;  %v1035_v30 = vadd.f32 %v5053_v44, %v826_v52  ;;  %v1028_v19 = vadd.f32 %v5054_v47, %v820_v13 }
 0x1d9   :  { %v1662_v51 = vrot.slane %v1661_v24, 4  ;;  %v1647_v49 = vadd.f32 %v4598_v37, %v1552_v60  ;;  %v1570_v48 = vadd.f32 %v3066_v41, %v1393_v29  ;;  %v1387_v15 = vadd.f32 %v1386_v56, %v1156_v12  ;;  %v1587_v20 = vpop.f32.mrf.mxu1 }
 0x1da   :  { %v3013_v35 = vpop.f32.mrf.mxu0 }
 0x1db   :  { %v1663_v58 = vmax.f32 %v1661_v24, %v1662_v51  ;;  %v1668_v27 = vmax.f32 %v1647_v49, %v1648_v46  ;;  %v1564_v32 = vadd.f32 %v1563_v21, %v1387_v15  ;;  %v3075_v33 = vpop.f32.mrf.mxu1  ;;  %v1650_v41 = vadd.f32 %v4596_v2, %v1570_v48  ;;  %v5056_v49 = vld [vmem:[#allocation39_spill] sm:$0xff]  ;;  %v5057_v15 = vld [vmem:[#allocation40_spill] sm:$0xff] }
 0x1dc   :  { %v1405_v38 = vadd.f32 %v3013_v35, %v1180_v61  ;;  %v1398_v59 = vpop.f32.mrf.mxu0  ;;  %v1228_v24 = vadd.f32 %v5055_v55, %v1021_v4  ;;  %v1220_v48 = vadd.f32 %v5056_v49, %v1014_v28  ;;  %v1244_v13 = vadd.f32 %v5057_v15, %v1035_v30 }
 0x1dd   :  { %v1664_v1 = vrot.slane %v1663_v58, 2  ;;  %v1669_v62 = vrot.slane %v1668_v27, 4  ;;  %v1649_v5 = vadd.f32 %v4598_v37, %v1564_v32  ;;  %v1399_v63 = vadd.f32 %v1398_v59, %v1172_v53  ;;  %v1599_v34 = vpop.f32.mrf.mxu1 }
 0x1de   :  { %v1582_v6 = vadd.f32 %v3069_v10, %v1405_v38  ;;  %v3016_v21 = vpop.f32.mrf.mxu0 }
 0x1df   :  { %v1665_v26 = vmax.f32 %v1663_v58, %v1664_v1  ;;  %v1670_v22 = vmax.f32 %v1668_v27, %v1669_v62  ;;  %v1675_v25 = vmax.f32 %v1649_v5, %v1650_v41  ;;  %v1576_v45 = vadd.f32 %v1575_v17, %v1399_v63  ;;  %v4642_v17 = vld [vmem:[%s4835_s3] ss:$0 sm:$0xff]  ;;  %v3078_v11 = vpop.f32.mrf.mxu1 }
 0x1e0   :  { %v1652_v36 = vadd.f32 %v4596_v2, %v1582_v6  ;;  %v1417_v54 = vadd.f32 %v3016_v21, %v1196_v50  ;;  %v1410_v14 = vpop.f32.mrf.mxu0  ;;  %v5058_v50 = vld [vmem:[#allocation41_spill] sm:$0xff] }
 0x1e1   :  { %v1666_v3 = vrot.slane %v1665_v26, 1  ;;  %v1671_v10 = vrot.slane %v1670_v22, 2  ;;  %v1676_v8 = vrot.slane %v1675_v25, 4  ;;  %v1651_v31 = vadd.f32 %v4598_v37, %v1576_v45  ;;  %v1611_v59 = vpop.f32.mrf.mxu1 }
 0x1e2   :  { %v1594_v57 = vadd.f32 %v3072_v43, %v1417_v54  ;;  %v1411_v0 = vadd.f32 %v1410_v14, %v1188_v9  ;;  %v3019_v12 = vpop.f32.mrf.mxu0  ;;  %v1236_v9 = vadd.f32 %v5058_v50, %v1028_v19 }
 0x1e3   :  { %v1667_v60 = vmax.f32 %v1665_v26, %v1666_v3  ;;  %v1672_v29 = vmax.f32 %v1670_v22, %v1671_v10  ;;  %v1677_v52 = vmax.f32 %v1675_v25, %v1676_v8  ;;  %v1682_v42 = vmax.f32 %v1651_v31, %v1652_v36  ;;  %v3081_v44 = vpop.f32.mrf.mxu1 }
 0x1e4   :  { %v1588_v46 = vadd.f32 %v1587_v20, %v1411_v0  ;;  %v1429_v56 = vadd.f32 %v3019_v12, %v1212_v23  ;;  %v1422_v51 = vpop.f32.mrf.mxu0  ;;  %v1654_v35 = vadd.f32 %v4596_v2, %v1594_v57 }
 0x1e5   :  { %v1724_v18 = vadd.f32 %v4642_v17, %v1667_v60  ;;  %v1673_v43 = vrot.slane %v1672_v29, 1  ;;  %v1678_v7 = vrot.slane %v1677_v52, 2  ;;  %v1683_v61 = vrot.slane %v1682_v42, 4 }
 0x1e6   :  { %v1653_v58 = vadd.f32 %v4598_v37, %v1588_v46  ;;  %v1606_v27 = vadd.f32 %v3075_v33, %v1429_v56  ;;  %v1423_v32 = vadd.f32 %v1422_v51, %v1204_v39  ;;  %v3022_v53 = vpop.f32.mrf.mxu0 }
 0x1e7   :  { %v1674_v41 = vmax.f32 %v1672_v29, %v1673_v43  ;;  %v1679_v20 = vmax.f32 %v1677_v52, %v1678_v7  ;;  %v1684_v38 = vmax.f32 %v1682_v42, %v1683_v61  ;;  %v1732_v1 = vmax.f32 %v1724_v18, 0.0  ;;  %v1623_v29 = vpop.f32.mrf.mxu1 }
 0x1e8   :  { %v1689_v62 = vmax.f32 %v1653_v58, %v1654_v35  ;;  %v1600_v5 = vadd.f32 %v1599_v34, %v1423_v32  ;;  %v1441_v63 = vadd.f32 %v3022_v53, %v1228_v24  ;;  %v1434_v4 = vpop.f32.mrf.mxu0  ;;  %v1656_v33 = vadd.f32 %v4596_v2, %v1606_v27 }
 0x1e9   :  { %v1725_v6 = vadd.f32 %v4642_v17, %v1674_v41  ;;  %v1680_v21 = vrot.slane %v1679_v20, 1  ;;  %v1685_v23 = vrot.slane %v1684_v38, 2  ;;  %v1435_v16 = vadd.f32 %v1434_v4, %v1220_v48 }
 0x1ea   :  { %v1690_v26 = vrot.slane %v1689_v62, 4  ;;  %v1655_v39 = vadd.f32 %v4598_v37, %v1600_v5  ;;  %v1618_v22 = vadd.f32 %v3078_v11, %v1441_v63  ;;  %v3025_v25 = vpop.f32.mrf.mxu0 }
 0x1eb   :  { %v1733_v45 = vmax.f32 %v1725_v6, 0.0  ;;  %v1681_v40 = vmax.f32 %v1679_v20, %v1680_v21  ;;  %v1686_v28 = vmax.f32 %v1684_v38, %v1685_v23  ;;  %v1612_v30 = vadd.f32 %v1611_v59, %v1435_v16 }
 0x1ec   :  { %v1691_v34 = vmax.f32 %v1689_v62, %v1690_v26  ;;  %v1696_v36 = vmax.f32 %v1655_v39, %v1656_v33  ;;  %v1658_v54 = vadd.f32 %v4596_v2, %v1618_v22  ;;  %v1453_v14 = vadd.f32 %v3025_v25, %v1244_v13  ;;  %v1446_v3 = vpop.f32.mrf.mxu0 }
 0x1ed   :  { %v1771_v10 = vrot.slane %v1733_v45, 7  ;;  %v1726_v8 = vadd.f32 %v4642_v17, %v1681_v40  ;;  %v1687_v31 = vrot.slane %v1686_v28, 1  ;;  %v1657_v47 = vadd.f32 %v4598_v37, %v1612_v30 }
 0x1ee   :  { %v1692_v19 = vrot.slane %v1691_v34, 2  ;;  %v1697_v57 = vrot.slane %v1696_v36, 4  ;;  %v1630_v0 = vadd.f32 %v3081_v44, %v1453_v14  ;;  %v1447_v12 = vadd.f32 %v1446_v3, %v1236_v9  ;;  %v5059_v14 = vld [vmem:[#allocation8_spill] sm:$0xff] }
 0x1ef   :  { %v1773_v55 = vsel %vm1772_vm6, %v1771_v10, %v1732_v1  ;;  %v1734_v24 = vmax.f32 %v1726_v8, 0.0  ;;  %v1688_v60 = vmax.f32 %v1686_v28, %v1687_v31  ;;  %v1703_v52 = vmax.f32 %v1657_v47, %v1658_v54  ;;  %v5061_v10 = vld [vmem:[#allocation10_spill] sm:$0xff]  ;;  %v5062_v31 = vld [vmem:[#allocation9_spill] sm:$0xff] }
 0x1f0   :  { %v1693_v42 = vmax.f32 %v1691_v34, %v1692_v19  ;;  %v1698_v11 = vmax.f32 %v1696_v36, %v1697_v57  ;;  %v1624_v46 = vadd.f32 %v1623_v29, %v1447_v12  ;;  %v1660_v13 = vadd.f32 %v4596_v2, %v1630_v0  ;;  %v5063_v19 = vld [vmem:[#allocation12_spill] sm:$0xff]  ;;  %v5064_v57 = vld [vmem:[#allocation5_spill] sm:$0xff]  ;;  %v5065_v0 = vld [vmem:[#allocation14_spill] sm:$0xff] }
 0x1f1   :  { %v1774_v56 = vrot.slane %v1734_v24, 6  ;;  %v1727_v51 = vadd.f32 %v4642_v17, %v1688_v60  ;;  %v1704_v49 = vrot.slane %v1703_v52, 4  ;;  %v5060_v3 = vmov 0.0   ;;  %v5066_v12 = vld [vmem:[#allocation6_spill] sm:$0xff]  ;;  %v5068_v24 = vld [vmem:[#allocation7_spill] sm:$0xff] }
 0x1f2   :  { %v1694_v48 = vrot.slane %v1693_v42, 1  ;;  %v1699_v15 = vrot.slane %v1698_v11, 2  ;;  %v1659_v18 = vadd.f32 %v4598_v37, %v1624_v46  ;;  %v5069_v60 = vld [vmem:[#allocation18_spill] sm:$0xff]  ;;  %v5070_v29 = vld [vmem:[#allocation11_spill] sm:$0xff] }
 0x1f3   :  { %v1776_v43 = vsel %vm1775_vm7, %v1774_v56, %v1773_v55  ;;  %v1735_v7 = vmax.f32 %v1727_v51, 0.0  ;;  %v1705_v61 = vmax.f32 %v1703_v52, %v1704_v49  ;;  %v5067_v55 = vld [vmem:[#allocation13_spill] sm:$0xff]  ;;  %v5071_v52 = vld [vmem:[#allocation20_spill] sm:$0xff]  ;;  %v5074_v46 = vld [vmem:[#allocation15_spill] sm:$0xff] }
 0x1f4   :  { %v1695_v35 = vmax.f32 %v1693_v42, %v1694_v48  ;;  %v1700_v58 = vmax.f32 %v1698_v11, %v1699_v15  ;;  %v1710_v27 = vmax.f32 %v1659_v18, %v1660_v13  ;;  %v5072_v42 = vld [vmem:[#allocation16_spill] sm:$0xff]  ;;  %v5073_v11 = vld [vmem:[#allocation21_spill] sm:$0xff]  ;;  %v5075_v56 = vld [vmem:[#allocation23_spill] sm:$0xff] }
 0x1f5   :  { %v1777_v32 = vrot.slane %v1735_v7, 5  ;;  %v1706_v53 = vrot.slane %v1705_v61, 2  ;;  %v5076_v51 = vld [vmem:[#allocation17_spill] sm:$0xff]  ;;  %v5077_v49 = vld [vmem:[#allocation24_spill] sm:$0xff]  ;;  %v5078_v48 = vld [vmem:[#allocation19_spill] sm:$0xff] }
 0x1f6   :  { %v1728_v41 = vadd.f32 %v4642_v17, %v1695_v35  ;;  %v1701_v20 = vrot.slane %v1700_v58, 1  ;;  %v1711_v38 = vrot.slane %v1710_v27, 4  ;;  %v5079_v15 = vld [vmem:[#allocation27_spill] sm:$0xff]  ;;  %v5080_v13 = vld [vmem:[#allocation22_spill] sm:$0xff]  ;;  %v5081_v18 = vld [vmem:[#allocation29_spill] sm:$0xff] }
 0x1f7   :  { %v1779_v59 = vsel %vm1778_vm8, %v1777_v32, %v1776_v43  ;;  %v1707_v50 = vmax.f32 %v1705_v61, %v1706_v53  ;;  %v5082_v43 = vld [vmem:[#allocation25_spill] sm:$0xff]  ;;  %v5083_v7 = vld [vmem:[#allocation31_spill] sm:$0xff]  ;;  %v5084_v61 = vld [vmem:[#allocation26_spill] sm:$0xff] }
 0x1f8   :  { %v1736_v9 = vmax.f32 %v1728_v41, 0.0  ;;  %v1702_v1 = vmax.f32 %v1700_v58, %v1701_v20  ;;  %v1712_v2 = vmax.f32 %v1710_v27, %v1711_v38  ;;  %v5085_v35 = vld [vmem:[#allocation33_spill] sm:$0xff]  ;;  %v5086_v58 = vld [vmem:[#allocation28_spill] sm:$0xff]  ;;  %v5087_v27 = vld [vmem:[#allocation34_spill] sm:$0xff]  ;;  %v5092_v38 = vand.u32 4294901760, %v5064_v57 }
 0x1f9   :  { %v1708_v62 = vrot.slane %v1707_v50, 1  ;;  %v5088_v32 = vld [vmem:[#allocation30_spill] sm:$0xff]  ;;  %v5089_v53 = vld [vmem:[#allocation32_spill] sm:$0xff]  ;;  %v5090_v41 = vld [vmem:[#allocation35_spill] sm:$0xff] }
 0x1fa   :  { %v1780_v37 = vrot.slane %v1736_v9, 4  ;;  %v1729_v5 = vadd.f32 %v4642_v17, %v1702_v1  ;;  %v1713_v63 = vrot.slane %v1712_v2, 2  ;;  %v5091_v20 = vld [vmem:[#allocation36_spill] sm:$0xff]  ;;  %v5095_v9 = vand.u32 4294901760, %v5070_v29 }
 0x1fb   :  { %v1709_v4 = vmax.f32 %v1707_v50, %v1708_v62  ;;  %v5094_v50 = vand.u32 4294901760, %v5068_v24  ;;  %v5096_v1 = vand.u32 4294901760, %v5072_v42  ;;  %v5098_v62 = vand.u32 4294901760, %v5076_v51 }
 0x1fc   :  { %v1737_v6 = vmax.f32 %v1729_v5, 0.0  ;;  %v1714_v21 = vmax.f32 %v1712_v2, %v1713_v63  ;;  %v1782_v23 = vsel %vm1781_vm9, %v1780_v37, %v1779_v59  ;;  %v5093_v59 = vand.u32 4294901760, %v5066_v12 }
 0x1fd   :  { %v1730_v16 = vadd.f32 %v4642_v17, %v1709_v4  ;;  %v5097_v2 = vand.u32 4294901760, %v5074_v46  ;;  %v5099_v37 = vand.u32 4294901760, %v5078_v48  ;;  %v5100_v5 = vand.u32 4294901760, %v5080_v13 }
 0x1fe   :  { %v1783_v26 = vrot.slane %v1737_v6, 3  ;;  %v1715_v33 = vrot.slane %v1714_v21, 1  ;;  %v5101_v63 = vand.u32 4294901760, %v5082_v43  ;;  %v5102_v4 = vand.u32 4294901760, %v5084_v61 }
 0x1ff   :  { %v1738_v39 = vmax.f32 %v1730_v16, 0.0  ;;  %v5103_v6 = vand.u32 4294901760, %v5086_v58  ;;  %v5106_v16 = vand.u32 4294901760, %v5090_v41 }
 0x200   :  { %v1716_v22 = vmax.f32 %v1714_v21, %v1715_v33  ;;  %v1785_v25 = vsel %vm1784_vm10, %v1783_v26, %v1782_v23  ;;  %v5104_v21 = vand.u32 4294901760, %v5088_v32  ;;  %v5105_v23 = vand.u32 4294901760, %v5089_v53 }
 0x201   :  { %v1786_v40 = vrot.slane %v1738_v39, 2  ;;  %v5107_v26 = vand.u32 4294901760, %v5091_v20 }
 0x202   :  { %v1731_v45 = vadd.f32 %v4642_v17, %v1716_v22 }
 0x203   :  { %v1788_v30 = vsel %vm1787_vm11, %v1786_v40, %v1785_v25 }
 0x204   :  { %v1739_v28 = vmax.f32 %v1731_v45, 0.0 }
 0x206   :  { %v1789_v44 = vrot.slane %v1739_v28, 1 }
 0x208   :  { %v1791_v34 = vsel %vm1790_vm12, %v1789_v44, %v1788_v30  ;;  %v2451_v30 = vld [vmem:[%s4837_s5] ss:$0 sm:$0xff] }
 0x209   :  { %v4665_v36 = vand.u32 4294901760, %v1791_v34 }
 0x20b   :  { %v4668_v54 = vsub.f32 %v1791_v34, %v4665_v36  ;;  %3150 = vmatmul.mubr.f32.vlgmr.msra.gmra.mxu1 %v4665_v36 }
 0x20c   :  { %3188 = vmatpush3.msra.mxu1 %v5059_v14  ;;  %3219 = vmatprep.mubr.msk.f32.mxu1 %vm3325_vm3, %v5060_v3 }
 0x20d   :  { %3189 = vmatprep.subr.mxu1 %v5060_v3  ;;  %v1876_v17 = vand.u32 4294901760, %v4668_v54 }
 0x20e   :  { %3190 = vmatpush3.msra.mxu1 %v5061_v10 }
 0x20f   :  { %3191 = vmatprep.subr.mxu1 %v5060_v3  ;;  %v1877_v8 = vsub.f32 %v4668_v54, %v1876_v17 }
 0x210   :  { %3192 = vmatpush3.msra.mxu1 %v5062_v31 }
 0x211   :  { %3193 = vmatprep.subr.mxu1 %v5060_v3  ;;  %v1878_v47 = vand.u32 4294901760, %v1877_v8 }
 0x212   :  { %3194 = vmatpush3.msra.mxu1 %v5063_v19 }
 0x213   :  { %3195 = vmatprep.subr.mxu1 %v5060_v3  ;;  %3115 = vmatmul.mubr.f32.vlgmr.msra.gmra.mxu0 %v1878_v47 }
 0x214   :  { %3153 = vmatpush3.msra.mxu0 %v5064_v57  ;;  %3196 = vmatpush3.msra.mxu1 %v5065_v0 }
 0x215   :  { %3154 = vmatprep.subr.mxu0 %v5060_v3  ;;  %3197 = vmatprep.subr.mxu1 %v5060_v3 }
 0x216   :  { %3155 = vmatpush3.msra.mxu0 %v5066_v12  ;;  %3198 = vmatpush3.msra.mxu1 %v5067_v55 }
 0x217   :  { %3156 = vmatprep.subr.mxu0 %v5060_v3  ;;  %3199 = vmatprep.subr.mxu1 %v5060_v3 }
 0x218   :  { %3157 = vmatpush3.msra.mxu0 %v5068_v24  ;;  %3200 = vmatpush3.msra.mxu1 %v5069_v60 }
 0x219   :  { %3158 = vmatprep.subr.mxu0 %v5060_v3  ;;  %3201 = vmatprep.subr.mxu1 %v5060_v3 }
 0x21a   :  { %3159 = vmatpush3.msra.mxu0 %v5070_v29  ;;  %3202 = vmatpush3.msra.mxu1 %v5071_v52 }
 0x21b   :  { %3160 = vmatprep.subr.mxu0 %v5060_v3  ;;  %3203 = vmatprep.subr.mxu1 %v5060_v3 }
 0x21c   :  { %3161 = vmatpush3.msra.mxu0 %v5072_v42  ;;  %3204 = vmatpush3.msra.mxu1 %v5073_v11 }
 0x21d   :  { %3162 = vmatprep.subr.mxu0 %v5060_v3  ;;  %3205 = vmatprep.subr.mxu1 %v5060_v3 }
 0x21e   :  { %3163 = vmatpush3.msra.mxu0 %v5074_v46  ;;  %3206 = vmatpush3.msra.mxu1 %v5075_v56 }
 0x21f   :  { %3164 = vmatprep.subr.mxu0 %v5060_v3  ;;  %3207 = vmatprep.subr.mxu1 %v5060_v3 }
 0x220   :  { %3165 = vmatpush3.msra.mxu0 %v5076_v51  ;;  %3208 = vmatpush3.msra.mxu1 %v5077_v49 }
 0x221   :  { %3166 = vmatprep.subr.mxu0 %v5060_v3  ;;  %3209 = vmatprep.subr.mxu1 %v5060_v3 }
 0x222   :  { %3167 = vmatpush3.msra.mxu0 %v5078_v48  ;;  %3210 = vmatpush3.msra.mxu1 %v5079_v15 }
 0x223   :  { %3168 = vmatprep.subr.mxu0 %v5060_v3  ;;  %3211 = vmatprep.subr.mxu1 %v5060_v3 }
 0x224   :  { %3169 = vmatpush3.msra.mxu0 %v5080_v13  ;;  %3212 = vmatpush3.msra.mxu1 %v5081_v18 }
 0x225   :  { %3170 = vmatprep.subr.mxu0 %v5060_v3  ;;  %3213 = vmatprep.subr.mxu1 %v5060_v3 }
 0x226   :  { %3171 = vmatpush3.msra.mxu0 %v5082_v43  ;;  %3214 = vmatpush3.msra.mxu1 %v5083_v7 }
 0x227   :  { %3172 = vmatprep.subr.mxu0 %v5060_v3  ;;  %3215 = vmatprep.subr.mxu1 %v5060_v3 }
 0x228   :  { %3173 = vmatpush3.msra.mxu0 %v5084_v61  ;;  %3216 = vmatpush3.msra.mxu1 %v5085_v35 }
 0x229   :  { %3174 = vmatprep.subr.mxu0 %v5060_v3  ;;  %3217 = vmatprep.subr.mxu1 %v5060_v3 }
 0x22a   :  { %3175 = vmatpush3.msra.mxu0 %v5086_v58  ;;  %3218 = vmatpush3.msra.mxu1 %v5087_v27 }
 0x22b   :  { %3176 = vmatprep.subr.mxu0 %v5060_v3  ;;  %3220 = vmatmul.mubr.f32.vlgmr.msra.gmra.mxu1 %v1876_v17 }
 0x22c   :  { %3257 = vmatprep.subr.mxu1 %v5060_v3  ;;  %3177 = vmatpush3.msra.mxu0 %v5088_v32 }
 0x22d   :  { %3258 = vmatpush3.msra.mxu1 %v5059_v14  ;;  %3178 = vmatprep.subr.mxu0 %v5060_v3 }
 0x22e   :  { %3259 = vmatprep.subr.mxu1 %v5060_v3  ;;  %3179 = vmatpush3.msra.mxu0 %v5089_v53 }
 0x22f   :  { %3260 = vmatpush3.msra.mxu1 %v5061_v10  ;;  %3180 = vmatprep.subr.mxu0 %v5060_v3 }
 0x230   :  { %3261 = vmatprep.subr.mxu1 %v5060_v3  ;;  %3181 = vmatpush3.msra.mxu0 %v5090_v41 }
 0x231   :  { %3262 = vmatpush3.msra.mxu1 %v5062_v31  ;;  %3182 = vmatprep.subr.mxu0 %v5060_v3 }
 0x232   :  { %3263 = vmatprep.subr.mxu1 %v5060_v3  ;;  %3183 = vmatpush3.msra.mxu0 %v5091_v20 }
 0x233   :  { %3184 = vmatprep.mubr.msk.f32.mxu0 %vm3325_vm3, %v5060_v3  ;;  %3264 = vmatpush3.msra.mxu1 %v5063_v19 }
 0x234   :  { %3185 = vmatmul.mubr.f32.vlgmr.msra.gmra.mxu0 %v4668_v54  ;;  %3222 = vmatprep.subr.mxu0 %v5060_v3 }
 0x235   :  { %3265 = vmatprep.subr.mxu1 %v5060_v3  ;;  %3223 = vmatpush3.msra.mxu0 %v5092_v38 }
 0x236   :  { %3266 = vmatpush3.msra.mxu1 %v5065_v0  ;;  %3224 = vmatprep.subr.mxu0 %v5060_v3 }
 0x237   :  { %3267 = vmatprep.subr.mxu1 %v5060_v3  ;;  %3225 = vmatpush3.msra.mxu0 %v5093_v59 }
 0x238   :  { %3268 = vmatpush3.msra.mxu1 %v5067_v55  ;;  %3226 = vmatprep.subr.mxu0 %v5060_v3 }
 0x239   :  { %3269 = vmatprep.subr.mxu1 %v5060_v3  ;;  %3227 = vmatpush3.msra.mxu0 %v5094_v50 }
 0x23a   :  { %3270 = vmatpush3.msra.mxu1 %v5069_v60  ;;  %3228 = vmatprep.subr.mxu0 %v5060_v3 }
 0x23b   :  { %3271 = vmatprep.subr.mxu1 %v5060_v3  ;;  %3229 = vmatpush3.msra.mxu0 %v5095_v9 }
 0x23c   :  { %3272 = vmatpush3.msra.mxu1 %v5071_v52  ;;  %3230 = vmatprep.subr.mxu0 %v5060_v3 }
 0x23d   :  { %3273 = vmatprep.subr.mxu1 %v5060_v3  ;;  %3231 = vmatpush3.msra.mxu0 %v5096_v1 }
 0x23e   :  { %3274 = vmatpush3.msra.mxu1 %v5073_v11  ;;  %3232 = vmatprep.subr.mxu0 %v5060_v3 }
 0x23f   :  { %3275 = vmatprep.subr.mxu1 %v5060_v3  ;;  %3233 = vmatpush3.msra.mxu0 %v5097_v2 }
 0x240   :  { %3276 = vmatpush3.msra.mxu1 %v5075_v56  ;;  %3234 = vmatprep.subr.mxu0 %v5060_v3 }
 0x241   :  { %3277 = vmatprep.subr.mxu1 %v5060_v3  ;;  %3235 = vmatpush3.msra.mxu0 %v5098_v62 }
 0x242   :  { %3278 = vmatpush3.msra.mxu1 %v5077_v49  ;;  %3236 = vmatprep.subr.mxu0 %v5060_v3 }
 0x243   :  { %3279 = vmatprep.subr.mxu1 %v5060_v3  ;;  %3237 = vmatpush3.msra.mxu0 %v5099_v37 }
 0x244   :  { %3280 = vmatpush3.msra.mxu1 %v5079_v15  ;;  %3238 = vmatprep.subr.mxu0 %v5060_v3 }
 0x245   :  { %3281 = vmatprep.subr.mxu1 %v5060_v3  ;;  %3239 = vmatpush3.msra.mxu0 %v5100_v5 }
 0x246   :  { %3282 = vmatpush3.msra.mxu1 %v5081_v18  ;;  %3240 = vmatprep.subr.mxu0 %v5060_v3 }
 0x247   :  { %3283 = vmatprep.subr.mxu1 %v5060_v3  ;;  %3241 = vmatpush3.msra.mxu0 %v5101_v63 }
 0x248   :  { %3284 = vmatpush3.msra.mxu1 %v5083_v7  ;;  %3242 = vmatprep.subr.mxu0 %v5060_v3 }
 0x249   :  { %3285 = vmatprep.subr.mxu1 %v5060_v3  ;;  %3243 = vmatpush3.msra.mxu0 %v5102_v4 }
 0x24a   :  { %3286 = vmatpush3.msra.mxu1 %v5085_v35  ;;  %3244 = vmatprep.subr.mxu0 %v5060_v3 }
 0x24b   :  { %3287 = vmatprep.subr.mxu1 %v5060_v3  ;;  %3245 = vmatpush3.msra.mxu0 %v5103_v6 }
 0x24c   :  { %3288 = vmatpush3.msra.mxu1 %v5087_v27  ;;  %3289 = vmatprep.mubr.msk.f32.mxu1 %vm3325_vm3, %v5060_v3 }
 0x24d   :  { %3246 = vmatprep.subr.mxu0 %v5060_v3  ;;  %3290 = vmatmul.mubr.f32.vlgmr.msra.gmra.mxu1 %v4665_v36 }
 0x24e   :  { %3247 = vmatpush3.msra.mxu0 %v5104_v21  ;;  %3254 = vmatprep.mubr.msk.f32.mxu0 %vm3325_vm3, %v5060_v3 }
 0x24f   :  { %3248 = vmatprep.subr.mxu0 %v5060_v3 }
 0x250   :  { %3249 = vmatpush3.msra.mxu0 %v5105_v23 }
 0x251   :  { %3250 = vmatprep.subr.mxu0 %v5060_v3 }
 0x252   :  { %3251 = vmatpush3.msra.mxu0 %v5106_v16 }
 0x253   :  { %3252 = vmatprep.subr.mxu0 %v5060_v3 }
 0x254   :  { %3253 = vmatpush3.msra.mxu0 %v5107_v26 }
 0x255   :  { %3255 = vmatmul.mubr.f32.vlgmr.msra.gmra.mxu0 %v4665_v36 }
 0x2cb   :  { %v2031_v33 = vpop.f32.mrf.mxu1 }
 0x2cd   :  { %v3151_v39 = vpop.f32.mrf.mxu1 }
 0x2d3   :  { %v1880_v22 = vpop.f32.mrf.mxu0 }
 0x2d4   :  { %v1881_v34 = vadd.f32 %v2451_v30, %v1880_v22 }
 0x2d5   :  { %v3116_v25 = vpop.f32.mrf.mxu0 }
 0x2d6   :  { %v2032_v14 = vadd.f32 %v2031_v33, %v1881_v34 }
 0x2eb   :  { %v2224_v45 = vpop.f32.mrf.mxu1 }
 0x2ed   :  { %v3221_v40 = vpop.f32.mrf.mxu1 }
 0x2f4   :  { %v2135_v28 = vpop.f32.mrf.mxu0 }
 0x2f5   :  { %v2136_v17 = vadd.f32 %v2135_v28, %v2032_v14 }
 0x2f6   :  { %v3186_v44 = vpop.f32.mrf.mxu0 }
 0x2f7   :  { %v2225_v10 = vadd.f32 %v2224_v45, %v2136_v17 }
 0x30d   :  { %v2430_v54 = vpop.f32.mrf.mxu1 }
 0x30f   :  { %v3291_v3 = vpop.f32.mrf.mxu1 }
 0x315   :  { %v2343_v8 = vpop.f32.mrf.mxu0 }
 0x316   :  { %v2344_v36 = vadd.f32 %v2343_v8, %v2225_v10 }
 0x317   :  { %v3256_v31 = vpop.f32.mrf.mxu0 }
 0x318   :  { %v2431_v47 = vadd.f32 %v2430_v54, %v2344_v36 }
 0x31a   :  { %2434 = vst [vmem:[#allocation2] sm:$0xff] %v2431_v47 }
 0x31b   :  { %3310 = shalt.err (!%p3307_p4)
}
 0x31c   :  { %2444 = dma.vmem_to_hbm [thread:$0]  %s2442_s12, 128, %s4838_s6, [#allocation3]  }
 0x31d   :  { %3319 = dma.done.wait [#allocation3], 128  }
 0x31e   :  { %3320 = vsyncadd [#allocation3], 4294967168 }
 0x31f   :  { %2448 = vsyncpa [#allocation3], 1 }

// kernel: tpu_custom_call.1
= control target key start
LH: loop header
LB: loop body
LE: loop exit
PB: predicated region body
PF: predicated region fallthrough
CT: control target
= control target key end

     0   :  { %s3321_s25 = smov 64   ;;  %s3322_s26 = smov 32   ;;  %s4832_s0 = inlined_call_operand.vmem [shape: f32[8,19,32], index: 0, kind: input, shape index: {}]   ;;  %s4833_s1 = inlined_call_operand.vmem [shape: s32[1,128], index: 1, kind: input, shape index: {}]   ;;  %s4834_s2 = inlined_call_operand.vmem [shape: f32[128,128], index: 2, kind: input, shape index: {}]   ;;  %s4835_s3 = inlined_call_operand.vmem [shape: f32[1,128], index: 3, kind: input, shape index: {}]   ;;  %s4836_s4 = inlined_call_operand.vmem [shape: f32[128,128], index: 4, kind: input, shape index: {}]   ;;  %s4837_s5 = inlined_call_operand.vmem [shape: f32[1,128], index: 5, kind: input, shape index: {}]   ;;  %s4838_s6 = inlined_call_operand.hbm [shape: f32[8,128], index: 6, kind: output, shape index: {}]  }
   0x1   :  { %v56_v0 = vld [vmem:[%s4832_s0 + $0x2] sm:$0xff]  ;;  %v57_v2 = vld [vmem:[%s4832_s0 + $0xa] sm:$0xff]  ;;  %s3323_s11 = smov 96   ;;  %v42_v7 = vld [vmem:[%s4832_s0 + $0x19] sm:$0xff] }
   0x2   :  { %v40_v1 = vld [vmem:[%s4832_s0 + $0x1] sm:$0xff]  ;;  %168 = vrot.lane.b32.xlu1 %v56_v0, %s3321_s25  ;;  %v41_v3 = vld [vmem:[%s4832_s0 + $0x9] sm:$0xff]  ;;  %v346_v12 = vld [vmem:[%s4834_s2 + $0x78] sm:$0xff] }
   0x3   :  { %104 = vrot.lane.b32.xlu0 %v40_v1, %s3322_s26  ;;  %v73_v4 = vld [vmem:[%s4832_s0 + $0xb] sm:$0xff]  ;;  %v72_v5 = vld [vmem:[%s4832_s0 + $0x3] sm:$0xff]  ;;  %v58_v9 = vld [vmem:[%s4832_s0 + $0x1a] sm:$0xff]  ;;  %v3412_v13 = vand.u32 4294901760, %v346_v12 }
   0x4   :  { %v43_v6 = vld [vmem:[%s4832_s0 + $0x21] sm:$0xff]  ;;  %v345_v14 = vld [vmem:[%s4834_s2 + $0x70] sm:$0xff]  ;;  %v342_v20 = vld [vmem:[%s4834_s2 + $0x58] sm:$0xff] }
   0x5   :  { %v59_v8 = vld [vmem:[%s4832_s0 + $0x22] sm:$0xff]  ;;  %v3423_v17 = vand.u32 4294901760, %v345_v14  ;;  %v341_v21 = vld [vmem:[%s4834_s2 + $0x50] sm:$0xff]  ;;  %v3436_v22 = vsub.f32 %v346_v12, %v3412_v13  ;;  %2746 = vmatprep.subr.mxu0 %v3412_v13  ;;  %v3439_v23 = vand.u32 4294901760, %v342_v20  ;;  %v45_v28 = vld [vmem:[%s4832_s0 + $0x39] sm:$0xff] }
   0x6   :  { %170 = vrot.lane.b32.xlu1 %v57_v2, %s3321_s25  ;;  %v75_v10 = vld [vmem:[%s4832_s0 + $0x23] sm:$0xff]  ;;  %v74_v11 = vld [vmem:[%s4832_s0 + $0x1b] sm:$0xff]  ;;  %v44_v29 = vld [vmem:[%s4832_s0 + $0x31] sm:$0xff]  ;;  %2747 = vmatpush3.msra.mxu0 %v3412_v13  ;;  %v3465_v31 = vand.u32 4294901760, %v341_v21 }
   0x7   :  { %106 = vrot.lane.b32.xlu0 %v41_v3, %s3322_s26  ;;  %v344_v15 = vld [vmem:[%s4834_s2 + $0x68] sm:$0xff]  ;;  %v343_v16 = vld [vmem:[%s4834_s2 + $0x60] sm:$0xff]  ;;  %v3444_v24 = vsub.f32 %v345_v14, %v3423_v17  ;;  %v3462_v30 = vand.u32 4294901760, %v3436_v22  ;;  %v3474_v34 = vsub.f32 %v342_v20, %v3439_v23  ;;  %2748 = vmatprep.subr.mxu0 %v3423_v17  ;;  %v60_v41 = vld [vmem:[%s4832_s0 + $0x32] sm:$0xff] }
   0x8   :  { %v3425_v18 = vand.u32 4294901760, %v344_v15  ;;  %v3427_v19 = vand.u32 4294901760, %v343_v16  ;;  %v340_v27 = vld [vmem:[%s4834_s2 + $0x48] sm:$0xff]  ;;  %2749 = vmatpush3.msra.mxu0 %v3423_v17  ;;  %v339_v38 = vld [vmem:[%s4834_s2 + $0x40] sm:$0xff]  ;;  %v3501_v44 = vsub.f32 %v341_v21, %v3465_v31 }
   0x9   :  { %v3468_v32 = vand.u32 4294901760, %v3444_v24  ;;  %v592_v35 = vsub.f32 %v3436_v22, %v3462_v30  ;;  %v3483_v37 = vand.u32 4294901760, %v340_v27  ;;  %v61_v40 = vld [vmem:[%s4832_s0 + $0x3a] sm:$0xff] }
   0xa   :  { %234 = vrot.lane.b32.xlu1 %v73_v4, %s3323_s11  ;;  %v3447_v25 = vsub.f32 %v344_v15, %v3425_v18  ;;  %v3450_v26 = vsub.f32 %v343_v16, %v3427_v19  ;;  %2750 = vmatprep.subr.mxu0 %v3425_v18 }
   0xb   :  { %232 = vrot.lane.b32.xlu0 %v72_v5, %s3323_s11  ;;  %v599_v39 = vsub.f32 %v3444_v24, %v3468_v32  ;;  %v593_v42 = vand.u32 4294901760, %v592_v35 }
   0xc   :  { %v3471_v33 = vand.u32 4294901760, %v3447_v25  ;;  %v3480_v36 = vand.u32 4294901760, %v3450_v26 }
   0xe   :  { %110 = vrot.lane.b32.xlu1 %v43_v6, %s3322_s26  ;;  %v606_v43 = vsub.f32 %v3447_v25, %v3471_v33 }
   0xf   :  { %108 = vrot.lane.b32.xlu0 %v42_v7, %s3322_s26 }
  0x12   :  { %174 = vrot.lane.b32.xlu1 %v59_v8, %s3321_s25 }
  0x13   :  { %172 = vrot.lane.b32.xlu0 %v58_v9, %s3321_s25 }
  0x16   :  { %238 = vrot.lane.b32.xlu1 %v75_v10, %s3323_s11 }
  0x17   :  { %236 = vrot.lane.b32.xlu0 %v74_v11, %s3323_s11 }
  0x1a   :  { %114 = vrot.lane.b32.xlu1 %v45_v28, %s3322_s26 }
  0x1b   :  { %112 = vrot.lane.b32.xlu0 %v44_v29, %s3322_s26 }
  0x1c   :  { %11 = vsyncpa [#allocation3], 0  ;;  %v600_v45 = vand.u32 4294901760, %v599_v39  ;;  %v3505_v46 = vand.u32 4294901760, %v3474_v34  ;;  %2751 = vmatpush3.msra.mxu0 %v3425_v18  ;;  %v3508_v47 = vand.u32 4294901760, %v339_v38  ;;  %v338_v48 = vld [vmem:[%s4834_s2 + $0x38] sm:$0xff]  ;;  %2802 = vmatprep.subr.mxu1 %v593_v42  ;;  %v613_v49 = vsub.f32 %v3450_v26, %v3480_v36 }
  0x1d   :  { %v3516_v50 = vsub.f32 %v340_v27, %v3483_v37  ;;  %2752 = vmatprep.subr.mxu0 %v3427_v19  ;;  %v337_v51 = vld [vmem:[%s4834_s2 + $0x30] sm:$0xff]  ;;  %v77_v52 = vld [vmem:[%s4832_s0 + $0x3b] sm:$0xff]  ;;  %2803 = vmatpush3.msra.mxu1 %v593_v42  ;;  %v607_v54 = vand.u32 4294901760, %v606_v43  ;;  %v3531_v55 = vand.u32 4294901760, %v3501_v44  ;;  %v3534_v56 = vand.u32 4294901760, %v338_v48  ;;  %v336_v62 = vld [vmem:[%s4834_s2 + $0x28] sm:$0xff] }
  0x1e   :  { %178 = vrot.lane.b32.xlu1 %v61_v40, %s3321_s25  ;;  %v76_v53 = vld [vmem:[%s4832_s0 + $0x33] sm:$0xff]  ;;  %2753 = vmatpush3.msra.mxu0 %v3427_v19  ;;  %v620_v57 = vsub.f32 %v3474_v34, %v3505_v46  ;;  %v3539_v58 = vsub.f32 %v339_v38, %v3508_v47  ;;  %v614_v59 = vand.u32 4294901760, %v613_v49  ;;  %v3546_v61 = vand.u32 4294901760, %v337_v51  ;;  %v46_v0 = vld [vmem:[%s4832_s0 + $0x49] sm:$0xff]  ;;  %v335_v6 = vld [vmem:[%s4834_s2 + $0x20] sm:$0xff]  ;;  %s3327_s10 = smov [#allocation2]  }
  0x1f   :  { %176 = vrot.lane.b32.xlu0 %v60_v41, %s3321_s25  ;;  %2804 = vmatprep.subr.mxu1 %v600_v45  ;;  %v3543_v60 = vand.u32 4294901760, %v3516_v50  ;;  %v47_v63 = vld [vmem:[%s4832_s0 + $0x51] sm:$0xff]  ;;  %v627_v1 = vsub.f32 %v3501_v44, %v3531_v55  ;;  %v3562_v2 = vsub.f32 %v338_v48, %v3534_v56  ;;  %v3569_v5 = vand.u32 4294901760, %v336_v62  ;;  %s2441_s12 = sshll.u32 %s3327_s10, 4  ;;  %s2442_s12 = int_to_ptr.vmem [resolvable:$true] %s2441_s12 }
  0x20   :  { %2754 = vmatprep.subr.mxu0 %v3439_v23  ;;  %2805 = vmatpush3.msra.mxu1 %v600_v45  ;;  %v621_v3 = vand.u32 4294901760, %v620_v57  ;;  %v3566_v4 = vand.u32 4294901760, %v3539_v58  ;;  %v3577_v8 = vsub.f32 %v337_v51, %v3546_v61  ;;  %v334_v9 = vld [vmem:[%s4834_s2 + $0x18] sm:$0xff]  ;;  %v62_v11 = vld [vmem:[%s4832_s0 + $0x4a] sm:$0xff]  ;;  %v3595_v15 = vand.u32 4294901760, %v335_v6  ;;  %v331_v51 = vld [vmem:[%s4834_s2] sm:$0xff]  ;;  %p3304_p1 = scmp.lt.s32.totalorder %s2442_s12, %s2442_s12 }
  0x21   :  { %2755 = vmatpush3.msra.mxu0 %v3439_v23  ;;  %2806 = vmatprep.subr.mxu1 %v607_v54  ;;  %v634_v7 = vsub.f32 %v3516_v50, %v3543_v60  ;;  %v63_v10 = vld [vmem:[%s4832_s0 + $0x52] sm:$0xff]  ;;  %v628_v12 = vand.u32 4294901760, %v627_v1  ;;  %v3592_v14 = vand.u32 4294901760, %v3562_v2  ;;  %v3600_v20 = vsub.f32 %v336_v62, %v3569_v5  ;;  %v332_v45 = vld [vmem:[%s4834_s2 + $0x8] sm:$0xff]  ;;  %s3299_s13 = scalar_lea.vmem %s2442_s12, 128 }
  0x22   :  { %242 = vrot.lane.b32.xlu1 %v77_v52, %s3323_s11  ;;  %2756 = vmatprep.subr.mxu0 %v3465_v31  ;;  %v641_v16 = vsub.f32 %v3539_v58, %v3566_v4  ;;  %v3604_v27 = vand.u32 4294901760, %v3577_v8  ;;  %v3607_v28 = vand.u32 4294901760, %v334_v9  ;;  %v333_v29 = vld [vmem:[%s4834_s2 + $0x10] sm:$0xff]  ;;  %v3623_v40 = vsub.f32 %v335_v6, %v3595_v15  ;;  %p3300_p0 = scmp.ne.s32.totalorder %s2442_s12, %s3299_s13  ;;  %p3305_p2 = scmp.lt.s32.totalorder %s3299_s13, %s3299_s13 }
  0x23   :  { %240 = vrot.lane.b32.xlu0 %v76_v53, %s3323_s11  ;;  %2807 = vmatpush3.msra.mxu1 %v607_v54  ;;  %v635_v21 = vand.u32 4294901760, %v634_v7  ;;  %v79_v35 = vld [vmem:[%s4832_s0 + $0x53] sm:$0xff]  ;;  %v78_v38 = vld [vmem:[%s4832_s0 + $0x4b] sm:$0xff]  ;;  %v648_v39 = vsub.f32 %v3562_v2, %v3592_v14  ;;  %v3627_v42 = vand.u32 4294901760, %v3600_v20  ;;  %v3630_v43 = vand.u32 4294901760, %v333_v29  ;;  %v48_v53 = vld [vmem:[%s4832_s0 + $0x61] sm:$0xff] }
  0x24   :  { %2757 = vmatpush3.msra.mxu0 %v3465_v31  ;;  %2808 = vmatprep.subr.mxu1 %v614_v59  ;;  %v642_v41 = vand.u32 4294901760, %v641_v16  ;;  %v655_v48 = vsub.f32 %v3577_v8, %v3604_v27  ;;  %v3638_v49 = vsub.f32 %v334_v9, %v3607_v28  ;;  %v49_v52 = vld [vmem:[%s4832_s0 + $0x69] sm:$0xff]  ;;  %v3653_v57 = vand.u32 4294901760, %v3623_v40  ;;  %p3306_p3 = por %p3305_p2, %p3304_p1 }
  0x25   :  { %2758 = vmatprep.subr.mxu0 %v3483_v37  ;;  %2809 = vmatpush3.msra.mxu1 %v614_v59  ;;  %v649_v54 = vand.u32 4294901760, %v648_v39  ;;  %v3656_v59 = vand.u32 4294901760, %v332_v45  ;;  %v662_v62 = vsub.f32 %v3600_v20, %v3627_v42  ;;  %v65_v6 = vld [vmem:[%s4832_s0 + $0x6a] sm:$0xff]  ;;  %v64_v7 = vld [vmem:[%s4832_s0 + $0x62] sm:$0xff]  ;;  %vm280_vm0 = vcmask 261120  }
  0x26   :  { %118 = vrot.lane.b32.xlu1 %v47_v63, %s3322_s26  ;;  %2759 = vmatpush3.msra.mxu0 %v3483_v37  ;;  %v3661_v63 = vsub.f32 %v333_v29, %v3630_v43  ;;  %v3665_v1 = vand.u32 4294901760, %v3638_v49  ;;  %v669_v9 = vsub.f32 %v3623_v40, %v3653_v57  ;;  %v81_v29 = vld [vmem:[%s4832_s0 + $0x6b] sm:$0xff]  ;;  %vm297_vm1 = vcmask 523264   ;;  %p3307_p4 = pnand %p3306_p3, %p3300_p0 }
  0x27   :  { %116 = vrot.lane.b32.xlu0 %v46_v0, %s3322_s26  ;;  %2810 = vmatprep.subr.mxu1 %v621_v3  ;;  %v656_v0 = vand.u32 4294901760, %v655_v48  ;;  %vm314_vm2 = vcmask 785408   ;;  %vm3325_vm3 = vmmov 0   ;;  %vm1772_vm6 = vcmask 1041409  }
  0x28   :  { %2760 = vmatprep.subr.mxu0 %v3508_v47  ;;  %2811 = vmatpush3.msra.mxu1 %v621_v3  ;;  %v3668_v3 = vand.u32 4294901760, %v331_v51  ;;  %v676_v16 = vsub.f32 %v3638_v49, %v3665_v1  ;;  %vm1775_vm7 = vcmask 1042434   ;;  %vm1778_vm8 = vcmask 1043459  }
  0x29   :  { %2761 = vmatpush3.msra.mxu0 %v3508_v47  ;;  %2812 = vmatprep.subr.mxu1 %v628_v12  ;;  %vm1781_vm9 = vcmask 1044484   ;;  %vm1784_vm10 = vcmask 1045509   ;;  %vm1787_vm11 = vcmask 1046534   ;;  %vm1790_vm12 = vcmask 1047559  }
  0x2a   :  { %182 = vrot.lane.b32.xlu1 %v63_v10, %s3321_s25  ;;  %2762 = vmatprep.subr.mxu0 %v3534_v56  ;;  %v3681_v10 = vsub.f32 %v332_v45, %v3656_v59  ;;  %v677_v45 = vand.u32 4294901760, %v676_v16  ;;  %v82_v16 = vld [vmem:[%s4832_s0 + $0x7b] sm:$0xff] }
  0x2b   :  { %180 = vrot.lane.b32.xlu0 %v62_v11, %s3321_s25  ;;  %2813 = vmatpush3.msra.mxu1 %v628_v12  ;;  %v663_v11 = vand.u32 4294901760, %v662_v62  ;;  %v3685_v12 = vand.u32 4294901760, %v3661_v63 }
  0x2c   :  { %2763 = vmatpush3.msra.mxu0 %v3534_v56  ;;  %2814 = vmatprep.subr.mxu1 %v635_v21  ;;  %v3703_v39 = vand.u32 4294901760, %v3681_v10 }
  0x2d   :  { %2764 = vmatprep.subr.mxu0 %v3546_v61  ;;  %2815 = vmatpush3.msra.mxu1 %v635_v21  ;;  %4966 = vst [vmem:[#allocation5_spill] sm:$0xff] %v3685_v12  ;;  %v3691_v21 = vsub.f32 %v331_v51, %v3668_v3  ;;  %v51_v51 = vld [vmem:[%s4832_s0 + $0x81] sm:$0xff] }
  0x2e   :  { %246 = vrot.lane.b32.xlu1 %v79_v35, %s3323_s11  ;;  %2765 = vmatpush3.msra.mxu0 %v3546_v61  ;;  %v80_v35 = vld [vmem:[%s4832_s0 + $0x63] sm:$0xff]  ;;  %4967 = vst [vmem:[#allocation6_spill] sm:$0xff] %v3703_v39 }
  0x2f   :  { %244 = vrot.lane.b32.xlu0 %v78_v38, %s3323_s11  ;;  %2816 = vmatprep.subr.mxu1 %v642_v41  ;;  %v670_v38 = vand.u32 4294901760, %v669_v9  ;;  %v3710_v48 = vand.u32 4294901760, %v3691_v21 }
  0x30   :  { %2766 = vmatprep.subr.mxu0 %v3569_v5  ;;  %2817 = vmatpush3.msra.mxu1 %v642_v41  ;;  %v683_v41 = vsub.f32 %v3661_v63, %v3685_v12 }
  0x31   :  { %2767 = vmatpush3.msra.mxu0 %v3569_v5  ;;  %2818 = vmatprep.subr.mxu1 %v649_v54  ;;  %4968 = vst [vmem:[#allocation7_spill] sm:$0xff] %v3710_v48  ;;  %v697_v62 = vsub.f32 %v3691_v21, %v3710_v48 }
  0x32   :  { %122 = vrot.lane.b32.xlu1 %v49_v52, %s3322_s26  ;;  %2768 = vmatprep.subr.mxu0 %v3595_v15  ;;  %v50_v52 = vld [vmem:[%s4832_s0 + $0x79] sm:$0xff] }
  0x33   :  { %120 = vrot.lane.b32.xlu0 %v48_v53, %s3322_s26  ;;  %2819 = vmatpush3.msra.mxu1 %v649_v54  ;;  %v690_v53 = vsub.f32 %v3681_v10, %v3703_v39  ;;  %v684_v54 = vand.u32 4294901760, %v683_v41  ;;  %v698_v9 = vand.u32 4294901760, %v697_v62  ;;  %v68_v41 = vld [vmem:[%s4832_s0 + $0x92] sm:$0xff]  ;;  %v70_v62 = vld [vmem:[%s4832_s0 + $0xaa] sm:$0xff] }
  0x34   :  { %2769 = vmatpush3.msra.mxu0 %v3595_v15  ;;  %2820 = vmatprep.subr.mxu1 %v656_v0 }
  0x35   :  { %2770 = vmatprep.subr.mxu0 %v3607_v28  ;;  %2821 = vmatpush3.msra.mxu1 %v656_v0  ;;  %v67_v0 = vld [vmem:[%s4832_s0 + $0x82] sm:$0xff] }
  0x36   :  { %186 = vrot.lane.b32.xlu1 %v65_v6, %s3321_s25  ;;  %2771 = vmatpush3.msra.mxu0 %v3607_v28  ;;  %v66_v6 = vld [vmem:[%s4832_s0 + $0x7a] sm:$0xff] }
  0x37   :  { %184 = vrot.lane.b32.xlu0 %v64_v7, %s3321_s25  ;;  %2822 = vmatprep.subr.mxu1 %v663_v11  ;;  %v691_v7 = vand.u32 4294901760, %v690_v53  ;;  %v54_v53 = vld [vmem:[%s4832_s0 + $0xa9] sm:$0xff] }
  0x38   :  { %2772 = vmatprep.subr.mxu0 %v3630_v43  ;;  %2823 = vmatpush3.msra.mxu1 %v663_v11  ;;  %v83_v11 = vld [vmem:[%s4832_s0 + $0x83] sm:$0xff] }
  0x39   :  { %2773 = vmatpush3.msra.mxu0 %v3630_v43  ;;  %2824 = vmatprep.subr.mxu1 %v670_v38 }
  0x3a   :  { %250 = vrot.lane.b32.xlu1 %v81_v29, %s3323_s11  ;;  %2774 = vmatprep.subr.mxu0 %v3656_v59  ;;  %v53_v29 = vld [vmem:[%s4832_s0 + $0x99] sm:$0xff] }
  0x3b   :  { %248 = vrot.lane.b32.xlu0 %v80_v35, %s3323_s11  ;;  %2825 = vmatpush3.msra.mxu1 %v670_v38  ;;  %v52_v35 = vld [vmem:[%s4832_s0 + $0x91] sm:$0xff]  ;;  %v69_v38 = vld [vmem:[%s4832_s0 + $0x9a] sm:$0xff] }
  0x3c   :  { %2775 = vmatpush3.msra.mxu0 %v3656_v59  ;;  %2826 = vmatprep.subr.mxu1 %v677_v45 }
  0x3d   :  { %2776 = vmatprep.subr.mxu0 %v3668_v3  ;;  %2827 = vmatpush3.msra.mxu1 %v677_v45  ;;  %v85_v45 = vld [vmem:[%s4832_s0 + $0x9b] sm:$0xff] }
  0x3e   :  { %126 = vrot.lane.b32.xlu1 %v51_v51, %s3322_s26  ;;  %2777 = vmatpush3.msra.mxu0 %v3668_v3  ;;  %v84_v51 = vld [vmem:[%s4832_s0 + $0x93] sm:$0xff] }
  0x3f   :  { %124 = vrot.lane.b32.xlu0 %v50_v52, %s3322_s26  ;;  %2828 = vmatprep.subr.mxu1 %v684_v54  ;;  %v55_v52 = vld [vmem:[%s4832_s0 + $0xb1] sm:$0xff] }
  0x40   :  { %2858 = vmatprep.subr.mxu0 %v3436_v22  ;;  %2829 = vmatpush3.msra.mxu1 %v684_v54  ;;  %v71_v54 = vld [vmem:[%s4832_s0 + $0xb2] sm:$0xff] }
  0x41   :  { %2830 = vmatprep.subr.mxu1 %v691_v7 }
  0x42   :  { %190 = vrot.lane.b32.xlu1 %v67_v0, %s3321_s25  ;;  %2831 = vmatpush3.msra.mxu1 %v691_v7  ;;  %v87_v0 = vld [vmem:[%s4832_s0 + $0xb3] sm:$0xff] }
  0x43   :  { %188 = vrot.lane.b32.xlu0 %v66_v6, %s3321_s25  ;;  %2832 = vmatprep.subr.mxu1 %v698_v9  ;;  %v86_v6 = vld [vmem:[%s4832_s0 + $0xab] sm:$0xff] }
  0x44   :  { %2833 = vmatpush3.msra.mxu1 %v698_v9 }
  0x45   :  { %2914 = vmatprep.subr.mxu1 %v3412_v13 }
  0x46   :  { %254 = vrot.lane.b32.xlu1 %v83_v11, %s3323_s11  ;;  %v24_v11 = vld [vmem:[%s4832_s0] sm:$0xff] }
  0x47   :  { %252 = vrot.lane.b32.xlu0 %v82_v16, %s3323_s11  ;;  %v25_v16 = vld [vmem:[%s4832_s0 + $0x8] sm:$0xff] }
  0x4a   :  { %130 = vrot.lane.b32.xlu1 %v53_v29, %s3322_s26 }
  0x4b   :  { %128 = vrot.lane.b32.xlu0 %v52_v35, %s3322_s26 }
  0x4e   :  { %194 = vrot.lane.b32.xlu1 %v69_v38, %s3321_s25 }
  0x4f   :  { %192 = vrot.lane.b32.xlu0 %v68_v41, %s3321_s25 }
  0x52   :  { %258 = vrot.lane.b32.xlu1 %v85_v45, %s3323_s11 }
  0x53   :  { %256 = vrot.lane.b32.xlu0 %v84_v51, %s3323_s11 }
  0x56   :  { %134 = vrot.lane.b32.xlu1 %v55_v52, %s3322_s26 }
  0x57   :  { %132 = vrot.lane.b32.xlu0 %v54_v53, %s3322_s26 }
  0x5a   :  { %198 = vrot.lane.b32.xlu1 %v71_v54, %s3321_s25 }
  0x5b   :  { %196 = vrot.lane.b32.xlu0 %v70_v62, %s3321_s25 }
  0x5e   :  { %262 = vrot.lane.b32.xlu1 %v87_v0, %s3323_s11 }
  0x5f   :  { %260 = vrot.lane.b32.xlu0 %v86_v6, %s3323_s11 }
  0x74   :  { %v169_v7 = vpop.permute.xlu1 %168 }
  0x75   :  { %v105_v9 = vpop.permute.xlu0 %104 }
  0x76   :  { %v281_v38 = vsel %vm280_vm0, %v24_v11, %v105_v9 }
  0x77   :  { %v298_v53 = vsel %vm297_vm1, %v281_v38, %v169_v7  ;;  %v27_v38 = vld [vmem:[%s4832_s0 + $0x20] sm:$0xff] }
  0x78   :  { %v171_v29 = vpop.permute.xlu1 %170 }
  0x79   :  { %v107_v35 = vpop.permute.xlu0 %106 }
  0x7a   :  { %v282_v41 = vsel %vm280_vm0, %v25_v16, %v107_v35 }
  0x7b   :  { %v299_v51 = vsel %vm297_vm1, %v282_v41, %v171_v29  ;;  %v26_v41 = vld [vmem:[%s4832_s0 + $0x18] sm:$0xff] }
  0x7c   :  { %v235_v45 = vpop.permute.xlu1 %234 }
  0x7d   :  { %v233_v52 = vpop.permute.xlu0 %232  ;;  %v316_v54 = vsel %vm314_vm2, %v299_v51, %v235_v45 }
  0x7e   :  { %v315_v62 = vsel %vm314_vm2, %v298_v53, %v233_v52  ;;  %v3809_v0 = vand.u32 4294901760, %v316_v54 }
  0x7f   :  { %v3811_v6 = vand.u32 4294901760, %v315_v62 }
  0x80   :  { %4969 = vst [vmem:[#allocation8_spill] sm:$0xff] %v3809_v0  ;;  %v3814_v9 = vsub.f32 %v316_v54, %v3809_v0  ;;  %v111_v16 = vpop.permute.xlu1 %110 }
  0x81   :  { %v3817_v11 = vsub.f32 %v315_v62, %v3811_v6  ;;  %v109_v35 = vpop.permute.xlu0 %108  ;;  %2834 = vmatprep.mubr.f32.mxu1 %v3811_v6  ;;  %v284_v48 = vsel %vm280_vm0, %v27_v38, %v111_v16 }
  0x82   :  { %2835 = vmatmul.mubr.f32.vlgmr.msra.gmra.mxu1 %v3809_v0  ;;  %v4848_v29 = vand.u32 4294901760, %v3814_v9  ;;  %v283_v39 = vsel %vm280_vm0, %v26_v41, %v109_v35 }
  0x83   :  { %v4843_v7 = vand.u32 4294901760, %v3817_v11  ;;  %2915 = vmatpush3.msra.mxu1 %v3412_v13 }
  0x84   :  { %2916 = vmatprep.subr.mxu1 %v3423_v17  ;;  %v175_v45 = vpop.permute.xlu1 %174  ;;  %v441_v53 = vsub.f32 %v3814_v9, %v4848_v29 }
  0x85   :  { %v173_v51 = vpop.permute.xlu0 %172  ;;  %v431_v52 = vsub.f32 %v3817_v11, %v4843_v7  ;;  %2917 = vmatpush3.msra.mxu1 %v3423_v17  ;;  %v301_v7 = vsel %vm297_vm1, %v284_v48, %v175_v45 }
  0x86   :  { %2918 = vmatprep.subr.mxu1 %v3425_v18  ;;  %v442_v62 = vand.u32 4294901760, %v441_v53  ;;  %v300_v12 = vsel %vm297_vm1, %v283_v39, %v173_v51 }
  0x87   :  { %v432_v54 = vand.u32 4294901760, %v431_v52  ;;  %2919 = vmatpush3.msra.mxu1 %v3425_v18 }
  0x88   :  { %2920 = vmatprep.subr.mxu1 %v3427_v19  ;;  %v239_v0 = vpop.permute.xlu1 %238 }
  0x89   :  { %v237_v29 = vpop.permute.xlu0 %236  ;;  %2778 = vmatprep.mubr.f32.mxu0 %v432_v54  ;;  %2921 = vmatpush3.msra.mxu1 %v3427_v19  ;;  %v318_v52 = vsel %vm314_vm2, %v301_v7, %v239_v0 }
  0x8a   :  { %v317_v53 = vsel %vm314_vm2, %v300_v12, %v237_v29  ;;  %2779 = vmatmul.mubr.f32.vlgmr.msra.gmra.mxu0 %v442_v62  ;;  %2922 = vmatprep.subr.mxu1 %v3439_v23  ;;  %v3849_v16 = vand.u32 4294901760, %v318_v52  ;;  %v28_v29 = vld [vmem:[%s4832_s0 + $0x30] sm:$0xff] }
  0x8b   :  { %v3851_v35 = vand.u32 4294901760, %v317_v53  ;;  %2859 = vmatpush3.msra.mxu0 %v3436_v22  ;;  %2923 = vmatpush3.msra.mxu1 %v3439_v23 }
  0x8c   :  { %4970 = vst [vmem:[#allocation9_spill] sm:$0xff] %v3849_v16  ;;  %2860 = vmatprep.subr.mxu0 %v3444_v24  ;;  %2924 = vmatprep.subr.mxu1 %v3465_v31  ;;  %v3858_v39 = vsub.f32 %v318_v52, %v3849_v16  ;;  %v115_v48 = vpop.permute.xlu1 %114 }
  0x8d   :  { %4971 = vst [vmem:[#allocation10_spill] sm:$0xff] %v3851_v35  ;;  %v3861_v12 = vsub.f32 %v317_v53, %v3851_v35  ;;  %v113_v0 = vpop.permute.xlu0 %112  ;;  %2837 = vmatprep.mubr.f32.mxu1 %v3851_v35  ;;  %2861 = vmatpush3.msra.mxu0 %v3444_v24  ;;  %v29_v24 = vld [vmem:[%s4832_s0 + $0x38] sm:$0xff] }
  0x8e   :  { %2838 = vmatmul.mubr.f32.gmra.mxu1 %v3849_v16  ;;  %2862 = vmatprep.subr.mxu0 %v3447_v25  ;;  %v4849_v7 = vand.u32 4294901760, %v3858_v39  ;;  %v286_v62 = vsel %vm280_vm0, %v29_v24, %v115_v48  ;;  %v285_v52 = vsel %vm280_vm0, %v28_v29, %v113_v0 }
  0x8f   :  { %v4850_v22 = vand.u32 4294901760, %v3861_v12  ;;  %2925 = vmatpush3.msra.mxu1 %v3465_v31  ;;  %2863 = vmatpush3.msra.mxu0 %v3447_v25 }
  0x90   :  { %2926 = vmatprep.subr.mxu1 %v3483_v37  ;;  %2864 = vmatprep.subr.mxu0 %v3450_v26  ;;  %v179_v38 = vpop.permute.xlu1 %178  ;;  %v461_v25 = vsub.f32 %v3858_v39, %v4849_v7 }
  0x91   :  { %v177_v41 = vpop.permute.xlu0 %176  ;;  %v451_v45 = vsub.f32 %v3861_v12, %v4850_v22  ;;  %2927 = vmatpush3.msra.mxu1 %v3483_v37  ;;  %2865 = vmatpush3.msra.mxu0 %v3450_v26  ;;  %v303_v26 = vsel %vm297_vm1, %v286_v62, %v179_v38 }
  0x92   :  { %2928 = vmatprep.subr.mxu1 %v3508_v47  ;;  %2866 = vmatprep.subr.mxu0 %v3474_v34  ;;  %v462_v54 = vand.u32 4294901760, %v461_v25  ;;  %v302_v53 = vsel %vm297_vm1, %v285_v52, %v177_v41  ;;  %v30_v41 = vld [vmem:[%s4832_s0 + $0x48] sm:$0xff] }
  0x93   :  { %v452_v51 = vand.u32 4294901760, %v451_v45  ;;  %2929 = vmatpush3.msra.mxu1 %v3508_v47  ;;  %2867 = vmatpush3.msra.mxu0 %v3474_v34 }
  0x94   :  { %2930 = vmatprep.subr.mxu1 %v3534_v56  ;;  %2868 = vmatprep.subr.mxu0 %v3501_v44  ;;  %v243_v7 = vpop.permute.xlu1 %242 }
  0x95   :  { %v241_v22 = vpop.permute.xlu0 %240  ;;  %2781 = vmatprep.mubr.f32.mxu0 %v452_v51  ;;  %2931 = vmatpush3.msra.mxu1 %v3534_v56  ;;  %v320_v45 = vsel %vm314_vm2, %v303_v26, %v243_v7 }
  0x96   :  { %v319_v34 = vsel %vm314_vm2, %v302_v53, %v241_v22  ;;  %2782 = vmatmul.mubr.f32.gmra.mxu0 %v462_v54  ;;  %2932 = vmatprep.subr.mxu1 %v3546_v61  ;;  %v3901_v48 = vand.u32 4294901760, %v320_v45 }
  0x97   :  { %v3903_v0 = vand.u32 4294901760, %v319_v34  ;;  %2869 = vmatpush3.msra.mxu0 %v3501_v44  ;;  %2933 = vmatpush3.msra.mxu1 %v3546_v61 }
  0x98   :  { %4972 = vst [vmem:[#allocation11_spill] sm:$0xff] %v3901_v48  ;;  %2870 = vmatprep.subr.mxu0 %v3516_v50  ;;  %2934 = vmatprep.subr.mxu1 %v3569_v5  ;;  %v3910_v24 = vsub.f32 %v320_v45, %v3901_v48  ;;  %v119_v7 = vpop.permute.xlu1 %118 }
  0x99   :  { %4973 = vst [vmem:[#allocation12_spill] sm:$0xff] %v3903_v0  ;;  %v3913_v22 = vsub.f32 %v319_v34, %v3903_v0  ;;  %v117_v29 = vpop.permute.xlu0 %116  ;;  %2840 = vmatprep.mubr.f32.mxu1 %v3903_v0  ;;  %2871 = vmatpush3.msra.mxu0 %v3516_v50  ;;  %v31_v50 = vld [vmem:[%s4832_s0 + $0x50] sm:$0xff] }
  0x9a   :  { %2841 = vmatmul.mubr.f32.gmra.mxu1 %v3901_v48  ;;  %2872 = vmatprep.subr.mxu0 %v3539_v58  ;;  %v4851_v38 = vand.u32 4294901760, %v3910_v24  ;;  %v288_v26 = vsel %vm280_vm0, %v31_v50, %v119_v7  ;;  %v287_v53 = vsel %vm280_vm0, %v30_v41, %v117_v29 }
  0x9b   :  { %v4854_v44 = vand.u32 4294901760, %v3913_v22  ;;  %2935 = vmatpush3.msra.mxu1 %v3569_v5  ;;  %2873 = vmatpush3.msra.mxu0 %v3539_v58 }
  0x9c   :  { %2936 = vmatprep.subr.mxu1 %v3595_v15  ;;  %2874 = vmatprep.subr.mxu0 %v3562_v2  ;;  %v183_v25 = vpop.permute.xlu1 %182  ;;  %v481_v58 = vsub.f32 %v3910_v24, %v4851_v38 }
  0x9d   :  { %v181_v51 = vpop.permute.xlu0 %180  ;;  %v471_v54 = vsub.f32 %v3913_v22, %v4854_v44  ;;  %2937 = vmatpush3.msra.mxu1 %v3595_v15  ;;  %2875 = vmatpush3.msra.mxu0 %v3562_v2  ;;  %v305_v2 = vsel %vm297_vm1, %v288_v26, %v183_v25 }
  0x9e   :  { %2938 = vmatprep.subr.mxu1 %v3607_v28  ;;  %2876 = vmatprep.subr.mxu0 %v3577_v8  ;;  %v482_v52 = vand.u32 4294901760, %v481_v58  ;;  %v304_v45 = vsel %vm297_vm1, %v287_v53, %v181_v51  ;;  %v32_v58 = vld [vmem:[%s4832_s0 + $0x60] sm:$0xff] }
  0x9f   :  { %v472_v62 = vand.u32 4294901760, %v471_v54  ;;  %2939 = vmatpush3.msra.mxu1 %v3607_v28  ;;  %2877 = vmatpush3.msra.mxu0 %v3577_v8 }
  0xa0   :  { %2940 = vmatprep.subr.mxu1 %v3630_v43  ;;  %2878 = vmatprep.subr.mxu0 %v3600_v20  ;;  %v247_v34 = vpop.permute.xlu1 %246 }
  0xa1   :  { %v245_v38 = vpop.permute.xlu0 %244  ;;  %2784 = vmatprep.mubr.f32.mxu0 %v472_v62  ;;  %2941 = vmatpush3.msra.mxu1 %v3630_v43  ;;  %v322_v54 = vsel %vm314_vm2, %v305_v2, %v247_v34 }
  0xa2   :  { %v321_v8 = vsel %vm314_vm2, %v304_v45, %v245_v38  ;;  %2785 = vmatmul.mubr.f32.gmra.mxu0 %v482_v52  ;;  %2942 = vmatprep.subr.mxu1 %v3656_v59  ;;  %v3953_v7 = vand.u32 4294901760, %v322_v54 }
  0xa3   :  { %v3955_v29 = vand.u32 4294901760, %v321_v8  ;;  %2879 = vmatpush3.msra.mxu0 %v3600_v20  ;;  %2943 = vmatpush3.msra.mxu1 %v3656_v59 }
  0xa4   :  { %4974 = vst [vmem:[#allocation13_spill] sm:$0xff] %v3953_v7  ;;  %2880 = vmatprep.subr.mxu0 %v3623_v40  ;;  %2944 = vmatprep.subr.mxu1 %v3668_v3  ;;  %v3962_v50 = vsub.f32 %v322_v54, %v3953_v7  ;;  %v123_v41 = vpop.permute.xlu1 %122 }
  0xa5   :  { %4975 = vst [vmem:[#allocation14_spill] sm:$0xff] %v3955_v29  ;;  %v3965_v38 = vsub.f32 %v321_v8, %v3955_v29  ;;  %v121_v25 = vpop.permute.xlu0 %120  ;;  %2843 = vmatprep.mubr.f32.mxu1 %v3955_v29  ;;  %2881 = vmatpush3.msra.mxu0 %v3623_v40  ;;  %v33_v40 = vld [vmem:[%s4832_s0 + $0x68] sm:$0xff] }
  0xa6   :  { %2844 = vmatmul.mubr.f32.gmra.mxu1 %v3953_v7  ;;  %2882 = vmatprep.subr.mxu0 %v3638_v49  ;;  %v4853_v51 = vand.u32 4294901760, %v3962_v50  ;;  %v290_v45 = vsel %vm280_vm0, %v33_v40, %v123_v41  ;;  %v289_v34 = vsel %vm280_vm0, %v32_v58, %v121_v25 }
  0xa7   :  { %v4852_v20 = vand.u32 4294901760, %v3965_v38  ;;  %2945 = vmatpush3.msra.mxu1 %v3668_v3  ;;  %2883 = vmatpush3.msra.mxu0 %v3638_v49 }
  0xa8   :  { %3026 = vmatprep.subr.mxu1 %v3412_v13  ;;  %2884 = vmatprep.subr.mxu0 %v3661_v63  ;;  %v187_v62 = vpop.permute.xlu1 %186  ;;  %v501_v49 = vsub.f32 %v3962_v50, %v4853_v51 }
  0xa9   :  { %v185_v52 = vpop.permute.xlu0 %184  ;;  %v491_v26 = vsub.f32 %v3965_v38, %v4852_v20  ;;  %2885 = vmatpush3.msra.mxu0 %v3661_v63  ;;  %v307_v54 = vsel %vm297_vm1, %v290_v45, %v187_v62 }
  0xaa   :  { %2886 = vmatprep.subr.mxu0 %v3681_v10  ;;  %v502_v2 = vand.u32 4294901760, %v501_v49  ;;  %v306_v8 = vsel %vm297_vm1, %v289_v34, %v185_v52  ;;  %v34_v52 = vld [vmem:[%s4832_s0 + $0x78] sm:$0xff] }
  0xab   :  { %v492_v53 = vand.u32 4294901760, %v491_v26  ;;  %2887 = vmatpush3.msra.mxu0 %v3681_v10 }
  0xac   :  { %2888 = vmatprep.subr.mxu0 %v3691_v21  ;;  %v251_v20 = vpop.permute.xlu1 %250 }
  0xad   :  { %v249_v51 = vpop.permute.xlu0 %248  ;;  %2787 = vmatprep.mubr.f32.mxu0 %v492_v53  ;;  %2889 = vmatpush3.msra.mxu0 %v3691_v21  ;;  %v324_v63 = vsel %vm314_vm2, %v307_v54, %v251_v20 }
  0xae   :  { %v323_v26 = vsel %vm314_vm2, %v306_v8, %v249_v51  ;;  %2788 = vmatmul.mubr.f32.gmra.mxu0 %v502_v2  ;;  %2970 = vmatprep.subr.mxu0 %v3462_v30  ;;  %v4001_v10 = vand.u32 4294901760, %v324_v63  ;;  %v35_v51 = vld [vmem:[%s4832_s0 + $0x80] sm:$0xff] }
  0xaf   :  { %v4003_v41 = vand.u32 4294901760, %v323_v26 }
  0xb0   :  { %4976 = vst [vmem:[#allocation15_spill] sm:$0xff] %v4001_v10  ;;  %v4006_v25 = vsub.f32 %v324_v63, %v4001_v10  ;;  %v127_v58 = vpop.permute.xlu1 %126 }
  0xb1   :  { %4977 = vst [vmem:[#allocation16_spill] sm:$0xff] %v4003_v41  ;;  %v4009_v40 = vsub.f32 %v323_v26, %v4003_v41  ;;  %v125_v62 = vpop.permute.xlu0 %124  ;;  %2846 = vmatprep.mubr.f32.mxu1 %v4003_v41  ;;  %v292_v8 = vsel %vm280_vm0, %v35_v51, %v127_v58 }
  0xb2   :  { %2847 = vmatmul.mubr.f32.gmra.mxu1 %v4001_v10  ;;  %v4864_v20 = vand.u32 4294901760, %v4006_v25  ;;  %v291_v63 = vsel %vm280_vm0, %v34_v52, %v125_v62 }
  0xb3   :  { %v4861_v21 = vand.u32 4294901760, %v4009_v40 }
  0xb4   :  { %v191_v49 = vpop.permute.xlu1 %190  ;;  %v521_v45 = vsub.f32 %v4006_v25, %v4864_v20 }
  0xb5   :  { %v189_v53 = vpop.permute.xlu0 %188  ;;  %v511_v2 = vsub.f32 %v4009_v40, %v4861_v21  ;;  %v309_v26 = vsel %vm297_vm1, %v292_v8, %v191_v49 }
  0xb6   :  { %v522_v54 = vand.u32 4294901760, %v521_v45  ;;  %v308_v44 = vsel %vm297_vm1, %v291_v63, %v189_v53 }
  0xb7   :  { %v512_v34 = vand.u32 4294901760, %v511_v2 }
  0xb8   :  { %v255_v10 = vpop.permute.xlu1 %254 }
  0xb9   :  { %v253_v41 = vpop.permute.xlu0 %252  ;;  %2790 = vmatprep.mubr.f32.mxu0 %v512_v34  ;;  %v326_v7 = vsel %vm314_vm2, %v309_v26, %v255_v10 }
  0xba   :  { %v325_v21 = vsel %vm314_vm2, %v308_v44, %v253_v41  ;;  %2791 = vmatmul.mubr.f32.gmra.mxu0 %v522_v54  ;;  %v4033_v29 = vand.u32 4294901760, %v326_v7  ;;  %v37_v41 = vld [vmem:[%s4832_s0 + $0x98] sm:$0xff] }
  0xbb   :  { %v4035_v2 = vand.u32 4294901760, %v325_v21 }
  0xbc   :  { %4978 = vst [vmem:[#allocation17_spill] sm:$0xff] %v4033_v29  ;;  %v4038_v58 = vsub.f32 %v326_v7, %v4033_v29  ;;  %v131_v51 = vpop.permute.xlu1 %130  ;;  %v36_v7 = vld [vmem:[%s4832_s0 + $0x90] sm:$0xff] }
  0xbd   :  { %4979 = vst [vmem:[#allocation18_spill] sm:$0xff] %v4035_v2  ;;  %v4041_v62 = vsub.f32 %v325_v21, %v4035_v2  ;;  %v129_v52 = vpop.permute.xlu0 %128  ;;  %2849 = vmatprep.mubr.f32.mxu1 %v4035_v2  ;;  %v294_v8 = vsel %vm280_vm0, %v37_v41, %v131_v51 }
  0xbe   :  { %2850 = vmatmul.mubr.f32.gmra.mxu1 %v4033_v29  ;;  %v4874_v44 = vand.u32 4294901760, %v4038_v58  ;;  %v293_v63 = vsel %vm280_vm0, %v36_v7, %v129_v52 }
  0xbf   :  { %v4871_v10 = vand.u32 4294901760, %v4041_v62 }
  0xc0   :  { %v195_v21 = vpop.permute.xlu1 %194  ;;  %v541_v45 = vsub.f32 %v4038_v58, %v4874_v44 }
  0xc1   :  { %v193_v49 = vpop.permute.xlu0 %192  ;;  %v531_v53 = vsub.f32 %v4041_v62, %v4871_v10  ;;  %v311_v26 = vsel %vm297_vm1, %v294_v8, %v195_v21 }
  0xc2   :  { %v542_v54 = vand.u32 4294901760, %v541_v45  ;;  %v310_v20 = vsel %vm297_vm1, %v293_v63, %v193_v49 }
  0xc3   :  { %v532_v34 = vand.u32 4294901760, %v531_v53 }
  0xc4   :  { %v259_v29 = vpop.permute.xlu1 %258 }
  0xc5   :  { %v257_v2 = vpop.permute.xlu0 %256  ;;  %2793 = vmatprep.mubr.f32.mxu0 %v532_v34  ;;  %v328_v48 = vsel %vm314_vm2, %v311_v26, %v259_v29 }
  0xc6   :  { %v327_v10 = vsel %vm314_vm2, %v310_v20, %v257_v2  ;;  %2794 = vmatmul.mubr.f32.gmra.mxu0 %v542_v54  ;;  %v4065_v0 = vand.u32 4294901760, %v328_v48  ;;  %v39_v2 = vld [vmem:[%s4832_s0 + $0xb0] sm:$0xff] }
  0xc7   :  { %v4067_v53 = vand.u32 4294901760, %v327_v10 }
  0xc8   :  { %4980 = vst [vmem:[#allocation19_spill] sm:$0xff] %v4065_v0  ;;  %v4070_v51 = vsub.f32 %v328_v48, %v4065_v0  ;;  %v135_v41 = vpop.permute.xlu1 %134  ;;  %v38_v48 = vld [vmem:[%s4832_s0 + $0xa8] sm:$0xff] }
  0xc9   :  { %4981 = vst [vmem:[#allocation20_spill] sm:$0xff] %v4067_v53  ;;  %v4073_v52 = vsub.f32 %v327_v10, %v4067_v53  ;;  %v133_v7 = vpop.permute.xlu0 %132  ;;  %2852 = vmatprep.mubr.f32.mxu1 %v4067_v53  ;;  %v296_v8 = vsel %vm280_vm0, %v39_v2, %v135_v41  ;;  %v4982_v2 = vand.u32 4294901760, %v3817_v11 }
  0xca   :  { %2853 = vmatmul.mubr.f32.gmra.mxu1 %v4065_v0  ;;  %v560_v20 = vand.u32 4294901760, %v4070_v51  ;;  %v295_v63 = vsel %vm280_vm0, %v38_v48, %v133_v7  ;;  %v4984_v48 = vand.u32 4294901760, %v3861_v12 }
  0xcb   :  { %v4881_v29 = vand.u32 4294901760, %v4073_v52 }
  0xcc   :  { %v199_v10 = vpop.permute.xlu1 %198  ;;  %v561_v45 = vsub.f32 %v4070_v51, %v560_v20 }
  0xcd   :  { %v197_v21 = vpop.permute.xlu0 %196  ;;  %v551_v49 = vsub.f32 %v4073_v52, %v4881_v29  ;;  %v313_v26 = vsel %vm297_vm1, %v296_v8, %v199_v10  ;;  %v1753_v8 = vld [vmem:[%s4836_s4 + $0x68] sm:$0xff] }
  0xce   :  { %v562_v54 = vand.u32 4294901760, %v561_v45  ;;  %v312_v44 = vsel %vm297_vm1, %v295_v63, %v197_v21  ;;  %v4985_v45 = vand.u32 4294901760, %v3858_v39 }
  0xcf   :  { %v552_v34 = vand.u32 4294901760, %v551_v49 }
  0xd0   :  { %v263_v0 = vpop.permute.xlu1 %262 }
  0xd1   :  { %v261_v53 = vpop.permute.xlu0 %260  ;;  %2796 = vmatprep.mubr.f32.mxu0 %v552_v34  ;;  %v330_v16 = vsel %vm314_vm2, %v313_v26, %v263_v0  ;;  %v4986_v34 = vand.u32 4294901760, %v3913_v22 }
  0xd2   :  { %v329_v29 = vsel %vm314_vm2, %v312_v44, %v261_v53  ;;  %2797 = vmatmul.mubr.f32.gmra.mxu0 %v562_v54  ;;  %v4097_v35 = vand.u32 4294901760, %v330_v16 }
  0xd3   :  { %v4099_v49 = vand.u32 4294901760, %v329_v29 }
  0xd4   :  { %v4102_v41 = vsub.f32 %v330_v16, %v4097_v35 }
  0xd5   :  { %v4105_v7 = vsub.f32 %v329_v29, %v4099_v49  ;;  %2855 = vmatprep.mubr.f32.mxu1 %v4099_v49  ;;  %v4983_v29 = vand.u32 4294901760, %v3814_v9 }
  0xd6   :  { %2856 = vmatmul.mubr.f32.gmra.mxu1 %v4097_v35  ;;  %v580_v44 = vand.u32 4294901760, %v4102_v41 }
  0xd7   :  { %2946 = vmatprep.mubr.f32.mxu1 %v4982_v2  ;;  %v570_v0 = vand.u32 4294901760, %v4105_v7 }
  0xd8   :  { %v581_v16 = vsub.f32 %v4102_v41, %v580_v44 }
  0xd9   :  { %v571_v53 = vsub.f32 %v4105_v7, %v570_v0 }
  0xda   :  { %2947 = vmatmul.mubr.f32.vlgmr.msra.gmra.mxu1 %v4983_v29  ;;  %v582_v21 = vand.u32 4294901760, %v581_v16 }
  0xdb   :  { %2949 = vmatprep.mubr.f32.mxu1 %v4984_v48  ;;  %3027 = vmatpush3.msra.mxu1 %v3412_v13  ;;  %v572_v10 = vand.u32 4294901760, %v571_v53  ;;  %v4987_v13 = vand.u32 4294901760, %v3910_v24  ;;  %v1751_v53 = vld [vmem:[%s4836_s4 + $0x58] sm:$0xff] }
  0xdc   :  { %3028 = vmatprep.subr.mxu1 %v3423_v17 }
  0xdd   :  { %2799 = vmatprep.mubr.f32.mxu0 %v572_v10  ;;  %3029 = vmatpush3.msra.mxu1 %v3423_v17  ;;  %v4988_v17 = vand.u32 4294901760, %v3965_v38  ;;  %v4900_v10 = vmov 0.0  }
  0xde   :  { %2800 = vmatmul.mubr.f32.gmra.mxu0 %v582_v21  ;;  %2950 = vmatmul.mubr.f32.gmra.mxu1 %v4985_v45  ;;  %v4317_v45 = vand.u32 4294901760, %v1751_v53 }
  0xdf   :  { %3030 = vmatprep.subr.mxu1 %v3425_v18  ;;  %2890 = vmatprep.mubr.f32.mxu0 %v3817_v11 }
  0xe0   :  { %2952 = vmatprep.mubr.f32.mxu1 %v4986_v34  ;;  %3031 = vmatpush3.msra.mxu1 %v3425_v18  ;;  %v4989_v18 = vand.u32 4294901760, %v3962_v50  ;;  %v1750_v34 = vld [vmem:[%s4836_s4 + $0x50] sm:$0xff] }
  0xe1   :  { %3032 = vmatprep.subr.mxu1 %v3427_v19 }
  0xe2   :  { %3033 = vmatpush3.msra.mxu1 %v3427_v19  ;;  %2891 = vmatmul.mubr.f32.vlgmr.msra.gmra.mxu0 %v3814_v9  ;;  %v4990_v19 = vand.u32 4294901760, %v4009_v40 }
  0xe3   :  { %2953 = vmatmul.mubr.f32.gmra.mxu1 %v4987_v13  ;;  %2971 = vmatpush3.msra.mxu0 %v3462_v30  ;;  %v4992_v30 = vand.u32 4294901760, %v4041_v62 }
  0xe4   :  { %3034 = vmatprep.subr.mxu1 %v3439_v23  ;;  %2893 = vmatprep.mubr.f32.mxu0 %v3861_v12 }
  0xe5   :  { %2955 = vmatprep.mubr.f32.mxu1 %v4988_v17  ;;  %2972 = vmatprep.subr.mxu0 %v3468_v32 }
  0xe6   :  { %3035 = vmatpush3.msra.mxu1 %v3439_v23  ;;  %2973 = vmatpush3.msra.mxu0 %v3468_v32  ;;  %v4991_v23 = vand.u32 4294901760, %v4006_v25  ;;  %v4994_v32 = vand.u32 4294901760, %v4073_v52 }
  0xe7   :  { %3036 = vmatprep.subr.mxu1 %v3465_v31  ;;  %2974 = vmatprep.subr.mxu0 %v3471_v33 }
  0xe8   :  { %3037 = vmatpush3.msra.mxu1 %v3465_v31  ;;  %2894 = vmatmul.mubr.f32.gmra.mxu0 %v3858_v39  ;;  %v4993_v31 = vand.u32 4294901760, %v4038_v58 }
  0xe9   :  { %2956 = vmatmul.mubr.f32.gmra.mxu1 %v4989_v18  ;;  %2975 = vmatpush3.msra.mxu0 %v3471_v33  ;;  %v4995_v33 = vld [vmem:[#allocation8_spill] sm:$0xff] }
  0xea   :  { %3038 = vmatprep.subr.mxu1 %v3483_v37  ;;  %2896 = vmatprep.mubr.f32.mxu0 %v3913_v22 }
  0xeb   :  { %2958 = vmatprep.mubr.f32.mxu1 %v4990_v19  ;;  %2976 = vmatprep.subr.mxu0 %v3480_v36  ;;  %v4326_v19 = vand.u32 4294901760, %v1750_v34 }
  0xec   :  { %3039 = vmatpush3.msra.mxu1 %v3483_v37  ;;  %2977 = vmatpush3.msra.mxu0 %v3480_v36  ;;  %v4996_v36 = vld [vmem:[#allocation5_spill] sm:$0xff]  ;;  %v4997_v37 = vld [vmem:[#allocation10_spill] sm:$0xff] }
  0xed   :  { %3040 = vmatprep.subr.mxu1 %v3508_v47  ;;  %2978 = vmatprep.subr.mxu0 %v3505_v46 }
  0xee   :  { %3041 = vmatpush3.msra.mxu1 %v3508_v47  ;;  %2897 = vmatmul.mubr.f32.gmra.mxu0 %v3910_v24  ;;  %v4999_v47 = vld [vmem:[#allocation9_spill] sm:$0xff] }
  0xef   :  { %2959 = vmatmul.mubr.f32.gmra.mxu1 %v4991_v23  ;;  %2979 = vmatpush3.msra.mxu0 %v3505_v46  ;;  %v4998_v46 = vld [vmem:[#allocation6_spill] sm:$0xff] }
  0xf0   :  { %3042 = vmatprep.subr.mxu1 %v3534_v56  ;;  %2899 = vmatprep.mubr.f32.mxu0 %v3965_v38 }
  0xf1   :  { %2961 = vmatprep.mubr.f32.mxu1 %v4992_v30  ;;  %2980 = vmatprep.subr.mxu0 %v3531_v55  ;;  %v4331_v30 = vsub.f32 %v1751_v53, %v4317_v45  ;;  %v1744_v53 = vld [vmem:[%s4836_s4 + $0x20] sm:$0xff] }
  0xf2   :  { %3043 = vmatpush3.msra.mxu1 %v3534_v56  ;;  %2981 = vmatpush3.msra.mxu0 %v3531_v55  ;;  %v5000_v55 = vld [vmem:[#allocation7_spill] sm:$0xff]  ;;  %v5001_v56 = vld [vmem:[#allocation12_spill] sm:$0xff] }
  0xf3   :  { %3044 = vmatprep.subr.mxu1 %v3546_v61  ;;  %2982 = vmatprep.subr.mxu0 %v3543_v60 }
  0xf4   :  { %3045 = vmatpush3.msra.mxu1 %v3546_v61  ;;  %2900 = vmatmul.mubr.f32.gmra.mxu0 %v3962_v50  ;;  %v5003_v61 = vld [vmem:[#allocation14_spill] sm:$0xff] }
  0xf5   :  { %2962 = vmatmul.mubr.f32.gmra.mxu1 %v4993_v31  ;;  %2983 = vmatpush3.msra.mxu0 %v3543_v60  ;;  %v5002_v60 = vld [vmem:[#allocation11_spill] sm:$0xff]  ;;  %5019 = vst [vmem:[#allocation14_spill] sm:$0xff] %v4317_v45  ;;  %v1749_v31 = vld [vmem:[%s4836_s4 + $0x48] sm:$0xff] }
  0xf6   :  { %3046 = vmatprep.subr.mxu1 %v3569_v5  ;;  %2902 = vmatprep.mubr.f32.mxu0 %v4009_v40 }
  0xf7   :  { %2964 = vmatprep.mubr.f32.mxu1 %v4994_v32  ;;  %2984 = vmatprep.subr.mxu0 %v3566_v4 }
  0xf8   :  { %3047 = vmatpush3.msra.mxu1 %v3569_v5  ;;  %2985 = vmatpush3.msra.mxu0 %v3566_v4  ;;  %v5004_v4 = vld [vmem:[#allocation13_spill] sm:$0xff]  ;;  %v5005_v5 = vld [vmem:[#allocation16_spill] sm:$0xff] }
  0xf9   :  { %3048 = vmatprep.subr.mxu1 %v3595_v15  ;;  %2986 = vmatprep.subr.mxu0 %v3592_v14  ;;  %5020 = vst [vmem:[#allocation13_spill] sm:$0xff] %v4326_v19  ;;  %5021 = vst [vmem:[#allocation16_spill] sm:$0xff] %v4331_v30 }
  0xfa   :  { %3049 = vmatpush3.msra.mxu1 %v3595_v15  ;;  %2903 = vmatmul.mubr.f32.gmra.mxu0 %v4006_v25  ;;  %v5007_v15 = vld [vmem:[#allocation18_spill] sm:$0xff] }
  0xfb   :  { %2965 = vmatmul.mubr.f32.gmra.mxu1 %v560_v20  ;;  %2987 = vmatpush3.msra.mxu0 %v3592_v14  ;;  %v5006_v14 = vld [vmem:[#allocation15_spill] sm:$0xff] }
  0xfc   :  { %3050 = vmatprep.subr.mxu1 %v3607_v28  ;;  %2905 = vmatprep.mubr.f32.mxu0 %v4041_v62 }
  0xfd   :  { %2967 = vmatprep.mubr.f32.mxu1 %v570_v0  ;;  %2988 = vmatprep.subr.mxu0 %v3604_v27 }
  0xfe   :  { %3051 = vmatpush3.msra.mxu1 %v3607_v28  ;;  %2989 = vmatpush3.msra.mxu0 %v3604_v27  ;;  %v5008_v27 = vld [vmem:[#allocation17_spill] sm:$0xff]  ;;  %v5009_v28 = vld [vmem:[#allocation20_spill] sm:$0xff] }
  0xff   :  { %3052 = vmatprep.subr.mxu1 %v3630_v43  ;;  %2990 = vmatprep.subr.mxu0 %v3627_v42 }
 0x100   :  { %3053 = vmatpush3.msra.mxu1 %v3630_v43  ;;  %2906 = vmatmul.mubr.f32.gmra.mxu0 %v4038_v58  ;;  %v1754_v58 = vld [vmem:[%s4836_s4 + $0x70] sm:$0xff] }
 0x101   :  { %2968 = vmatmul.mubr.f32.gmra.mxu1 %v580_v44  ;;  %2991 = vmatpush3.msra.mxu0 %v3627_v42  ;;  %v5010_v42 = vld [vmem:[#allocation19_spill] sm:$0xff]  ;;  %v4280_v20 = vand.u32 4294901760, %v1754_v58 }
 0x102   :  { %3054 = vmatprep.subr.mxu1 %v3656_v59  ;;  %2908 = vmatprep.mubr.f32.mxu0 %v4073_v52 }
 0x103   :  { %2992 = vmatprep.subr.mxu0 %v3653_v57  ;;  %3055 = vmatpush3.msra.mxu1 %v3656_v59  ;;  %5013 = vst [vmem:[#allocation10_spill] sm:$0xff] %v4280_v20  ;;  %v4289_v26 = vsub.f32 %v1754_v58, %v4280_v20  ;;  %v1745_v58 = vld [vmem:[%s4836_s4 + $0x28] sm:$0xff] }
 0x104   :  { %3058 = vmatprep.mubr.f32.mxu1 %v3811_v6  ;;  %2993 = vmatpush3.msra.mxu0 %v3653_v57 }
 0x105   :  { %3056 = vmatprep.subr.mxu1 %v3668_v3  ;;  %2994 = vmatprep.subr.mxu0 %v3665_v1  ;;  %5014 = vst [vmem:[#allocation6_spill] sm:$0xff] %v4289_v26  ;;  %v4898_v2 = vand.u32 4294901760, %v4289_v26 }
 0x106   :  { %3057 = vmatpush3.msra.mxu1 %v3668_v3  ;;  %2909 = vmatmul.mubr.f32.gmra.mxu0 %v4070_v51 }
 0x107   :  { %2995 = vmatpush3.msra.mxu0 %v3665_v1  ;;  %3059 = vmatmul.mubr.f32.vlgmr.msra.gmra.mxu1 %v4995_v33  ;;  %v1895_v29 = vsub.f32 %v4289_v26, %v4898_v2 }
 0x108   :  { %2911 = vmatprep.mubr.f32.mxu0 %v4105_v7  ;;  %2996 = vmatprep.subr.mxu0 %v4996_v36 }
 0x109   :  { %3061 = vmatprep.mubr.f32.mxu1 %v4997_v37  ;;  %2997 = vmatpush3.msra.mxu0 %v4996_v36  ;;  %v1896_v17 = vand.u32 4294901760, %v1895_v29  ;;  %v4339_v36 = vsub.f32 %v1750_v34, %v4326_v19 }
 0x10a   :  { %2998 = vmatprep.subr.mxu0 %v4998_v46  ;;  %2912 = vmatmul.mubr.f32.gmra.mxu0 %v4102_v41  ;;  %v1752_v41 = vld [vmem:[%s4836_s4 + $0x60] sm:$0xff] }
 0x10b   :  { %2999 = vmatpush3.msra.mxu0 %v4998_v46  ;;  %3062 = vmatmul.mubr.f32.gmra.mxu1 %v4999_v47  ;;  %v4303_v44 = vand.u32 4294901760, %v1752_v41  ;;  %5022 = vst [vmem:[#allocation15_spill] sm:$0xff] %v4339_v36 }
 0x10c   :  { %3000 = vmatprep.subr.mxu0 %v5000_v55  ;;  %3002 = vmatprep.mubr.f32.mxu0 %v3811_v6 }
 0x10d   :  { %3064 = vmatprep.mubr.f32.mxu1 %v5001_v56  ;;  %3001 = vmatpush3.msra.mxu0 %v5000_v55  ;;  %5017 = vst [vmem:[#allocation12_spill] sm:$0xff] %v4303_v44  ;;  %v4314_v21 = vsub.f32 %v1752_v41, %v4303_v44  ;;  %v4895_v55 = vand.u32 4294901760, %v4331_v30  ;;  %v4406_v41 = vand.u32 4294901760, %v1745_v58 }
 0x10e   :  { %3003 = vmatmul.mubr.f32.vlgmr.msra.gmra.mxu0 %v4995_v33  ;;  %3117 = vmatprep.subr.mxu1 %v4900_v10 }
 0x10f   :  { %3065 = vmatmul.mubr.f32.gmra.mxu1 %v5002_v60  ;;  %3005 = vmatprep.mubr.f32.mxu0 %v4997_v37  ;;  %5018 = vst [vmem:[#allocation11_spill] sm:$0xff] %v4314_v21  ;;  %v4896_v23 = vand.u32 4294901760, %v4314_v21  ;;  %v4341_v37 = vand.u32 4294901760, %v1749_v31  ;;  %5030 = vst [vmem:[#allocation24_spill] sm:$0xff] %v4406_v41 }
 0x110   :  { %3067 = vmatprep.mubr.f32.mxu1 %v5003_v61  ;;  %3082 = vmatprep.subr.mxu0 %v4900_v10 }
 0x111   :  { %5023 = vst [vmem:[#allocation18_spill] sm:$0xff] %v4341_v37 }
 0x112   :  { %3006 = vmatmul.mubr.f32.gmra.mxu0 %v4999_v47  ;;  %v1909_v47 = vsub.f32 %v4314_v21, %v4896_v23 }
 0x113   :  { %3068 = vmatmul.mubr.f32.gmra.mxu1 %v5004_v4  ;;  %3008 = vmatprep.mubr.f32.mxu0 %v5001_v56  ;;  %v1748_v56 = vld [vmem:[%s4836_s4 + $0x40] sm:$0xff] }
 0x114   :  { %3070 = vmatprep.mubr.f32.mxu1 %v5005_v5 }
 0x116   :  { %3009 = vmatmul.mubr.f32.gmra.mxu0 %v5002_v60 }
 0x117   :  { %3071 = vmatmul.mubr.f32.gmra.mxu1 %v5006_v14  ;;  %3011 = vmatprep.mubr.f32.mxu0 %v5003_v61 }
 0x118   :  { %3073 = vmatprep.mubr.f32.mxu1 %v5007_v15 }
 0x11a   :  { %3012 = vmatmul.mubr.f32.gmra.mxu0 %v5004_v4  ;;  %v4894_v4 = vand.u32 4294901760, %v4339_v36 }
 0x11b   :  { %3074 = vmatmul.mubr.f32.gmra.mxu1 %v5008_v27  ;;  %3014 = vmatprep.mubr.f32.mxu0 %v5005_v5  ;;  %v4357_v5 = vsub.f32 %v1749_v31, %v4341_v37  ;;  %v1743_v31 = vld [vmem:[%s4836_s4 + $0x18] sm:$0xff] }
 0x11c   :  { %3076 = vmatprep.mubr.f32.mxu1 %v5009_v28 }
 0x11d   :  { %5024 = vst [vmem:[#allocation17_spill] sm:$0xff] %v4357_v5 }
 0x11e   :  { %3015 = vmatmul.mubr.f32.gmra.mxu0 %v5006_v14  ;;  %v4359_v14 = vand.u32 4294901760, %v1748_v56 }
 0x11f   :  { %3077 = vmatmul.mubr.f32.gmra.mxu1 %v5010_v42  ;;  %3017 = vmatprep.mubr.f32.mxu0 %v5007_v15 }
 0x120   :  { %3079 = vmatprep.mubr.f32.mxu1 %v4099_v49  ;;  %5025 = vst [vmem:[#allocation20_spill] sm:$0xff] %v4359_v14 }
 0x122   :  { %3018 = vmatmul.mubr.f32.gmra.mxu0 %v5008_v27  ;;  %v1910_v27 = vand.u32 4294901760, %v1909_v47 }
 0x123   :  { %3080 = vmatmul.mubr.f32.gmra.mxu1 %v4097_v35  ;;  %3020 = vmatprep.mubr.f32.mxu0 %v5009_v28  ;;  %v1916_v28 = vsub.f32 %v4331_v30, %v4895_v55 }
 0x124   :  { %3149 = vmatprep.mubr.msk.f32.mxu1 %vm3325_vm3, %v4900_v10 }
 0x126   :  { %3021 = vmatmul.mubr.f32.gmra.mxu0 %v5010_v42  ;;  %v1747_v42 = vld [vmem:[%s4836_s4 + $0x38] sm:$0xff] }
 0x127   :  { %3023 = vmatprep.mubr.f32.mxu0 %v4099_v49  ;;  %v4291_v49 = vand.u32 4294901760, %v1753_v8 }
 0x129   :  { %5015 = vst [vmem:[#allocation9_spill] sm:$0xff] %v4291_v49  ;;  %v4301_v0 = vsub.f32 %v1753_v8, %v4291_v49 }
 0x12a   :  { %3024 = vmatmul.mubr.f32.gmra.mxu0 %v4097_v35  ;;  %v1755_v35 = vld [vmem:[%s4836_s4 + $0x78] sm:$0xff] }
 0x12b   :  { %v4270_v25 = vand.u32 4294901760, %v1755_v35  ;;  %5016 = vst [vmem:[#allocation7_spill] sm:$0xff] %v4301_v0  ;;  %v4897_v48 = vand.u32 4294901760, %v4301_v0  ;;  %3114 = vmatprep.mubr.msk.f32.mxu0 %vm3325_vm3, %v4900_v10 }
 0x12d   :  { %5011 = vst [vmem:[#allocation8_spill] sm:$0xff] %v4270_v25  ;;  %v4278_v52 = vsub.f32 %v1755_v35, %v4270_v25  ;;  %v1902_v18 = vsub.f32 %v4301_v0, %v4897_v48  ;;  %3083 = vmatpush3.msra.mxu0 %v4270_v25 }
 0x12e   :  { %3084 = vmatprep.subr.mxu0 %v4900_v10 }
 0x12f   :  { %5012 = vst [vmem:[#allocation5_spill] sm:$0xff] %v4278_v52  ;;  %v4899_v63 = vand.u32 4294901760, %v4278_v52  ;;  %v1903_v33 = vand.u32 4294901760, %v1902_v18  ;;  %3085 = vmatpush3.msra.mxu0 %v4280_v20 }
 0x130   :  { %3086 = vmatprep.subr.mxu0 %v4900_v10 }
 0x131   :  { %v1888_v7 = vsub.f32 %v4278_v52, %v4899_v63  ;;  %3087 = vmatpush3.msra.mxu0 %v4291_v49 }
 0x132   :  { %3088 = vmatprep.subr.mxu0 %v4900_v10 }
 0x133   :  { %v1889_v16 = vand.u32 4294901760, %v1888_v7  ;;  %3089 = vmatpush3.msra.mxu0 %v4303_v44  ;;  %v2449_v44 = vld [vmem:[%s4833_s1] ss:$0 sm:$0xff] }
 0x134   :  { %3090 = vmatprep.subr.mxu0 %v4900_v10 }
 0x135   :  { %3118 = vmatpush3.msra.mxu1 %v1889_v16  ;;  %3091 = vmatpush3.msra.mxu0 %v4317_v45 }
 0x136   :  { %3119 = vmatprep.subr.mxu1 %v4900_v10  ;;  %3092 = vmatprep.subr.mxu0 %v4900_v10 }
 0x137   :  { %3120 = vmatpush3.msra.mxu1 %v1896_v17  ;;  %3093 = vmatpush3.msra.mxu0 %v4326_v19  ;;  %v4423_v17 = vand.u32 4294901760, %v1744_v53 }
 0x138   :  { %3121 = vmatprep.subr.mxu1 %v4900_v10  ;;  %3094 = vmatprep.subr.mxu0 %v4900_v10 }
 0x139   :  { %3122 = vmatpush3.msra.mxu1 %v1903_v33  ;;  %3095 = vmatpush3.msra.mxu0 %v4341_v37  ;;  %5033 = vst [vmem:[#allocation27_spill] sm:$0xff] %v4423_v17 }
 0x13a   :  { %3123 = vmatprep.subr.mxu1 %v4900_v10  ;;  %3096 = vmatprep.subr.mxu0 %v4900_v10 }
 0x13b   :  { %3124 = vmatpush3.msra.mxu1 %v1910_v27  ;;  %3097 = vmatpush3.msra.mxu0 %v4359_v14 }
 0x13c   :  { %3125 = vmatprep.subr.mxu1 %v4900_v10  ;;  %3098 = vmatprep.subr.mxu0 %v4900_v10 }
 0x142   :  { %v2836_v43 = vpop.f32.mrf.mxu1 }
 0x144   :  { %v735_v1 = vpop.f32.mrf.mxu1 }
 0x14a   :  { %v2780_v57 = vpop.f32.mrf.mxu0 }
 0x14b   :  { %v4259_v59 = vadd.f32 %v2836_v43, %v2780_v57  ;;  %v1923_v43 = vsub.f32 %v4339_v36, %v4894_v4  ;;  %v4893_v57 = vand.u32 4294901760, %v4357_v5 }
 0x14c   :  { %v434_v3 = vpop.f32.mrf.mxu0 }
 0x14d   :  { %v4261_v6 = vadd.f32 %v735_v1, %v434_v3  ;;  %v4377_v1 = vsub.f32 %v1748_v56, %v4359_v14  ;;  %v4379_v3 = vand.u32 4294901760, %v1747_v42  ;;  %v4434_v56 = vsub.f32 %v1744_v53, %v4423_v17 }
 0x14e   :  { %v2839_v9 = vpop.f32.mrf.mxu1 }
 0x14f   :  { %5026 = vst [vmem:[#allocation19_spill] sm:$0xff] %v4377_v1  ;;  %5027 = vst [vmem:[#allocation21_spill] sm:$0xff] %v4379_v3  ;;  %v4392_v35 = vsub.f32 %v1747_v42, %v4379_v3  ;;  %3099 = vmatpush3.msra.mxu0 %v4379_v3 }
 0x150   :  { %v747_v12 = vpop.f32.mrf.mxu1  ;;  %5034 = vst [vmem:[#allocation28_spill] sm:$0xff] %v4434_v56  ;;  %3100 = vmatprep.subr.mxu0 %v4900_v10 }
 0x151   :  { %5028 = vst [vmem:[#allocation22_spill] sm:$0xff] %v4392_v35  ;;  %v4891_v8 = vand.u32 4294901760, %v4392_v35 }
 0x153   :  { %v1944_v34 = vsub.f32 %v4392_v35, %v4891_v8 }
 0x155   :  { %v1945_v33 = vand.u32 4294901760, %v1944_v34 }
 0x156   :  { %v2783_v11 = vpop.f32.mrf.mxu0 }
 0x157   :  { %v4263_v39 = vadd.f32 %v2839_v9, %v2783_v11  ;;  %v1917_v9 = vand.u32 4294901760, %v1916_v28  ;;  %v1746_v11 = vld [vmem:[%s4836_s4 + $0x30] sm:$0xff] }
 0x158   :  { %v454_v24 = vpop.f32.mrf.mxu0  ;;  %v1742_v28 = vld [vmem:[%s4836_s4 + $0x10] sm:$0xff] }
 0x159   :  { %v4265_v22 = vadd.f32 %v747_v12, %v454_v24  ;;  %v1924_v12 = vand.u32 4294901760, %v1923_v43  ;;  %v1930_v24 = vsub.f32 %v4357_v5, %v4893_v57  ;;  %3126 = vmatpush3.msra.mxu1 %v1917_v9 }
 0x15a   :  { %v2842_v50 = vpop.f32.mrf.mxu1  ;;  %3127 = vmatprep.subr.mxu1 %v4900_v10 }
 0x15b   :  { %3128 = vmatpush3.msra.mxu1 %v1924_v12 }
 0x15c   :  { %v759_v62 = vpop.f32.mrf.mxu1  ;;  %3129 = vmatprep.subr.mxu1 %v4900_v10 }
 0x162   :  { %v2786_v38 = vpop.f32.mrf.mxu0 }
 0x163   :  { %v4272_v40 = vadd.f32 %v2842_v50, %v2786_v38  ;;  %v4892_v50 = vand.u32 4294901760, %v4377_v1  ;;  %v4395_v38 = vand.u32 4294901760, %v1746_v11 }
 0x164   :  { %v474_v51 = vpop.f32.mrf.mxu0 }
 0x165   :  { %v4282_v54 = vadd.f32 %v759_v62, %v474_v51  ;;  %5029 = vst [vmem:[#allocation23_spill] sm:$0xff] %v4395_v38  ;;  %v1931_v62 = vand.u32 4294901760, %v1930_v24  ;;  %v1937_v51 = vsub.f32 %v4377_v1, %v4892_v50  ;;  %v4409_v7 = vsub.f32 %v1746_v11, %v4395_v38  ;;  %3101 = vmatpush3.msra.mxu0 %v4395_v38 }
 0x166   :  { %v2845_v13 = vpop.f32.mrf.mxu1  ;;  %v4888_v11 = vand.u32 4294901760, %v4434_v56  ;;  %v4456_v24 = vand.u32 4294901760, %v1742_v28  ;;  %3102 = vmatprep.subr.mxu0 %v4900_v10  ;;  %v1633_v38 = vlaneseq }
 0x167   :  { %5031 = vst [vmem:[#allocation25_spill] sm:$0xff] %v4409_v7  ;;  %v1938_v29 = vand.u32 4294901760, %v1937_v51  ;;  %3130 = vmatpush3.msra.mxu1 %v1931_v62  ;;  %v4890_v18 = vand.u32 4294901760, %v4409_v7  ;;  %v1741_v51 = vld [vmem:[%s4836_s4 + $0x8] sm:$0xff]  ;;  %3103 = vmatpush3.msra.mxu0 %v4406_v41 }
 0x168   :  { %v771_v60 = vpop.f32.mrf.mxu1  ;;  %3131 = vmatprep.subr.mxu1 %v4900_v10  ;;  %5037 = vst [vmem:[#allocation31_spill] sm:$0xff] %v4456_v24  ;;  %v4471_v34 = vsub.f32 %v1742_v28, %v4456_v24  ;;  %3104 = vmatprep.subr.mxu0 %v4900_v10  ;;  %v1634_v30 = vshrl.u32 %v1633_v38, 7 }
 0x169   :  { %3132 = vmatpush3.msra.mxu1 %v1938_v29  ;;  %v1951_v27 = vsub.f32 %v4409_v7, %v4890_v18  ;;  %3105 = vmatpush3.msra.mxu0 %v4423_v17 }
 0x16a   :  { %3133 = vmatprep.subr.mxu1 %v4900_v10  ;;  %5038 = vst [vmem:[#allocation32_spill] sm:$0xff] %v4471_v34  ;;  %3106 = vmatprep.subr.mxu0 %v4900_v10  ;;  %v1635_v26 = vadd.s32 8, %v1634_v30  ;;  %vm1641_vm5 = vcmp.lt.s32.totalorder %v1634_v30, %v2449_v44 }
 0x16b   :  { %3134 = vmatpush3.msra.mxu1 %v1945_v33  ;;  %v1952_v62 = vand.u32 4294901760, %v1951_v27 }
 0x16c   :  { %3135 = vmatprep.subr.mxu1 %v4900_v10  ;;  %vm1642_vm4 = vcmp.lt.s32.totalorder %v1635_v26, %v2449_v44 }
 0x16d   :  { %3136 = vmatpush3.msra.mxu1 %v1952_v62 }
 0x16e   :  { %v2789_v32 = vpop.f32.mrf.mxu0  ;;  %3137 = vmatprep.subr.mxu1 %v4900_v10 }
 0x16f   :  { %v4343_v46 = vadd.f32 %v2845_v13, %v2789_v32  ;;  %v4421_v13 = vsub.f32 %v1745_v58, %v4406_v41 }
 0x170   :  { %v494_v61 = vpop.f32.mrf.mxu0 }
 0x171   :  { %v4361_v15 = vadd.f32 %v771_v60, %v494_v61  ;;  %5032 = vst [vmem:[#allocation26_spill] sm:$0xff] %v4421_v13  ;;  %v4889_v47 = vand.u32 4294901760, %v4421_v13  ;;  %v4436_v60 = vand.u32 4294901760, %v1743_v31 }
 0x172   :  { %v2848_v16 = vpop.f32.mrf.mxu1 }
 0x173   :  { %5035 = vst [vmem:[#allocation29_spill] sm:$0xff] %v4436_v60  ;;  %v1958_v9 = vsub.f32 %v4421_v13, %v4889_v47  ;;  %v4454_v12 = vsub.f32 %v1743_v31, %v4436_v60  ;;  %v4474_v31 = vand.u32 4294901760, %v1741_v51  ;;  %3107 = vmatpush3.msra.mxu0 %v4436_v60 }
 0x174   :  { %v783_v42 = vpop.f32.mrf.mxu1  ;;  %3108 = vmatprep.subr.mxu0 %v4900_v10 }
 0x175   :  { %5036 = vst [vmem:[#allocation30_spill] sm:$0xff] %v4454_v12  ;;  %v1959_v53 = vand.u32 4294901760, %v1958_v9  ;;  %v4884_v29 = vand.u32 4294901760, %v4454_v12  ;;  %5039 = vst [vmem:[#allocation33_spill] sm:$0xff] %v4474_v31  ;;  %3109 = vmatpush3.msra.mxu0 %v4456_v24 }
 0x176   :  { %3110 = vmatprep.subr.mxu0 %v4900_v10 }
 0x177   :  { %v1972_v27 = vsub.f32 %v4454_v12, %v4884_v29  ;;  %3138 = vmatpush3.msra.mxu1 %v1959_v53  ;;  %3111 = vmatpush3.msra.mxu0 %v4474_v31 }
 0x178   :  { %3139 = vmatprep.subr.mxu1 %v4900_v10  ;;  %3112 = vmatprep.subr.mxu0 %v4900_v10 }
 0x179   :  { %v1973_v9 = vand.u32 4294901760, %v1972_v27 }
 0x17a   :  { %v2792_v32 = vpop.f32.mrf.mxu0 }
 0x17b   :  { %v4438_v61 = vadd.f32 %v2848_v16, %v2792_v32  ;;  %v1965_v16 = vsub.f32 %v4434_v56, %v4888_v11  ;;  %v1740_v32 = vld [vmem:[%s4836_s4] sm:$0xff] }
 0x17c   :  { %v514_v43 = vpop.f32.mrf.mxu0  ;;  %v4485_v28 = vand.u32 4294901760, %v1740_v32 }
 0x17d   :  { %v4458_v58 = vadd.f32 %v783_v42, %v514_v43  ;;  %v1966_v33 = vand.u32 4294901760, %v1965_v16  ;;  %v4885_v42 = vand.u32 4294901760, %v4471_v34  ;;  %v4488_v43 = vsub.f32 %v1741_v51, %v4474_v31 }
 0x17e   :  { %5040 = vst [vmem:[#allocation34_spill] sm:$0xff] %v4485_v28  ;;  %v4497_v16 = vsub.f32 %v1740_v32, %v4485_v28  ;;  %v2851_v32 = vpop.f32.mrf.mxu1  ;;  %3113 = vmatpush3.msra.mxu0 %v4485_v28 }
 0x17f   :  { %5041 = vst [vmem:[#allocation35_spill] sm:$0xff] %v4488_v43  ;;  %v1979_v62 = vsub.f32 %v4471_v34, %v4885_v42  ;;  %3140 = vmatpush3.msra.mxu1 %v1966_v33  ;;  %v4886_v53 = vand.u32 4294901760, %v4488_v43  ;;  %3152 = vmatprep.subr.mxu0 %v4900_v10 }
 0x180   :  { %5042 = vst [vmem:[#allocation36_spill] sm:$0xff] %v4497_v16  ;;  %3141 = vmatprep.subr.mxu1 %v4900_v10  ;;  %v4887_v29 = vand.u32 4294901760, %v4497_v16 }
 0x181   :  { %v1980_v51 = vand.u32 4294901760, %v1979_v62  ;;  %3142 = vmatpush3.msra.mxu1 %v1973_v9  ;;  %v1986_v27 = vsub.f32 %v4488_v43, %v4886_v53 }
 0x182   :  { %3143 = vmatprep.subr.mxu1 %v4900_v10  ;;  %v1993_v42 = vsub.f32 %v4497_v16, %v4887_v29 }
 0x183   :  { %3144 = vmatpush3.msra.mxu1 %v1980_v51  ;;  %v1987_v9 = vand.u32 4294901760, %v1986_v27 }
 0x184   :  { %3145 = vmatprep.subr.mxu1 %v4900_v10  ;;  %v1994_v53 = vand.u32 4294901760, %v1993_v42  ;;  %v4527_v42 = vpop.f32.mrf.mxu1 }
 0x185   :  { %3146 = vmatpush3.msra.mxu1 %v1987_v9 }
 0x186   :  { %v2795_v33 = vpop.f32.mrf.mxu0  ;;  %3147 = vmatprep.subr.mxu1 %v4900_v10 }
 0x187   :  { %v4513_v62 = vadd.f32 %v2851_v32, %v2795_v33  ;;  %3148 = vmatpush3.msra.mxu1 %v1994_v53 }
 0x188   :  { %3187 = vmatprep.subr.mxu1 %v4900_v10  ;;  %v4533_v32 = vpop.f32.mrf.mxu0 }
 0x18a   :  { %v4529_v51 = vpop.f32.mrf.mxu1 }
 0x18c   :  { %v4531_v27 = vpop.f32.mrf.mxu1 }
 0x192   :  { %v4537_v53 = vpop.f32.mrf.mxu0 }
 0x194   :  { %v4541_v11 = vpop.f32.mrf.mxu0 }
 0x196   :  { %v4535_v33 = vpop.f32.mrf.mxu1 }
 0x198   :  { %v4539_v9 = vpop.f32.mrf.mxu1 }
 0x19a   :  { %v2948_v29 = vpop.f32.mrf.mxu1 }
 0x19c   :  { %v1123_v47 = vpop.f32.mrf.mxu1 }
 0x19e   :  { %v4543_v18 = vpop.f32.mrf.mxu0  ;;  %v2951_v8 = vpop.f32.mrf.mxu1 }
 0x1a0   :  { %v4545_v50 = vpop.f32.mrf.mxu0  ;;  %v1139_v57 = vpop.f32.mrf.mxu1 }
 0x1a2   :  { %v2892_v4 = vpop.f32.mrf.mxu0 }
 0x1a3   :  { %v4547_v55 = vpop.f32.mrf.mxu1  ;;  %v937_v37 = vadd.f32 %v2892_v4, %v4259_v59 }
 0x1a4   :  { %v929_v23 = vpop.f32.mrf.mxu0 }
 0x1a5   :  { %v4549_v48 = vpop.f32.mrf.mxu1  ;;  %v930_v45 = vadd.f32 %v929_v23, %v4261_v6  ;;  %v1132_v25 = vadd.f32 %v2948_v29, %v937_v37 }
 0x1a8   :  { %v2895_v2 = vpop.f32.mrf.mxu0 }
 0x1a9   :  { %v4551_v63 = vpop.f32.mrf.mxu1  ;;  %v951_v38 = vadd.f32 %v2895_v2, %v4263_v39  ;;  %v3326_v39 = vmov -1e+30  }
 0x1aa   :  { %v943_v10 = vpop.f32.mrf.mxu0  ;;  %v4596_v2 = vsel %vm1642_vm4, 0.0, %v3326_v39  ;;  %v4598_v37 = vsel %vm1641_vm5, 0.0, %v3326_v39 }
 0x1ab   :  { %v4553_v16 = vpop.f32.mrf.mxu1  ;;  %v944_v59 = vadd.f32 %v943_v10, %v4265_v22 }
 0x1ae   :  { %v2898_v43 = vpop.f32.mrf.mxu0 }
 0x1af   :  { %v4555_v34 = vpop.f32.mrf.mxu1  ;;  %v965_v6 = vadd.f32 %v2898_v43, %v4272_v40  ;;  %v796_v40 = vadd.f32 %v4527_v42, %v4533_v32 }
 0x1b0   :  { %v957_v12 = vpop.f32.mrf.mxu0 }
 0x1b1   :  { %v4557_v28 = vpop.f32.mrf.mxu1  ;;  %v1164_v30 = vadd.f32 %v4547_v55, %v965_v6 }
 0x1b4   :  { %v2901_v56 = vpop.f32.mrf.mxu0 }
 0x1b5   :  { %v4559_v31 = vpop.f32.mrf.mxu1 }
 0x1b6   :  { %v971_v13 = vpop.f32.mrf.mxu0 }
 0x1b7   :  { %v4561_v24 = vpop.f32.mrf.mxu1  ;;  %v972_v55 = vadd.f32 %v971_v13, %v4361_v15  ;;  %v820_v13 = vadd.f32 %v4539_v9, %v4545_v50 }
 0x1b8   :  { %5043 = vst [vmem:[#allocation37_spill] sm:$0xff] %v4561_v24  ;;  %v1148_v24 = vadd.f32 %v2951_v8, %v951_v38 }
 0x1ba   :  { %v4563_v7 = vpop.f32.mrf.mxu0 }
 0x1bb   :  { %v4565_v60 = vpop.f32.mrf.mxu1  ;;  %v993_v42 = vadd.f32 %v4563_v7, %v4438_v61 }
 0x1bc   :  { %5044 = vst [vmem:[#allocation38_spill] sm:$0xff] %v4565_v60  ;;  %v4567_v35 = vpop.f32.mrf.mxu0 }
 0x1bd   :  { %v4569_v17 = vpop.f32.mrf.mxu1  ;;  %v1196_v50 = vadd.f32 %v4555_v34, %v993_v42 }
 0x1be   :  { %5045 = vst [vmem:[#allocation39_spill] sm:$0xff] %v4569_v17  ;;  %v1124_v17 = vadd.f32 %v1123_v47, %v930_v45  ;;  %v1140_v45 = vadd.f32 %v1139_v57, %v944_v59  ;;  %v814_v47 = vadd.f32 %v4529_v51, %v4537_v53  ;;  %v1172_v53 = vadd.f32 %v4553_v16, %v972_v55 }
 0x1bf   :  { %v5051_v16 = vld [vmem:[#allocation37_spill] sm:$0xff] }
 0x1c0   :  { %v4571_v1 = vpop.f32.mrf.mxu0 }
 0x1c1   :  { %v4573_v41 = vpop.f32.mrf.mxu1 }
 0x1c2   :  { %5046 = vst [vmem:[#allocation40_spill] sm:$0xff] %v4573_v41  ;;  %v4575_v5 = vpop.f32.mrf.mxu0 }
 0x1c3   :  { %v4577_v36 = vpop.f32.mrf.mxu1  ;;  %v1000_v7 = vadd.f32 %v4575_v5, %v796_v40  ;;  %v5055_v55 = vld [vmem:[#allocation38_spill] sm:$0xff] }
 0x1c4   :  { %5047 = vst [vmem:[#allocation41_spill] sm:$0xff] %v4577_v36 }
 0x1c5   :  { %v1204_v39 = vadd.f32 %v5051_v16, %v1000_v7 }
 0x1c6   :  { %v4579_v3 = vpop.f32.mrf.mxu0 }
 0x1c7   :  { %v3060_v14 = vpop.f32.mrf.mxu1 }
 0x1c8   :  { %v4581_v21 = vpop.f32.mrf.mxu0 }
 0x1c9   :  { %5048 = vst [vmem:[#allocation42_spill] sm:$0xff] %v4581_v21  ;;  %v1539_v0 = vpop.f32.mrf.mxu1 }
 0x1ca   :  { %v4584_v19 = vpop.f32.mrf.mxu0 }
 0x1cb   :  { %5049 = vst [vmem:[#allocation43_spill] sm:$0xff] %v4584_v19  ;;  %v3063_v52 = vpop.f32.mrf.mxu1 }
 0x1cc   :  { %v4590_v49 = vpop.f32.mrf.mxu0 }
 0x1cd   :  { %5050 = vst [vmem:[#allocation44_spill] sm:$0xff] %v4590_v49  ;;  %v1551_v20 = vpop.f32.mrf.mxu1  ;;  %v958_v49 = vadd.f32 %v957_v12, %v4282_v54 }
 0x1ce   :  { %v3004_v36 = vpop.f32.mrf.mxu0 }
 0x1cf   :  { %v1369_v4 = vadd.f32 %v3004_v36, %v1132_v25  ;;  %v3066_v41 = vpop.f32.mrf.mxu1  ;;  %v1156_v12 = vadd.f32 %v4549_v48, %v958_v49 }
 0x1d0   :  { %v1362_v23 = vpop.f32.mrf.mxu0  ;;  %v5052_v40 = vld [vmem:[#allocation42_spill] sm:$0xff] }
 0x1d1   :  { %v1546_v60 = vadd.f32 %v3060_v14, %v1369_v4  ;;  %v1363_v19 = vadd.f32 %v1362_v23, %v1124_v17  ;;  %v1563_v21 = vpop.f32.mrf.mxu1  ;;  %v1021_v4 = vadd.f32 %v4579_v3, %v814_v47 }
 0x1d2   :  { %v3007_v26 = vpop.f32.mrf.mxu0 }
 0x1d3   :  { %v1540_v22 = vadd.f32 %v1539_v0, %v1363_v19  ;;  %v1381_v25 = vadd.f32 %v3007_v26, %v1148_v24  ;;  %v3069_v10 = vpop.f32.mrf.mxu1  ;;  %v1646_v36 = vadd.f32 %v4596_v2, %v1546_v60  ;;  %v808_v0 = vadd.f32 %v4531_v27, %v4541_v11 }
 0x1d4   :  { %v1374_v44 = vpop.f32.mrf.mxu0  ;;  %v979_v19 = vadd.f32 %v2901_v56, %v4343_v46  ;;  %v986_v11 = vadd.f32 %v4567_v35, %v4458_v58  ;;  %v5054_v47 = vld [vmem:[#allocation44_spill] sm:$0xff] }
 0x1d5   :  { %v1645_v54 = vadd.f32 %v4598_v37, %v1540_v22  ;;  %v1558_v14 = vadd.f32 %v3063_v52, %v1381_v25  ;;  %v1375_v8 = vadd.f32 %v1374_v44, %v1140_v45  ;;  %v1575_v17 = vpop.f32.mrf.mxu1  ;;  %v826_v52 = vadd.f32 %v4535_v33, %v4543_v18  ;;  %v5053_v44 = vld [vmem:[#allocation43_spill] sm:$0xff] }
 0x1d6   :  { %v3010_v57 = vpop.f32.mrf.mxu0  ;;  %v1007_v18 = vadd.f32 %v4571_v1, %v4513_v62  ;;  %v1180_v61 = vadd.f32 %v4551_v63, %v979_v19  ;;  %v1188_v9 = vadd.f32 %v4557_v28, %v986_v11  ;;  %v1014_v28 = vadd.f32 %v5052_v40, %v808_v0 }
 0x1d7   :  { %v1661_v24 = vmax.f32 %v1645_v54, %v1646_v36  ;;  %v1552_v60 = vadd.f32 %v1551_v20, %v1375_v8  ;;  %v1393_v29 = vadd.f32 %v3010_v57, %v1164_v30  ;;  %v3072_v43 = vpop.f32.mrf.mxu1  ;;  %v1648_v46 = vadd.f32 %v4596_v2, %v1558_v14 }
 0x1d8   :  { %v1386_v56 = vpop.f32.mrf.mxu0  ;;  %v1212_v23 = vadd.f32 %v4559_v31, %v1007_v18  ;;  %v1035_v30 = vadd.f32 %v5053_v44, %v826_v52  ;;  %v1028_v19 = vadd.f32 %v5054_v47, %v820_v13 }
 0x1d9   :  { %v1662_v51 = vrot.slane %v1661_v24, 4  ;;  %v1647_v49 = vadd.f32 %v4598_v37, %v1552_v60  ;;  %v1570_v48 = vadd.f32 %v3066_v41, %v1393_v29  ;;  %v1387_v15 = vadd.f32 %v1386_v56, %v1156_v12  ;;  %v1587_v20 = vpop.f32.mrf.mxu1 }
 0x1da   :  { %v3013_v35 = vpop.f32.mrf.mxu0 }
 0x1db   :  { %v1663_v58 = vmax.f32 %v1661_v24, %v1662_v51  ;;  %v1668_v27 = vmax.f32 %v1647_v49, %v1648_v46  ;;  %v1564_v32 = vadd.f32 %v1563_v21, %v1387_v15  ;;  %v3075_v33 = vpop.f32.mrf.mxu1  ;;  %v1650_v41 = vadd.f32 %v4596_v2, %v1570_v48  ;;  %v5056_v49 = vld [vmem:[#allocation39_spill] sm:$0xff]  ;;  %v5057_v15 = vld [vmem:[#allocation40_spill] sm:$0xff] }
 0x1dc   :  { %v1405_v38 = vadd.f32 %v3013_v35, %v1180_v61  ;;  %v1398_v59 = vpop.f32.mrf.mxu0  ;;  %v1228_v24 = vadd.f32 %v5055_v55, %v1021_v4  ;;  %v1220_v48 = vadd.f32 %v5056_v49, %v1014_v28  ;;  %v1244_v13 = vadd.f32 %v5057_v15, %v1035_v30 }
 0x1dd   :  { %v1664_v1 = vrot.slane %v1663_v58, 2  ;;  %v1669_v62 = vrot.slane %v1668_v27, 4  ;;  %v1649_v5 = vadd.f32 %v4598_v37, %v1564_v32  ;;  %v1399_v63 = vadd.f32 %v1398_v59, %v1172_v53  ;;  %v1599_v34 = vpop.f32.mrf.mxu1 }
 0x1de   :  { %v1582_v6 = vadd.f32 %v3069_v10, %v1405_v38  ;;  %v3016_v21 = vpop.f32.mrf.mxu0 }
 0x1df   :  { %v1665_v26 = vmax.f32 %v1663_v58, %v1664_v1  ;;  %v1670_v22 = vmax.f32 %v1668_v27, %v1669_v62  ;;  %v1675_v25 = vmax.f32 %v1649_v5, %v1650_v41  ;;  %v1576_v45 = vadd.f32 %v1575_v17, %v1399_v63  ;;  %v4642_v17 = vld [vmem:[%s4835_s3] ss:$0 sm:$0xff]  ;;  %v3078_v11 = vpop.f32.mrf.mxu1 }
 0x1e0   :  { %v1652_v36 = vadd.f32 %v4596_v2, %v1582_v6  ;;  %v1417_v54 = vadd.f32 %v3016_v21, %v1196_v50  ;;  %v1410_v14 = vpop.f32.mrf.mxu0  ;;  %v5058_v50 = vld [vmem:[#allocation41_spill] sm:$0xff] }
 0x1e1   :  { %v1666_v3 = vrot.slane %v1665_v26, 1  ;;  %v1671_v10 = vrot.slane %v1670_v22, 2  ;;  %v1676_v8 = vrot.slane %v1675_v25, 4  ;;  %v1651_v31 = vadd.f32 %v4598_v37, %v1576_v45  ;;  %v1611_v59 = vpop.f32.mrf.mxu1 }
 0x1e2   :  { %v1594_v57 = vadd.f32 %v3072_v43, %v1417_v54  ;;  %v1411_v0 = vadd.f32 %v1410_v14, %v1188_v9  ;;  %v3019_v12 = vpop.f32.mrf.mxu0  ;;  %v1236_v9 = vadd.f32 %v5058_v50, %v1028_v19 }
 0x1e3   :  { %v1667_v60 = vmax.f32 %v1665_v26, %v1666_v3  ;;  %v1672_v29 = vmax.f32 %v1670_v22, %v1671_v10  ;;  %v1677_v52 = vmax.f32 %v1675_v25, %v1676_v8  ;;  %v1682_v42 = vmax.f32 %v1651_v31, %v1652_v36  ;;  %v3081_v44 = vpop.f32.mrf.mxu1 }
 0x1e4   :  { %v1588_v46 = vadd.f32 %v1587_v20, %v1411_v0  ;;  %v1429_v56 = vadd.f32 %v3019_v12, %v1212_v23  ;;  %v1422_v51 = vpop.f32.mrf.mxu0  ;;  %v1654_v35 = vadd.f32 %v4596_v2, %v1594_v57 }
 0x1e5   :  { %v1724_v18 = vadd.f32 %v4642_v17, %v1667_v60  ;;  %v1673_v43 = vrot.slane %v1672_v29, 1  ;;  %v1678_v7 = vrot.slane %v1677_v52, 2  ;;  %v1683_v61 = vrot.slane %v1682_v42, 4 }
 0x1e6   :  { %v1653_v58 = vadd.f32 %v4598_v37, %v1588_v46  ;;  %v1606_v27 = vadd.f32 %v3075_v33, %v1429_v56  ;;  %v1423_v32 = vadd.f32 %v1422_v51, %v1204_v39  ;;  %v3022_v53 = vpop.f32.mrf.mxu0 }
 0x1e7   :  { %v1674_v41 = vmax.f32 %v1672_v29, %v1673_v43  ;;  %v1679_v20 = vmax.f32 %v1677_v52, %v1678_v7  ;;  %v1684_v38 = vmax.f32 %v1682_v42, %v1683_v61  ;;  %v1732_v1 = vmax.f32 %v1724_v18, 0.0  ;;  %v1623_v29 = vpop.f32.mrf.mxu1 }
 0x1e8   :  { %v1689_v62 = vmax.f32 %v1653_v58, %v1654_v35  ;;  %v1600_v5 = vadd.f32 %v1599_v34, %v1423_v32  ;;  %v1441_v63 = vadd.f32 %v3022_v53, %v1228_v24  ;;  %v1434_v4 = vpop.f32.mrf.mxu0  ;;  %v1656_v33 = vadd.f32 %v4596_v2, %v1606_v27 }
 0x1e9   :  { %v1725_v6 = vadd.f32 %v4642_v17, %v1674_v41  ;;  %v1680_v21 = vrot.slane %v1679_v20, 1  ;;  %v1685_v23 = vrot.slane %v1684_v38, 2  ;;  %v1435_v16 = vadd.f32 %v1434_v4, %v1220_v48 }
 0x1ea   :  { %v1690_v26 = vrot.slane %v1689_v62, 4  ;;  %v1655_v39 = vadd.f32 %v4598_v37, %v1600_v5  ;;  %v1618_v22 = vadd.f32 %v3078_v11, %v1441_v63  ;;  %v3025_v25 = vpop.f32.mrf.mxu0 }
 0x1eb   :  { %v1733_v45 = vmax.f32 %v1725_v6, 0.0  ;;  %v1681_v40 = vmax.f32 %v1679_v20, %v1680_v21  ;;  %v1686_v28 = vmax.f32 %v1684_v38, %v1685_v23  ;;  %v1612_v30 = vadd.f32 %v1611_v59, %v1435_v16 }
 0x1ec   :  { %v1691_v34 = vmax.f32 %v1689_v62, %v1690_v26  ;;  %v1696_v36 = vmax.f32 %v1655_v39, %v1656_v33  ;;  %v1658_v54 = vadd.f32 %v4596_v2, %v1618_v22  ;;  %v1453_v14 = vadd.f32 %v3025_v25, %v1244_v13  ;;  %v1446_v3 = vpop.f32.mrf.mxu0 }
 0x1ed   :  { %v1771_v10 = vrot.slane %v1733_v45, 7  ;;  %v1726_v8 = vadd.f32 %v4642_v17, %v1681_v40  ;;  %v1687_v31 = vrot.slane %v1686_v28, 1  ;;  %v1657_v47 = vadd.f32 %v4598_v37, %v1612_v30 }
 0x1ee   :  { %v1692_v19 = vrot.slane %v1691_v34, 2  ;;  %v1697_v57 = vrot.slane %v1696_v36, 4  ;;  %v1630_v0 = vadd.f32 %v3081_v44, %v1453_v14  ;;  %v1447_v12 = vadd.f32 %v1446_v3, %v1236_v9  ;;  %v5059_v14 = vld [vmem:[#allocation8_spill] sm:$0xff] }
 0x1ef   :  { %v1773_v55 = vsel %vm1772_vm6, %v1771_v10, %v1732_v1  ;;  %v1734_v24 = vmax.f32 %v1726_v8, 0.0  ;;  %v1688_v60 = vmax.f32 %v1686_v28, %v1687_v31  ;;  %v1703_v52 = vmax.f32 %v1657_v47, %v1658_v54  ;;  %v5061_v10 = vld [vmem:[#allocation10_spill] sm:$0xff]  ;;  %v5062_v31 = vld [vmem:[#allocation9_spill] sm:$0xff] }
 0x1f0   :  { %v1693_v42 = vmax.f32 %v1691_v34, %v1692_v19  ;;  %v1698_v11 = vmax.f32 %v1696_v36, %v1697_v57  ;;  %v1624_v46 = vadd.f32 %v1623_v29, %v1447_v12  ;;  %v1660_v13 = vadd.f32 %v4596_v2, %v1630_v0  ;;  %v5063_v19 = vld [vmem:[#allocation12_spill] sm:$0xff]  ;;  %v5064_v57 = vld [vmem:[#allocation5_spill] sm:$0xff]  ;;  %v5065_v0 = vld [vmem:[#allocation14_spill] sm:$0xff] }
 0x1f1   :  { %v1774_v56 = vrot.slane %v1734_v24, 6  ;;  %v1727_v51 = vadd.f32 %v4642_v17, %v1688_v60  ;;  %v1704_v49 = vrot.slane %v1703_v52, 4  ;;  %v5060_v3 = vmov 0.0   ;;  %v5066_v12 = vld [vmem:[#allocation6_spill] sm:$0xff]  ;;  %v5068_v24 = vld [vmem:[#allocation7_spill] sm:$0xff] }
 0x1f2   :  { %v1694_v48 = vrot.slane %v1693_v42, 1  ;;  %v1699_v15 = vrot.slane %v1698_v11, 2  ;;  %v1659_v18 = vadd.f32 %v4598_v37, %v1624_v46  ;;  %v5069_v60 = vld [vmem:[#allocation18_spill] sm:$0xff]  ;;  %v5070_v29 = vld [vmem:[#allocation11_spill] sm:$0xff] }
 0x1f3   :  { %v1776_v43 = vsel %vm1775_vm7, %v1774_v56, %v1773_v55  ;;  %v1735_v7 = vmax.f32 %v1727_v51, 0.0  ;;  %v1705_v61 = vmax.f32 %v1703_v52, %v1704_v49  ;;  %v5067_v55 = vld [vmem:[#allocation13_spill] sm:$0xff]  ;;  %v5071_v52 = vld [vmem:[#allocation20_spill] sm:$0xff]  ;;  %v5074_v46 = vld [vmem:[#allocation15_spill] sm:$0xff] }
 0x1f4   :  { %v1695_v35 = vmax.f32 %v1693_v42, %v1694_v48  ;;  %v1700_v58 = vmax.f32 %v1698_v11, %v1699_v15  ;;  %v1710_v27 = vmax.f32 %v1659_v18, %v1660_v13  ;;  %v5072_v42 = vld [vmem:[#allocation16_spill] sm:$0xff]  ;;  %v5073_v11 = vld [vmem:[#allocation21_spill] sm:$0xff]  ;;  %v5075_v56 = vld [vmem:[#allocation23_spill] sm:$0xff] }
 0x1f5   :  { %v1777_v32 = vrot.slane %v1735_v7, 5  ;;  %v1706_v53 = vrot.slane %v1705_v61, 2  ;;  %v5076_v51 = vld [vmem:[#allocation17_spill] sm:$0xff]  ;;  %v5077_v49 = vld [vmem:[#allocation24_spill] sm:$0xff]  ;;  %v5078_v48 = vld [vmem:[#allocation19_spill] sm:$0xff] }
 0x1f6   :  { %v1728_v41 = vadd.f32 %v4642_v17, %v1695_v35  ;;  %v1701_v20 = vrot.slane %v1700_v58, 1  ;;  %v1711_v38 = vrot.slane %v1710_v27, 4  ;;  %v5079_v15 = vld [vmem:[#allocation27_spill] sm:$0xff]  ;;  %v5080_v13 = vld [vmem:[#allocation22_spill] sm:$0xff]  ;;  %v5081_v18 = vld [vmem:[#allocation29_spill] sm:$0xff] }
 0x1f7   :  { %v1779_v59 = vsel %vm1778_vm8, %v1777_v32, %v1776_v43  ;;  %v1707_v50 = vmax.f32 %v1705_v61, %v1706_v53  ;;  %v5082_v43 = vld [vmem:[#allocation25_spill] sm:$0xff]  ;;  %v5083_v7 = vld [vmem:[#allocation31_spill] sm:$0xff]  ;;  %v5084_v61 = vld [vmem:[#allocation26_spill] sm:$0xff] }
 0x1f8   :  { %v1736_v9 = vmax.f32 %v1728_v41, 0.0  ;;  %v1702_v1 = vmax.f32 %v1700_v58, %v1701_v20  ;;  %v1712_v2 = vmax.f32 %v1710_v27, %v1711_v38  ;;  %v5085_v35 = vld [vmem:[#allocation33_spill] sm:$0xff]  ;;  %v5086_v58 = vld [vmem:[#allocation28_spill] sm:$0xff]  ;;  %v5087_v27 = vld [vmem:[#allocation34_spill] sm:$0xff]  ;;  %v5092_v38 = vand.u32 4294901760, %v5064_v57 }
 0x1f9   :  { %v1708_v62 = vrot.slane %v1707_v50, 1  ;;  %v5088_v32 = vld [vmem:[#allocation30_spill] sm:$0xff]  ;;  %v5089_v53 = vld [vmem:[#allocation32_spill] sm:$0xff]  ;;  %v5090_v41 = vld [vmem:[#allocation35_spill] sm:$0xff] }
 0x1fa   :  { %v1780_v37 = vrot.slane %v1736_v9, 4  ;;  %v1729_v5 = vadd.f32 %v4642_v17, %v1702_v1  ;;  %v1713_v63 = vrot.slane %v1712_v2, 2  ;;  %v5091_v20 = vld [vmem:[#allocation36_spill] sm:$0xff]  ;;  %v5095_v9 = vand.u32 4294901760, %v5070_v29 }
 0x1fb   :  { %v1709_v4 = vmax.f32 %v1707_v50, %v1708_v62  ;;  %v5094_v50 = vand.u32 4294901760, %v5068_v24  ;;  %v5096_v1 = vand.u32 4294901760, %v5072_v42  ;;  %v5098_v62 = vand.u32 4294901760, %v5076_v51 }
 0x1fc   :  { %v1737_v6 = vmax.f32 %v1729_v5, 0.0  ;;  %v1714_v21 = vmax.f32 %v1712_v2, %v1713_v63  ;;  %v1782_v23 = vsel %vm1781_vm9, %v1780_v37, %v1779_v59  ;;  %v5093_v59 = vand.u32 4294901760, %v5066_v12 }
 0x1fd   :  { %v1730_v16 = vadd.f32 %v4642_v17, %v1709_v4  ;;  %v5097_v2 = vand.u32 4294901760, %v5074_v46  ;;  %v5099_v37 = vand.u32 4294901760, %v5078_v48  ;;  %v5100_v5 = vand.u32 4294901760, %v5080_v13 }
 0x1fe   :  { %v1783_v26 = vrot.slane %v1737_v6, 3  ;;  %v1715_v33 = vrot.slane %v1714_v21, 1  ;;  %v5101_v63 = vand.u32 4294901760, %v5082_v43  ;;  %v5102_v4 = vand.u32 4294901760, %v5084_v61 }
 0x1ff   :  { %v1738_v39 = vmax.f32 %v1730_v16, 0.0  ;;  %v5103_v6 = vand.u32 4294901760, %v5086_v58  ;;  %v5106_v16 = vand.u32 4294901760, %v5090_v41 }
 0x200   :  { %v1716_v22 = vmax.f32 %v1714_v21, %v1715_v33  ;;  %v1785_v25 = vsel %vm1784_vm10, %v1783_v26, %v1782_v23  ;;  %v5104_v21 = vand.u32 4294901760, %v5088_v32  ;;  %v5105_v23 = vand.u32 4294901760, %v5089_v53 }
 0x201   :  { %v1786_v40 = vrot.slane %v1738_v39, 2  ;;  %v5107_v26 = vand.u32 4294901760, %v5091_v20 }
 0x202   :  { %v1731_v45 = vadd.f32 %v4642_v17, %v1716_v22 }
 0x203   :  { %v1788_v30 = vsel %vm1787_vm11, %v1786_v40, %v1785_v25 }
 0x204   :  { %v1739_v28 = vmax.f32 %v1731_v45, 0.0 }
 0x206   :  { %v1789_v44 = vrot.slane %v1739_v28, 1 }
 0x208   :  { %v1791_v34 = vsel %vm1790_vm12, %v1789_v44, %v1788_v30  ;;  %v2451_v30 = vld [vmem:[%s4837_s5] ss:$0 sm:$0xff] }
 0x209   :  { %v4665_v36 = vand.u32 4294901760, %v1791_v34 }
 0x20b   :  { %v4668_v54 = vsub.f32 %v1791_v34, %v4665_v36  ;;  %3150 = vmatmul.mubr.f32.vlgmr.msra.gmra.mxu1 %v4665_v36 }
 0x20c   :  { %3188 = vmatpush3.msra.mxu1 %v5059_v14  ;;  %3219 = vmatprep.mubr.msk.f32.mxu1 %vm3325_vm3, %v5060_v3 }
 0x20d   :  { %3189 = vmatprep.subr.mxu1 %v5060_v3  ;;  %v1876_v17 = vand.u32 4294901760, %v4668_v54 }
 0x20e   :  { %3190 = vmatpush3.msra.mxu1 %v5061_v10 }
 0x20f   :  { %3191 = vmatprep.subr.mxu1 %v5060_v3  ;;  %v1877_v8 = vsub.f32 %v4668_v54, %v1876_v17 }
 0x210   :  { %3192 = vmatpush3.msra.mxu1 %v5062_v31 }
 0x211   :  { %3193 = vmatprep.subr.mxu1 %v5060_v3  ;;  %v1878_v47 = vand.u32 4294901760, %v1877_v8 }
 0x212   :  { %3194 = vmatpush3.msra.mxu1 %v5063_v19 }
 0x213   :  { %3195 = vmatprep.subr.mxu1 %v5060_v3  ;;  %3115 = vmatmul.mubr.f32.vlgmr.msra.gmra.mxu0 %v1878_v47 }
 0x214   :  { %3153 = vmatpush3.msra.mxu0 %v5064_v57  ;;  %3196 = vmatpush3.msra.mxu1 %v5065_v0 }
 0x215   :  { %3154 = vmatprep.subr.mxu0 %v5060_v3  ;;  %3197 = vmatprep.subr.mxu1 %v5060_v3 }
 0x216   :  { %3155 = vmatpush3.msra.mxu0 %v5066_v12  ;;  %3198 = vmatpush3.msra.mxu1 %v5067_v55 }
 0x217   :  { %3156 = vmatprep.subr.mxu0 %v5060_v3  ;;  %3199 = vmatprep.subr.mxu1 %v5060_v3 }
 0x218   :  { %3157 = vmatpush3.msra.mxu0 %v5068_v24  ;;  %3200 = vmatpush3.msra.mxu1 %v5069_v60 }
 0x219   :  { %3158 = vmatprep.subr.mxu0 %v5060_v3  ;;  %3201 = vmatprep.subr.mxu1 %v5060_v3 }
 0x21a   :  { %3159 = vmatpush3.msra.mxu0 %v5070_v29  ;;  %3202 = vmatpush3.msra.mxu1 %v5071_v52 }
 0x21b   :  { %3160 = vmatprep.subr.mxu0 %v5060_v3  ;;  %3203 = vmatprep.subr.mxu1 %v5060_v3 }
 0x21c   :  { %3161 = vmatpush3.msra.mxu0 %v5072_v42  ;;  %3204 = vmatpush3.msra.mxu1 %v5073_v11 }
 0x21d   :  { %3162 = vmatprep.subr.mxu0 %v5060_v3  ;;  %3205 = vmatprep.subr.mxu1 %v5060_v3 }
 0x21e   :  { %3163 = vmatpush3.msra.mxu0 %v5074_v46  ;;  %3206 = vmatpush3.msra.mxu1 %v5075_v56 }
 0x21f   :  { %3164 = vmatprep.subr.mxu0 %v5060_v3  ;;  %3207 = vmatprep.subr.mxu1 %v5060_v3 }
 0x220   :  { %3165 = vmatpush3.msra.mxu0 %v5076_v51  ;;  %3208 = vmatpush3.msra.mxu1 %v5077_v49 }
 0x221   :  { %3166 = vmatprep.subr.mxu0 %v5060_v3  ;;  %3209 = vmatprep.subr.mxu1 %v5060_v3 }
 0x222   :  { %3167 = vmatpush3.msra.mxu0 %v5078_v48  ;;  %3210 = vmatpush3.msra.mxu1 %v5079_v15 }
 0x223   :  { %3168 = vmatprep.subr.mxu0 %v5060_v3  ;;  %3211 = vmatprep.subr.mxu1 %v5060_v3 }
 0x224   :  { %3169 = vmatpush3.msra.mxu0 %v5080_v13  ;;  %3212 = vmatpush3.msra.mxu1 %v5081_v18 }
 0x225   :  { %3170 = vmatprep.subr.mxu0 %v5060_v3  ;;  %3213 = vmatprep.subr.mxu1 %v5060_v3 }
 0x226   :  { %3171 = vmatpush3.msra.mxu0 %v5082_v43  ;;  %3214 = vmatpush3.msra.mxu1 %v5083_v7 }
 0x227   :  { %3172 = vmatprep.subr.mxu0 %v5060_v3  ;;  %3215 = vmatprep.subr.mxu1 %v5060_v3 }
 0x228   :  { %3173 = vmatpush3.msra.mxu0 %v5084_v61  ;;  %3216 = vmatpush3.msra.mxu1 %v5085_v35 }
 0x229   :  { %3174 = vmatprep.subr.mxu0 %v5060_v3  ;;  %3217 = vmatprep.subr.mxu1 %v5060_v3 }
 0x22a   :  { %3175 = vmatpush3.msra.mxu0 %v5086_v58  ;;  %3218 = vmatpush3.msra.mxu1 %v5087_v27 }
 0x22b   :  { %3176 = vmatprep.subr.mxu0 %v5060_v3  ;;  %3220 = vmatmul.mubr.f32.vlgmr.msra.gmra.mxu1 %v1876_v17 }
 0x22c   :  { %3257 = vmatprep.subr.mxu1 %v5060_v3  ;;  %3177 = vmatpush3.msra.mxu0 %v5088_v32 }
 0x22d   :  { %3258 = vmatpush3.msra.mxu1 %v5059_v14  ;;  %3178 = vmatprep.subr.mxu0 %v5060_v3 }
 0x22e   :  { %3259 = vmatprep.subr.mxu1 %v5060_v3  ;;  %3179 = vmatpush3.msra.mxu0 %v5089_v53 }
 0x22f   :  { %3260 = vmatpush3.msra.mxu1 %v5061_v10  ;;  %3180 = vmatprep.subr.mxu0 %v5060_v3 }
 0x230   :  { %3261 = vmatprep.subr.mxu1 %v5060_v3  ;;  %3181 = vmatpush3.msra.mxu0 %v5090_v41 }
 0x231   :  { %3262 = vmatpush3.msra.mxu1 %v5062_v31  ;;  %3182 = vmatprep.subr.mxu0 %v5060_v3 }
 0x232   :  { %3263 = vmatprep.subr.mxu1 %v5060_v3  ;;  %3183 = vmatpush3.msra.mxu0 %v5091_v20 }
 0x233   :  { %3184 = vmatprep.mubr.msk.f32.mxu0 %vm3325_vm3, %v5060_v3  ;;  %3264 = vmatpush3.msra.mxu1 %v5063_v19 }
 0x234   :  { %3185 = vmatmul.mubr.f32.vlgmr.msra.gmra.mxu0 %v4668_v54  ;;  %3222 = vmatprep.subr.mxu0 %v5060_v3 }
 0x235   :  { %3265 = vmatprep.subr.mxu1 %v5060_v3  ;;  %3223 = vmatpush3.msra.mxu0 %v5092_v38 }
 0x236   :  { %3266 = vmatpush3.msra.mxu1 %v5065_v0  ;;  %3224 = vmatprep.subr.mxu0 %v5060_v3 }
 0x237   :  { %3267 = vmatprep.subr.mxu1 %v5060_v3  ;;  %3225 = vmatpush3.msra.mxu0 %v5093_v59 }
 0x238   :  { %3268 = vmatpush3.msra.mxu1 %v5067_v55  ;;  %3226 = vmatprep.subr.mxu0 %v5060_v3 }
 0x239   :  { %3269 = vmatprep.subr.mxu1 %v5060_v3  ;;  %3227 = vmatpush3.msra.mxu0 %v5094_v50 }
 0x23a   :  { %3270 = vmatpush3.msra.mxu1 %v5069_v60  ;;  %3228 = vmatprep.subr.mxu0 %v5060_v3 }
 0x23b   :  { %3271 = vmatprep.subr.mxu1 %v5060_v3  ;;  %3229 = vmatpush3.msra.mxu0 %v5095_v9 }
 0x23c   :  { %3272 = vmatpush3.msra.mxu1 %v5071_v52  ;;  %3230 = vmatprep.subr.mxu0 %v5060_v3 }
 0x23d   :  { %3273 = vmatprep.subr.mxu1 %v5060_v3  ;;  %3231 = vmatpush3.msra.mxu0 %v5096_v1 }
 0x23e   :  { %3274 = vmatpush3.msra.mxu1 %v5073_v11  ;;  %3232 = vmatprep.subr.mxu0 %v5060_v3 }
 0x23f   :  { %3275 = vmatprep.subr.mxu1 %v5060_v3  ;;  %3233 = vmatpush3.msra.mxu0 %v5097_v2 }
 0x240   :  { %3276 = vmatpush3.msra.mxu1 %v5075_v56  ;;  %3234 = vmatprep.subr.mxu0 %v5060_v3 }
 0x241   :  { %3277 = vmatprep.subr.mxu1 %v5060_v3  ;;  %3235 = vmatpush3.msra.mxu0 %v5098_v62 }
 0x242   :  { %3278 = vmatpush3.msra.mxu1 %v5077_v49  ;;  %3236 = vmatprep.subr.mxu0 %v5060_v3 }
 0x243   :  { %3279 = vmatprep.subr.mxu1 %v5060_v3  ;;  %3237 = vmatpush3.msra.mxu0 %v5099_v37 }
 0x244   :  { %3280 = vmatpush3.msra.mxu1 %v5079_v15  ;;  %3238 = vmatprep.subr.mxu0 %v5060_v3 }
 0x245   :  { %3281 = vmatprep.subr.mxu1 %v5060_v3  ;;  %3239 = vmatpush3.msra.mxu0 %v5100_v5 }
 0x246   :  { %3282 = vmatpush3.msra.mxu1 %v5081_v18  ;;  %3240 = vmatprep.subr.mxu0 %v5060_v3 }
 0x247   :  { %3283 = vmatprep.subr.mxu1 %v5060_v3  ;;  %3241 = vmatpush3.msra.mxu0 %v5101_v63 }
 0x248   :  { %3284 = vmatpush3.msra.mxu1 %v5083_v7  ;;  %3242 = vmatprep.subr.mxu0 %v5060_v3 }
 0x249   :  { %3285 = vmatprep.subr.mxu1 %v5060_v3  ;;  %3243 = vmatpush3.msra.mxu0 %v5102_v4 }
 0x24a   :  { %3286 = vmatpush3.msra.mxu1 %v5085_v35  ;;  %3244 = vmatprep.subr.mxu0 %v5060_v3 }
 0x24b   :  { %3287 = vmatprep.subr.mxu1 %v5060_v3  ;;  %3245 = vmatpush3.msra.mxu0 %v5103_v6 }
 0x24c   :  { %3288 = vmatpush3.msra.mxu1 %v5087_v27  ;;  %3289 = vmatprep.mubr.msk.f32.mxu1 %vm3325_vm3, %v5060_v3 }
 0x24d   :  { %3246 = vmatprep.subr.mxu0 %v5060_v3  ;;  %3290 = vmatmul.mubr.f32.vlgmr.msra.gmra.mxu1 %v4665_v36 }
 0x24e   :  { %3247 = vmatpush3.msra.mxu0 %v5104_v21  ;;  %3254 = vmatprep.mubr.msk.f32.mxu0 %vm3325_vm3, %v5060_v3 }
 0x24f   :  { %3248 = vmatprep.subr.mxu0 %v5060_v3 }
 0x250   :  { %3249 = vmatpush3.msra.mxu0 %v5105_v23 }
 0x251   :  { %3250 = vmatprep.subr.mxu0 %v5060_v3 }
 0x252   :  { %3251 = vmatpush3.msra.mxu0 %v5106_v16 }
 0x253   :  { %3252 = vmatprep.subr.mxu0 %v5060_v3 }
 0x254   :  { %3253 = vmatpush3.msra.mxu0 %v5107_v26 }
 0x255   :  { %3255 = vmatmul.mubr.f32.vlgmr.msra.gmra.mxu0 %v4665_v36 }
 0x2cb   :  { %v2031_v33 = vpop.f32.mrf.mxu1 }
 0x2cd   :  { %v3151_v39 = vpop.f32.mrf.mxu1 }
 0x2d3   :  { %v1880_v22 = vpop.f32.mrf.mxu0 }
 0x2d4   :  { %v1881_v34 = vadd.f32 %v2451_v30, %v1880_v22 }
 0x2d5   :  { %v3116_v25 = vpop.f32.mrf.mxu0 }
 0x2d6   :  { %v2032_v14 = vadd.f32 %v2031_v33, %v1881_v34 }
 0x2eb   :  { %v2224_v45 = vpop.f32.mrf.mxu1 }
 0x2ed   :  { %v3221_v40 = vpop.f32.mrf.mxu1 }
 0x2f4   :  { %v2135_v28 = vpop.f32.mrf.mxu0 }
 0x2f5   :  { %v2136_v17 = vadd.f32 %v2135_v28, %v2032_v14 }
 0x2f6   :  { %v3186_v44 = vpop.f32.mrf.mxu0 }
 0x2f7   :  { %v2225_v10 = vadd.f32 %v2224_v45, %v2136_v17 }
 0x30d   :  { %v2430_v54 = vpop.f32.mrf.mxu1 }
 0x30f   :  { %v3291_v3 = vpop.f32.mrf.mxu1 }
 0x315   :  { %v2343_v8 = vpop.f32.mrf.mxu0 }
 0x316   :  { %v2344_v36 = vadd.f32 %v2343_v8, %v2225_v10 }
 0x317   :  { %v3256_v31 = vpop.f32.mrf.mxu0 }
 0x318   :  { %v2431_v47 = vadd.f32 %v2430_v54, %v2344_v36 }
 0x31a   :  { %2434 = vst [vmem:[#allocation2] sm:$0xff] %v2431_v47 }
 0x31b   :  { %3310 = shalt.err (!%p3307_p4)
}
 0x31c   :  { %2444 = dma.vmem_to_hbm [thread:$0]  %s2442_s12, 128, %s4838_s6, [#allocation3]  }
 0x31d   :  { %3319 = dma.done.wait [#allocation3], 128  }
 0x31e   :  { %3320 = vsyncadd [#allocation3], 4294967168 }
 0x31f   :  { %2448 = vsyncpa [#allocation3], 1 }

</bundles_post_ra>
